<compile_context>
chip_gen: v7x
topology: tpu7x:2x2x1
jax: 0.10.0
libtpu: 0.0.40
codegen_flags: <defaults>
</compile_context>

<pallas_src>
import functools

import numpy as np
import jax
import jax.numpy as jnp
from jax.experimental import pallas as pl
from jax.experimental.pallas import tpu as pltpu


def _round_up(x, m):
    return ((x + m - 1) // m) * m


# ----------------------------------------------------------------------------
# Tiled fused matmul kernel:  out = act(x @ w + b)
#   - bf16 operands on the MXU, f32 accumulation
#   - K fits one tile  -> scratch-free single-shot kernel, grid=(M/tm, N/tn)
#   - K needs tiling   -> grid=(M/tm, N/tn, K/tk) with f32 VMEM accumulator
# ----------------------------------------------------------------------------
_SQRT_2_OVER_PI = 0.7978845608028654


def _apply_act(y, act):
    if act == "relu":
        return jnp.maximum(y, 0.0)
    if act == "gelu":
        # tanh-approx GELU: tanh runs on the EUP (own VLIW slot), unlike erf.
        return 0.5 * y * (1.0 + jnp.tanh(_SQRT_2_OVER_PI * (y + 0.044715 * y * y * y)))
    return y


def _mm_kernel_single(x_ref, w_ref, b_ref, o_ref, *, act):
    y = jnp.dot(x_ref[...], w_ref[...], preferred_element_type=jnp.float32) + b_ref[...]
    o_ref[...] = _apply_act(y, act).astype(o_ref.dtype)


def _mm_kernel_acc(x_ref, w_ref, b_ref, o_ref, acc_ref, *, act):
    @pl.when(pl.program_id(2) == 0)
    def _():
        acc_ref[...] = jnp.zeros_like(acc_ref)

    acc_ref[...] += jnp.dot(x_ref[...], w_ref[...],
                            preferred_element_type=jnp.float32)

    @pl.when(pl.program_id(2) == pl.num_programs(2) - 1)
    def _():
        y = acc_ref[...] + b_ref[...]
        o_ref[...] = _apply_act(y, act).astype(o_ref.dtype)


def fused_matmul(x, w, b=None, act="none", out_dtype=jnp.float32,
                 tm_max=512, tn_max=512, tk_max=512):
    """x: (M, K), w: (K, N) -> (M, N) out_dtype. Pads M/N/K internally."""
    M, K = x.shape
    Kw, N = w.shape
    assert K == Kw
    if b is None:
        b = jnp.zeros((N,), jnp.float32)

    Kp = _round_up(K, 128)
    tk = tk_max if Kp > tk_max else Kp
    Kp = _round_up(Kp, tk)
    Np = _round_up(N, 128)
    tn = tn_max if Np > tn_max else Np
    Np = _round_up(Np, tn)
    Mp = _round_up(M, 8)
    tm = tm_max if Mp > tm_max else Mp
    Mp = _round_up(Mp, tm)

    xb = jnp.pad(x, ((0, Mp - M), (0, Kp - K))).astype(jnp.bfloat16)
    wb = jnp.pad(w, ((0, Kp - K), (0, Np - N))).astype(jnp.bfloat16)
    bb = jnp.pad(b.astype(jnp.float32), (0, Np - N)).reshape(1, Np)

    if Kp // tk == 1:
        out = pl.pallas_call(
            functools.partial(_mm_kernel_single, act=act),
            out_shape=jax.ShapeDtypeStruct((Mp, Np), out_dtype),
            grid=(Mp // tm, Np // tn),
            in_specs=[
                pl.BlockSpec((tm, Kp), lambda i, j: (i, 0)),
                pl.BlockSpec((Kp, tn), lambda i, j: (0, j)),
                pl.BlockSpec((1, tn), lambda i, j: (0, j)),
            ],
            out_specs=pl.BlockSpec((tm, tn), lambda i, j: (i, j)),
            compiler_params=pltpu.CompilerParams(
                dimension_semantics=("parallel", "parallel")),
        )(xb, wb, bb)
    else:
        out = pl.pallas_call(
            functools.partial(_mm_kernel_acc, act=act),
            out_shape=jax.ShapeDtypeStruct((Mp, Np), out_dtype),
            grid=(Mp // tm, Np // tn, Kp // tk),
            in_specs=[
                pl.BlockSpec((tm, tk), lambda i, j, k: (i, k)),
                pl.BlockSpec((tk, tn), lambda i, j, k: (k, j)),
                pl.BlockSpec((1, tn), lambda i, j, k: (0, j)),
            ],
            out_specs=pl.BlockSpec((tm, tn), lambda i, j, k: (i, j)),
            scratch_shapes=[pltpu.VMEM((tm, tn), jnp.float32)],
            compiler_params=pltpu.CompilerParams(
                dimension_semantics=("parallel", "parallel", "arbitrary")),
        )(xb, wb, bb)

    if Mp != M or Np != N:
        out = out[:M, :N]
    return out


# ----------------------------------------------------------------------------
# Fused decoder tail (concat-free):
#   logits = relu(x3@w1_0 + x2@w1_1 + x1@w1_2 + x0@w1_3 + b1) @ w2 + b2
# The concat of the four projected levels never materializes in HBM; BN(eval)
# is already folded into (w1, b1); ReLU + linear_pred happen in-kernel.
# ----------------------------------------------------------------------------
def _fuse_pred_kernel(x0_ref, x1_ref, x2_ref, x3_ref,
                      w1_ref, b1_ref, w2_ref, b2_ref, o_ref, *, ep):
    h = jnp.dot(x0_ref[...], w1_ref[0 * ep:1 * ep, :],
                preferred_element_type=jnp.float32)
    h = h + jnp.dot(x1_ref[...], w1_ref[1 * ep:2 * ep, :],
                    preferred_element_type=jnp.float32)
    h = h + jnp.dot(x2_ref[...], w1_ref[2 * ep:3 * ep, :],
                    preferred_element_type=jnp.float32)
    h = h + jnp.dot(x3_ref[...], w1_ref[3 * ep:4 * ep, :],
                    preferred_element_type=jnp.float32)
    h = jnp.maximum(h + b1_ref[...], 0.0)
    o = jnp.dot(h.astype(w2_ref.dtype), w2_ref[...],
                preferred_element_type=jnp.float32)
    o_ref[...] = (o + b2_ref[...]).astype(o_ref.dtype)


def fuse_pred(xs, w1, b1, w2, b2, tm_max=512):
    """xs: list of 4 (M, EP) arrays, concat order already applied."""
    M, ep = xs[0].shape
    n1 = w1.shape[1]
    n2 = w2.shape[1]
    assert w1.shape[0] == 4 * ep and w2.shape[0] == n1
    Mp = _round_up(M, 8)
    tm = tm_max if Mp > tm_max else Mp
    Mp = _round_up(Mp, tm)

    xbs = [jnp.pad(x, ((0, Mp - M), (0, 0))).astype(jnp.bfloat16) for x in xs]
    out = pl.pallas_call(
        functools.partial(_fuse_pred_kernel, ep=ep),
        out_shape=jax.ShapeDtypeStruct((Mp, n2), jnp.float32),
        grid=(Mp // tm,),
        in_specs=[
            pl.BlockSpec((tm, ep), lambda i: (i, 0)),
            pl.BlockSpec((tm, ep), lambda i: (i, 0)),
            pl.BlockSpec((tm, ep), lambda i: (i, 0)),
            pl.BlockSpec((tm, ep), lambda i: (i, 0)),
            pl.BlockSpec((4 * ep, n1), lambda i: (0, 0)),
            pl.BlockSpec((1, n1), lambda i: (0, 0)),
            pl.BlockSpec((n1, n2), lambda i: (0, 0)),
            pl.BlockSpec((1, n2), lambda i: (0, 0)),
        ],
        out_specs=pl.BlockSpec((tm, n2), lambda i: (i, 0)),
        compiler_params=pltpu.CompilerParams(dimension_semantics=("parallel",)),
    )(*xbs, w1.astype(jnp.bfloat16), b1.reshape(1, n1).astype(jnp.float32),
      w2.astype(jnp.bfloat16), b2.reshape(1, n2).astype(jnp.float32))
    return out[:M] if Mp != M else out


# ----------------------------------------------------------------------------
# Bilinear interpolation (align_corners=False, PyTorch semantics).
# Separable interpolation expressed as two transpose-free Pallas kernels:
#   H-interp:  per batch n,  out[t] = Ah_tile @ x[n]      (x[n] kept resident)
#   W-interp:  per 8-row block, 8 small matmuls  Aw @ y[n, row]
# Output dtype matches the input dtype (bf16 features stay bf16).
# ----------------------------------------------------------------------------
@functools.lru_cache(maxsize=None)
def _bilinear_matrix_np(out_size, in_size):
    A = np.zeros((out_size, in_size), np.float32)
    if in_size == 1:
        A[:, 0] = 1.0
        return A
    scale = in_size / out_size
    for o in range(out_size):
        src = max((o + 0.5) * scale - 0.5, 0.0)       # PyTorch clamps negative src
        i0 = min(int(np.floor(src)), in_size - 1)
        i1 = min(i0 + 1, in_size - 1)
        frac = src - i0
        A[o, i0] += 1.0 - frac
        A[o, i1] += frac
    return A


def _interp_matrix(out_size, in_size, out_pad, in_pad, dtype):
    A = _bilinear_matrix_np(out_size, in_size)
    A = np.pad(A, ((0, out_pad - out_size), (0, in_pad - in_size)))
    return jnp.asarray(A, dtype=dtype)


def _h_interp_kernel(a_ref, x_ref, o_ref):
    o_ref[...] = jnp.dot(a_ref[...], x_ref[...],
                         preferred_element_type=jnp.float32).astype(o_ref.dtype)


def _w_interp_kernel(a_ref, y_ref, o_ref, *, rb):
    a = a_ref[...]
    for r in range(rb):                       # static unroll (rb small)
        o_ref[r] = jnp.dot(a, y_ref[r],
                           preferred_element_type=jnp.float32).astype(o_ref.dtype)


def bilinear_resize_nhwc(x, out_h, out_w):
    """Upsample (N, H, W, C) -> (N, out_h, out_w, C), no HBM transposes."""
    n, h, w, c = x.shape
    dt = x.dtype
    hp = _round_up(h, 8)                      # pad tiny contraction dims
    wp = _round_up(w, 8)
    THO = min(_round_up(out_h, 8), 64)        # output-row tile for H interp
    Hop = _round_up(out_h, THO)
    Wop = _round_up(out_w, 8)
    RB = 8                                    # output-row block for W interp

    Ah = _interp_matrix(out_h, h, Hop, hp, dt)    # (Hop, hp)
    Aw = _interp_matrix(out_w, w, Wop, wp, dt)    # (Wop, wp)

    wc = w * c
    x2 = x.reshape(n, h, wc)
    if hp != h:
        x2 = jnp.pad(x2, ((0, 0), (0, hp - h), (0, 0)))

    # --- interpolate along H:  (Hop, hp) @ (hp, W*C) per batch element ---
    y = pl.pallas_call(
        _h_interp_kernel,
        out_shape=jax.ShapeDtypeStruct((n, Hop, wc), dt),
        grid=(n, Hop // THO),
        in_specs=[
            pl.BlockSpec((THO, hp), lambda i, t: (t, 0)),
            pl.BlockSpec((None, hp, wc), lambda i, t: (i, 0, 0)),
        ],
        out_specs=pl.BlockSpec((None, THO, wc), lambda i, t: (i, t, 0)),
        compiler_params=pltpu.CompilerParams(
            dimension_semantics=("parallel", "arbitrary")),
    )(Ah, x2)

    y = y.reshape(n, Hop, w, c)
    if wp != w:
        y = jnp.pad(y, ((0, 0), (0, 0), (0, wp - w), (0, 0)))

    # --- interpolate along W:  (Wop, wp) @ (wp, C) per output row ---
    z = pl.pallas_call(
        functools.partial(_w_interp_kernel, rb=RB),
        out_shape=jax.ShapeDtypeStruct((n, Hop, Wop, c), dt),
        grid=(n, Hop // RB),
        in_specs=[
            pl.BlockSpec((Wop, wp), lambda i, t: (0, 0)),
            pl.BlockSpec((None, RB, wp, c), lambda i, t: (i, t, 0, 0)),
        ],
        out_specs=pl.BlockSpec((None, RB, Wop, c), lambda i, t: (i, t, 0, 0)),
        compiler_params=pltpu.CompilerParams(
            dimension_semantics=("parallel", "parallel")),
    )(Aw, y)

    if Hop != out_h or Wop != out_w:
        z = z[:, :out_h, :out_w, :]
    return z


# ----------------------------------------------------------------------------
# Patch-embed "conv" (kernel == stride) as patch reshape + tiled matmul.
# ----------------------------------------------------------------------------
def patch_embed(x, w, b, patch, act="gelu"):
    n, h, ww, c = x.shape
    ph, pw = h // patch, ww // patch
    xp = (x.reshape(n, ph, patch, pw, patch, c)
            .transpose(0, 1, 3, 2, 4, 5)
            .reshape(n * ph * pw, patch * patch * c))
    y = fused_matmul(xp, w, b, act=act, out_dtype=jnp.bfloat16)
    return y.reshape(n, ph, pw, -1)


# ----------------------------------------------------------------------------
# Parameters: logical DFormer-Tiny / MLPDecoder shapes, then a one-time prep
# pass that folds BN(eval) into the fuse weights and zero-pads every channel
# dimension to a lane-dense (multiple-of-128) width.
# ----------------------------------------------------------------------------
CHANNELS = [32, 64, 128, 256]     # DFormer-Tiny
EMBED_DIM = 64                    # cfg.decoder_embed_dim (logical)
NUM_CLASSES = 8                   # cfg.num_classes       (logical)

C_PAD = [128, 128, 128, 256]      # lane-dense backbone channels
EP = 128                          # padded embed dim
CP = 128                          # padded class dim


def init_params(key):
    p = {}
    def nrm(k, shape):
        return jax.random.normal(k, shape, jnp.float32) * 0.02
    keys = jax.random.split(key, 16)
    # backbone patch-embed pyramid: 6 -> 32 -> 64 -> 128 -> 256
    p["stem_w"]  = nrm(keys[0], (4 * 4 * 6, CHANNELS[0]));            p["stem_b"]  = jnp.zeros((CHANNELS[0],))
    p["down1_w"] = nrm(keys[1], (2 * 2 * CHANNELS[0], CHANNELS[1]));  p["down1_b"] = jnp.zeros((CHANNELS[1],))
    p["down2_w"] = nrm(keys[2], (2 * 2 * CHANNELS[1], CHANNELS[2]));  p["down2_b"] = jnp.zeros((CHANNELS[2],))
    p["down3_w"] = nrm(keys[3], (2 * 2 * CHANNELS[2], CHANNELS[3]));  p["down3_b"] = jnp.zeros((CHANNELS[3],))
    # MLPDecoder per-level 1x1 projections
    for i, c in enumerate(CHANNELS):
        p[f"proj{i}_w"] = nrm(keys[4 + i], (c, EMBED_DIM))
        p[f"proj{i}_b"] = jnp.zeros((EMBED_DIM,))
    # linear_fuse: 1x1 conv(4*E -> E) + BN(eval) + ReLU
    p["fuse_w"] = nrm(keys[8], (4 * EMBED_DIM, EMBED_DIM)); p["fuse_b"] = jnp.zeros((EMBED_DIM,))
    p["fuse_bn_scale"] = jnp.ones((EMBED_DIM,)); p["fuse_bn_shift"] = jnp.zeros((EMBED_DIM,))
    # linear_pred: 1x1 conv(E -> num_classes)
    p["pred_w"] = nrm(keys[9], (EMBED_DIM, NUM_CLASSES)); p["pred_b"] = jnp.zeros((NUM_CLASSES,))
    return p


def prepare_params(p):
    """Fold BN, zero-pad channels to 128-multiples, cast weights to bf16."""
    bf = lambda a: a.astype(jnp.bfloat16)
    f32 = lambda a: a.astype(jnp.float32)

    def pad2d(w, rpad, cpad):
        r, c = w.shape
        return jnp.pad(w, ((0, rpad - r), (0, cpad - c)))

    def padv(b, n):
        return jnp.pad(b, (0, n - b.shape[0]))

    def pad_groups(w, groups, cin_pad, cout_pad):
        gc, cout = w.shape
        cin = gc // groups
        w = w.reshape(groups, cin, cout)
        w = jnp.pad(w, ((0, 0), (0, cin_pad - cin), (0, cout_pad - cout)))
        return w.reshape(groups * cin_pad, cout_pad)

    pp = {}
    pp["stem_w"]  = bf(pad2d(p["stem_w"], p["stem_w"].shape[0], C_PAD[0]))
    pp["stem_b"]  = f32(padv(p["stem_b"], C_PAD[0]))
    pp["down1_w"] = bf(pad_groups(p["down1_w"], 4, C_PAD[0], C_PAD[1])); pp["down1_b"] = f32(padv(p["down1_b"], C_PAD[1]))
    pp["down2_w"] = bf(pad_groups(p["down2_w"], 4, C_PAD[1], C_PAD[2])); pp["down2_b"] = f32(padv(p["down2_b"], C_PAD[2]))
    pp["down3_w"] = bf(pad_groups(p["down3_w"], 4, C_PAD[2], C_PAD[3])); pp["down3_b"] = f32(padv(p["down3_b"], C_PAD[3]))
    for i in range(4):
        pp[f"proj{i}_w"] = bf(pad2d(p[f"proj{i}_w"], C_PAD[i], EP))
        pp[f"proj{i}_b"] = f32(padv(p[f"proj{i}_b"], EP))
    # fold BN(eval) into the fuse conv:  w' = w*scale,  b' = b*scale + shift
    fw = p["fuse_w"] * p["fuse_bn_scale"][None, :]
    fb = p["fuse_b"] * p["fuse_bn_scale"] + p["fuse_bn_shift"]
    pp["fuse_w"] = bf(pad_groups(fw, 4, EP, EP))
    pp["fuse_b"] = f32(padv(fb, EP))
    pp["pred_w"] = bf(pad2d(p["pred_w"], EP, CP))
    pp["pred_b"] = f32(padv(p["pred_b"], CP))
    return pp


# ----------------------------------------------------------------------------
# EncoderDecoder.forward  (no aux head, no label -> returns segmentation logits)
# ----------------------------------------------------------------------------
def encoder_decoder_forward(pp, rgb, modal_x):
    n, _, H, W = rgb.shape
    # NCHW -> NHWC, fuse RGB + modal at the stem.
    # TODO(synk): the real DFormer dual-branch attention backbone is not
    # reproducible here (source not provided); this is a patch-embed pyramid
    # producing feature maps with the same channels/strides [32,64,128,256]@[4,8,16,32].
    x = jnp.concatenate([jnp.transpose(rgb, (0, 2, 3, 1)),
                         jnp.transpose(modal_x, (0, 2, 3, 1))], axis=-1)
    f0 = patch_embed(x,  pp["stem_w"],  pp["stem_b"],  4)   # (N, H/4,  W/4,  128p) bf16
    f1 = patch_embed(f0, pp["down1_w"], pp["down1_b"], 2)   # (N, H/8,  W/8,  128p) bf16
    f2 = patch_embed(f1, pp["down2_w"], pp["down2_b"], 2)   # (N, H/16, W/16, 128p) bf16
    f3 = patch_embed(f2, pp["down3_w"], pp["down3_b"], 2)   # (N, H/32, W/32, 256)  bf16
    feats = [f0, f1, f2, f3]

    # --- MLPDecoder (DecoderHead), all channels kept lane-dense (128), bf16 ---
    Ho, Wo = f0.shape[1], f0.shape[2]
    proj = []
    for i, f in enumerate(feats):
        nb, h, w, c = f.shape
        y = fused_matmul(f.reshape(nb * h * w, c), pp[f"proj{i}_w"], pp[f"proj{i}_b"],
                         out_dtype=jnp.bfloat16)
        y = y.reshape(nb, h, w, EP)
        if (h, w) != (Ho, Wo):
            y = bilinear_resize_nhwc(y, Ho, Wo)
        proj.append(y.reshape(nb * Ho * Wo, EP))
    # MLPDecoder concatenates coarse-to-fine: [c4, c3, c2, c1] -> concat is
    # fused away: each level goes to its own slice of the fuse weight.
    logits = fuse_pred([proj[3], proj[2], proj[1], proj[0]],
                       pp["fuse_w"], pp["fuse_b"], pp["pred_w"], pp["pred_b"])
    logits = logits.reshape(n, Ho, Wo, CP)                   # padded classes, f32

    # --- encode_decode: upsample to input size (bilinear, align_corners=False) ---
    out = bilinear_resize_nhwc(logits, H, W)                 # (N, H, W, CP) f32
    out = out[:, :, :, :NUM_CLASSES]                         # drop lane padding
    return jnp.transpose(out, (0, 3, 1, 2))                  # NCHW to match PyTorch


if __name__ == "__main__":
    key = jax.random.PRNGKey(0)
    k_rgb, k_modal, k_param = jax.random.split(key, 3)

    N, H, W = 2, 32, 32
    rgb = jax.random.normal(k_rgb, (N, 3, H, W), jnp.float32)
    modal_x = jax.random.normal(k_modal, (N, 3, H, W), jnp.float32)

    params = init_params(k_param)
    pparams = prepare_params(params)

    fwd = jax.jit(encoder_decoder_forward)
    out = fwd(pparams, rgb, modal_x)
    out = jax.block_until_ready(out)

    assert out.shape == (N, NUM_CLASSES, H, W), out.shape
    assert bool(jnp.all(jnp.isfinite(out)))
    print("KERNEL_OK")
</pallas_src>

<mosaic_0001>
module attributes {stable_mosaic.version = 11 : i64} {
  func.func @_mm_kernel_single(%arg0: i32, %arg1: i32, %arg2: memref<128x128xbf16, #tpu.memory_space<vmem>>, %arg3: memref<128x128xbf16, #tpu.memory_space<vmem>>, %arg4: memref<1x128xf32, #tpu.memory_space<vmem>>, %arg5: memref<128x128xbf16, #tpu.memory_space<vmem>>) attributes {dimension_semantics = [#tpu.dimension_semantics<parallel>, #tpu.dimension_semantics<parallel>], iteration_bounds = array<i64: 1, 1>, scalar_prefetch = 0 : i64, scratch_operands = 0 : i64, tpu.core_type = #tpu.core_type<tc>, window_params = [{transform_indices = @transform_0, window_bounds = array<i64: 128, 128>}, {transform_indices = @transform_1, window_bounds = array<i64: 128, 128>}, {transform_indices = @transform_2, window_bounds = array<i64: 1, 128>}, {transform_indices = @transform_3, window_bounds = array<i64: 128, 128>}]} {
    %c0 = arith.constant 0 : index
    %c0_0 = arith.constant 0 : index
    %0 = vector.load %arg2[%c0, %c0_0] : memref<128x128xbf16, #tpu.memory_space<vmem>>, vector<128x128xbf16>
    %c0_1 = arith.constant 0 : index
    %c0_2 = arith.constant 0 : index
    %1 = vector.load %arg3[%c0_1, %c0_2] : memref<128x128xbf16, #tpu.memory_space<vmem>>, vector<128x128xbf16>
    %cst = arith.constant dense<0.000000e+00> : vector<128x128xf32>
    %2 = tpu.matmul %0, %1, %cst {dimension_numbers = #tpu.dot_dimension_numbers<[1], [0], [0], [1], [0, 0, 1, 1], [], []>} : vector<128x128xbf16>, vector<128x128xbf16>, vector<128x128xf32> -> vector<128x128xf32>
    %c0_3 = arith.constant 0 : index
    %c0_4 = arith.constant 0 : index
    %3 = vector.load %arg4[%c0_3, %c0_4] : memref<1x128xf32, #tpu.memory_space<vmem>>, vector<1x128xf32>
    %4 = vector.broadcast %3 : vector<1x128xf32> to vector<128x128xf32>
    %5 = arith.addf %2, %4 : vector<128x128xf32>
    %cst_5 = arith.constant 5.000000e-01 : f32
    %6 = vector.broadcast %cst_5 : f32 to vector<128x128xf32>
    %7 = arith.mulf %6, %5 : vector<128x128xf32>
    %cst_6 = arith.constant 4.471500e-02 : f32
    %8 = vector.broadcast %cst_6 : f32 to vector<128x128xf32>
    %9 = arith.mulf %8, %5 : vector<128x128xf32>
    %10 = arith.mulf %9, %5 : vector<128x128xf32>
    %11 = arith.mulf %10, %5 : vector<128x128xf32>
    %12 = arith.addf %5, %11 : vector<128x128xf32>
    %cst_7 = arith.constant 0.797884583 : f32
    %13 = vector.broadcast %cst_7 : f32 to vector<128x128xf32>
    %14 = arith.mulf %13, %12 : vector<128x128xf32>
    %15 = math.tanh %14 : vector<128x128xf32>
    %cst_8 = arith.constant 1.000000e+00 : f32
    %16 = vector.broadcast %cst_8 : f32 to vector<128x128xf32>
    %17 = arith.addf %16, %15 : vector<128x128xf32>
    %18 = arith.mulf %7, %17 : vector<128x128xf32>
    %19 = arith.truncf %18 : vector<128x128xf32> to vector<128x128xbf16>
    %c0_9 = arith.constant 0 : index
    %c0_10 = arith.constant 0 : index
    %20 = vector.load %arg5[%c0_9, %c0_10] : memref<128x128xbf16, #tpu.memory_space<vmem>>, vector<128x128xbf16>
    tpu.vector_store %arg5[%c0_9, %c0_10], %19 {strides = array<i32>} : memref<128x128xbf16, #tpu.memory_space<vmem>>, vector<128x128xbf16>,
    return
  }
  func.func @transform_0(%arg0: i32, %arg1: i32) -> (i32, i32) {
    %c0_i32 = arith.constant 0 : i32
    %c0_i32_0 = arith.constant 0 : i32
    return %arg0, %c0_i32 : i32, i32
  }
  func.func @transform_1(%arg0: i32, %arg1: i32) -> (i32, i32) {
    %c0_i32 = arith.constant 0 : i32
    %c0_i32_0 = arith.constant 0 : i32
    return %c0_i32, %arg1 : i32, i32
  }
  func.func @transform_2(%arg0: i32, %arg1: i32) -> (i32, i32) {
    %c0_i32 = arith.constant 0 : i32
    %c0_i32_0 = arith.constant 0 : i32
    return %c0_i32, %arg1 : i32, i32
  }
  func.func @transform_3(%arg0: i32, %arg1: i32) -> (i32, i32) {
    %c0_i32 = arith.constant 0 : i32
    return %arg0, %arg1 : i32, i32
  }
}

module attributes {stable_mosaic.version = 11 : i64} {
  func.func @_mm_kernel_single(%arg0: i32, %arg1: i32, %arg2: memref<32x512xbf16, #tpu.memory_space<vmem>>, %arg3: memref<512x128xbf16, #tpu.memory_space<vmem>>, %arg4: memref<1x128xf32, #tpu.memory_space<vmem>>, %arg5: memref<32x128xbf16, #tpu.memory_space<vmem>>) attributes {dimension_semantics = [#tpu.dimension_semantics<parallel>, #tpu.dimension_semantics<parallel>], iteration_bounds = array<i64: 1, 1>, scalar_prefetch = 0 : i64, scratch_operands = 0 : i64, tpu.core_type = #tpu.core_type<tc>, window_params = [{transform_indices = @transform_0, window_bounds = array<i64: 32, 512>}, {transform_indices = @transform_1, window_bounds = array<i64: 512, 128>}, {transform_indices = @transform_2, window_bounds = array<i64: 1, 128>}, {transform_indices = @transform_3, window_bounds = array<i64: 32, 128>}]} {
    %c0 = arith.constant 0 : index
    %c0_0 = arith.constant 0 : index
    %0 = vector.load %arg2[%c0, %c0_0] : memref<32x512xbf16, #tpu.memory_space<vmem>>, vector<32x512xbf16>
    %c0_1 = arith.constant 0 : index
    %c0_2 = arith.constant 0 : index
    %1 = vector.load %arg3[%c0_1, %c0_2] : memref<512x128xbf16, #tpu.memory_space<vmem>>, vector<512x128xbf16>
    %cst = arith.constant dense<0.000000e+00> : vector<32x128xf32>
    %2 = tpu.matmul %0, %1, %cst {dimension_numbers = #tpu.dot_dimension_numbers<[1], [0], [0], [1], [0, 0, 1, 1], [], []>} : vector<32x512xbf16>, vector<512x128xbf16>, vector<32x128xf32> -> vector<32x128xf32>
    %c0_3 = arith.constant 0 : index
    %c0_4 = arith.constant 0 : index
    %3 = vector.load %arg4[%c0_3, %c0_4] : memref<1x128xf32, #tpu.memory_space<vmem>>, vector<1x128xf32>
    %4 = vector.broadcast %3 : vector<1x128xf32> to vector<32x128xf32>
    %5 = arith.addf %2, %4 : vector<32x128xf32>
    %cst_5 = arith.constant 5.000000e-01 : f32
    %6 = vector.broadcast %cst_5 : f32 to vector<32x128xf32>
    %7 = arith.mulf %6, %5 : vector<32x128xf32>
    %cst_6 = arith.constant 4.471500e-02 : f32
    %8 = vector.broadcast %cst_6 : f32 to vector<32x128xf32>
    %9 = arith.mulf %8, %5 : vector<32x128xf32>
    %10 = arith.mulf %9, %5 : vector<32x128xf32>
    %11 = arith.mulf %10, %5 : vector<32x128xf32>
    %12 = arith.addf %5, %11 : vector<32x128xf32>
    %cst_7 = arith.constant 0.797884583 : f32
    %13 = vector.broadcast %cst_7 : f32 to vector<32x128xf32>
    %14 = arith.mulf %13, %12 : vector<32x128xf32>
    %15 = math.tanh %14 : vector<32x128xf32>
    %cst_8 = arith.constant 1.000000e+00 : f32
    %16 = vector.broadcast %cst_8 : f32 to vector<32x128xf32>
    %17 = arith.addf %16, %15 : vector<32x128xf32>
    %18 = arith.mulf %7, %17 : vector<32x128xf32>
    %19 = arith.truncf %18 : vector<32x128xf32> to vector<32x128xbf16>
    %c0_9 = arith.constant 0 : index
    %c0_10 = arith.constant 0 : index
    %20 = vector.load %arg5[%c0_9, %c0_10] : memref<32x128xbf16, #tpu.memory_space<vmem>>, vector<32x128xbf16>
    tpu.vector_store %arg5[%c0_9, %c0_10], %19 {strides = array<i32>} : memref<32x128xbf16, #tpu.memory_space<vmem>>, vector<32x128xbf16>,
    return
  }
  func.func @transform_0(%arg0: i32, %arg1: i32) -> (i32, i32) {
    %c0_i32 = arith.constant 0 : i32
    %c0_i32_0 = arith.constant 0 : i32
    return %arg0, %c0_i32 : i32, i32
  }
  func.func @transform_1(%arg0: i32, %arg1: i32) -> (i32, i32) {
    %c0_i32 = arith.constant 0 : i32
    %c0_i32_0 = arith.constant 0 : i32
    return %c0_i32, %arg1 : i32, i32
  }
  func.func @transform_2(%arg0: i32, %arg1: i32) -> (i32, i32) {
    %c0_i32 = arith.constant 0 : i32
    %c0_i32_0 = arith.constant 0 : i32
    return %c0_i32, %arg1 : i32, i32
  }
  func.func @transform_3(%arg0: i32, %arg1: i32) -> (i32, i32) {
    %c0_i32 = arith.constant 0 : i32
    return %arg0, %arg1 : i32, i32
  }
}

module attributes {stable_mosaic.version = 11 : i64} {
  func.func @_mm_kernel_single(%arg0: i32, %arg1: i32, %arg2: memref<8x128xbf16, #tpu.memory_space<vmem>>, %arg3: memref<128x128xbf16, #tpu.memory_space<vmem>>, %arg4: memref<1x128xf32, #tpu.memory_space<vmem>>, %arg5: memref<8x128xbf16, #tpu.memory_space<vmem>>) attributes {dimension_semantics = [#tpu.dimension_semantics<parallel>, #tpu.dimension_semantics<parallel>], iteration_bounds = array<i64: 1, 1>, scalar_prefetch = 0 : i64, scratch_operands = 0 : i64, tpu.core_type = #tpu.core_type<tc>, window_params = [{transform_indices = @transform_0, window_bounds = array<i64: 8, 128>}, {transform_indices = @transform_1, window_bounds = array<i64: 128, 128>}, {transform_indices = @transform_2, window_bounds = array<i64: 1, 128>}, {transform_indices = @transform_3, window_bounds = array<i64: 8, 128>}]} {
    %c0 = arith.constant 0 : index
    %c0_0 = arith.constant 0 : index
    %0 = vector.load %arg2[%c0, %c0_0] : memref<8x128xbf16, #tpu.memory_space<vmem>>, vector<8x128xbf16>
    %c0_1 = arith.constant 0 : index
    %c0_2 = arith.constant 0 : index
    %1 = vector.load %arg3[%c0_1, %c0_2] : memref<128x128xbf16, #tpu.memory_space<vmem>>, vector<128x128xbf16>
    %cst = arith.constant dense<0.000000e+00> : vector<8x128xf32>
    %2 = tpu.matmul %0, %1, %cst {dimension_numbers = #tpu.dot_dimension_numbers<[1], [0], [0], [1], [0, 0, 1, 1], [], []>} : vector<8x128xbf16>, vector<128x128xbf16>, vector<8x128xf32> -> vector<8x128xf32>
    %c0_3 = arith.constant 0 : index
    %c0_4 = arith.constant 0 : index
    %3 = vector.load %arg4[%c0_3, %c0_4] : memref<1x128xf32, #tpu.memory_space<vmem>>, vector<1x128xf32>
    %4 = vector.broadcast %3 : vector<1x128xf32> to vector<8x128xf32>
    %5 = arith.addf %2, %4 : vector<8x128xf32>
    %6 = arith.truncf %5 : vector<8x128xf32> to vector<8x128xbf16>
    %c0_5 = arith.constant 0 : index
    %c0_6 = arith.constant 0 : index
    %7 = vector.load %arg5[%c0_5, %c0_6] : memref<8x128xbf16, #tpu.memory_space<vmem>>, vector<8x128xbf16>
    tpu.vector_store %arg5[%c0_5, %c0_6], %6 {strides = array<i32>} : memref<8x128xbf16, #tpu.memory_space<vmem>>, vector<8x128xbf16>,
    return
  }
  func.func @transform_0(%arg0: i32, %arg1: i32) -> (i32, i32) {
    %c0_i32 = arith.constant 0 : i32
    %c0_i32_0 = arith.constant 0 : i32
    return %arg0, %c0_i32 : i32, i32
  }
  func.func @transform_1(%arg0: i32, %arg1: i32) -> (i32, i32) {
    %c0_i32 = arith.constant 0 : i32
    %c0_i32_0 = arith.constant 0 : i32
    return %c0_i32, %arg1 : i32, i32
  }
  func.func @transform_2(%arg0: i32, %arg1: i32) -> (i32, i32) {
    %c0_i32 = arith.constant 0 : i32
    %c0_i32_0 = arith.constant 0 : i32
    return %c0_i32, %arg1 : i32, i32
  }
  func.func @transform_3(%arg0: i32, %arg1: i32) -> (i32, i32) {
    %c0_i32 = arith.constant 0 : i32
    return %arg0, %arg1 : i32, i32
  }
}

module attributes {stable_mosaic.version = 11 : i64} {
  func.func @_h_interp_kernel(%arg0: i32, %arg1: i32, %arg2: memref<8x8xbf16, #tpu.memory_space<vmem>>, %arg3: memref<1x8x256xbf16, #tpu.memory_space<vmem>>, %arg4: memref<1x8x256xbf16, #tpu.memory_space<vmem>>) attributes {dimension_semantics = [#tpu.dimension_semantics<parallel>, #tpu.dimension_semantics<arbitrary>], iteration_bounds = array<i64: 2, 1>, scalar_prefetch = 0 : i64, scratch_operands = 0 : i64, tpu.core_type = #tpu.core_type<tc>, window_params = [{transform_indices = @transform_0, window_bounds = array<i64: 8, 8>}, {transform_indices = @transform_1, window_bounds = array<i64: 1, 8, 256>}, {transform_indices = @transform_2, window_bounds = array<i64: 1, 8, 256>}]} {
    %c0 = arith.constant 0 : index
    %c0_0 = arith.constant 0 : index
    %0 = vector.load %arg2[%c0, %c0_0] : memref<8x8xbf16, #tpu.memory_space<vmem>>, vector<8x8xbf16>
    %c0_1 = arith.constant 0 : index
    %c0_2 = arith.constant 0 : index
    %c0_3 = arith.constant 0 : index
    %1 = vector.load %arg3[%c0_1, %c0_2, %c0_3] : memref<1x8x256xbf16, #tpu.memory_space<vmem>>, vector<1x8x256xbf16>
    %2 = vector.shape_cast %1 : vector<1x8x256xbf16> to vector<8x256xbf16>
    %cst = arith.constant dense<0.000000e+00> : vector<8x256xf32>
    %3 = tpu.matmul %0, %2, %cst {dimension_numbers = #tpu.dot_dimension_numbers<[1], [0], [0], [1], [0, 0, 1, 1], [], []>} : vector<8x8xbf16>, vector<8x256xbf16>, vector<8x256xf32> -> vector<8x256xf32>
    %4 = arith.truncf %3 : vector<8x256xf32> to vector<8x256xbf16>
    %c0_4 = arith.constant 0 : index
    %c0_5 = arith.constant 0 : index
    %c0_6 = arith.constant 0 : index
    %5 = vector.load %arg4[%c0_4, %c0_5, %c0_6] : memref<1x8x256xbf16, #tpu.memory_space<vmem>>, vector<1x8x256xbf16>
    %6 = vector.shape_cast %5 : vector<1x8x256xbf16> to vector<8x256xbf16>
    %7 = vector.shape_cast %4 : vector<8x256xbf16> to vector<1x8x256xbf16>
    tpu.vector_store %arg4[%c0_4, %c0_5, %c0_6], %7 {strides = array<i32>} : memref<1x8x256xbf16, #tpu.memory_space<vmem>>, vector<1x8x256xbf16>,
    return
  }
  func.func @transform_0(%arg0: i32, %arg1: i32) -> (i32, i32) {
    %c0_i32 = arith.constant 0 : i32
    %c0_i32_0 = arith.constant 0 : i32
    return %arg1, %c0_i32 : i32, i32
  }
  func.func @transform_1(%arg0: i32, %arg1: i32) -> (i32, i32, i32) {
    %c0_i32 = arith.constant 0 : i32
    %c0_i32_0 = arith.constant 0 : i32
    %c0_i32_1 = arith.constant 0 : i32
    return %arg0, %c0_i32, %c0_i32_0 : i32, i32, i32
  }
  func.func @transform_2(%arg0: i32, %arg1: i32) -> (i32, i32, i32) {
    %c0_i32 = arith.constant 0 : i32
    %c0_i32_0 = arith.constant 0 : i32
    return %arg0, %arg1, %c0_i32 : i32, i32, i32
  }
}

module attributes {stable_mosaic.version = 11 : i64} {
  func.func @_mm_kernel_single(%arg0: i32, %arg1: i32, %arg2: memref<8x512xbf16, #tpu.memory_space<vmem>>, %arg3: memref<512x128xbf16, #tpu.memory_space<vmem>>, %arg4: memref<1x128xf32, #tpu.memory_space<vmem>>, %arg5: memref<8x128xbf16, #tpu.memory_space<vmem>>) attributes {dimension_semantics = [#tpu.dimension_semantics<parallel>, #tpu.dimension_semantics<parallel>], iteration_bounds = array<i64: 1, 1>, scalar_prefetch = 0 : i64, scratch_operands = 0 : i64, tpu.core_type = #tpu.core_type<tc>, window_params = [{transform_indices = @transform_0, window_bounds = array<i64: 8, 512>}, {transform_indices = @transform_1, window_bounds = array<i64: 512, 128>}, {transform_indices = @transform_2, window_bounds = array<i64: 1, 128>}, {transform_indices = @transform_3, window_bounds = array<i64: 8, 128>}]} {
    %c0 = arith.constant 0 : index
    %c0_0 = arith.constant 0 : index
    %0 = vector.load %arg2[%c0, %c0_0] : memref<8x512xbf16, #tpu.memory_space<vmem>>, vector<8x512xbf16>
    %c0_1 = arith.constant 0 : index
    %c0_2 = arith.constant 0 : index
    %1 = vector.load %arg3[%c0_1, %c0_2] : memref<512x128xbf16, #tpu.memory_space<vmem>>, vector<512x128xbf16>
    %cst = arith.constant dense<0.000000e+00> : vector<8x128xf32>
    %2 = tpu.matmul %0, %1, %cst {dimension_numbers = #tpu.dot_dimension_numbers<[1], [0], [0], [1], [0, 0, 1, 1], [], []>} : vector<8x512xbf16>, vector<512x128xbf16>, vector<8x128xf32> -> vector<8x128xf32>
    %c0_3 = arith.constant 0 : index
    %c0_4 = arith.constant 0 : index
    %3 = vector.load %arg4[%c0_3, %c0_4] : memref<1x128xf32, #tpu.memory_space<vmem>>, vector<1x128xf32>
    %4 = vector.broadcast %3 : vector<1x128xf32> to vector<8x128xf32>
    %5 = arith.addf %2, %4 : vector<8x128xf32>
    %cst_5 = arith.constant 5.000000e-01 : f32
    %6 = vector.broadcast %cst_5 : f32 to vector<8x128xf32>
    %7 = arith.mulf %6, %5 : vector<8x128xf32>
    %cst_6 = arith.constant 4.471500e-02 : f32
    %8 = vector.broadcast %cst_6 : f32 to vector<8x128xf32>
    %9 = arith.mulf %8, %5 : vector<8x128xf32>
    %10 = arith.mulf %9, %5 : vector<8x128xf32>
    %11 = arith.mulf %10, %5 : vector<8x128xf32>
    %12 = arith.addf %5, %11 : vector<8x128xf32>
    %cst_7 = arith.constant 0.797884583 : f32
    %13 = vector.broadcast %cst_7 : f32 to vector<8x128xf32>
    %14 = arith.mulf %13, %12 : vector<8x128xf32>
    %15 = math.tanh %14 : vector<8x128xf32>
    %cst_8 = arith.constant 1.000000e+00 : f32
    %16 = vector.broadcast %cst_8 : f32 to vector<8x128xf32>
    %17 = arith.addf %16, %15 : vector<8x128xf32>
    %18 = arith.mulf %7, %17 : vector<8x128xf32>
    %19 = arith.truncf %18 : vector<8x128xf32> to vector<8x128xbf16>
    %c0_9 = arith.constant 0 : index
    %c0_10 = arith.constant 0 : index
    %20 = vector.load %arg5[%c0_9, %c0_10] : memref<8x128xbf16, #tpu.memory_space<vmem>>, vector<8x128xbf16>
    tpu.vector_store %arg5[%c0_9, %c0_10], %19 {strides = array<i32>} : memref<8x128xbf16, #tpu.memory_space<vmem>>, vector<8x128xbf16>,
    return
  }
  func.func @transform_0(%arg0: i32, %arg1: i32) -> (i32, i32) {
    %c0_i32 = arith.constant 0 : i32
    %c0_i32_0 = arith.constant 0 : i32
    return %arg0, %c0_i32 : i32, i32
  }
  func.func @transform_1(%arg0: i32, %arg1: i32) -> (i32, i32) {
    %c0_i32 = arith.constant 0 : i32
    %c0_i32_0 = arith.constant 0 : i32
    return %c0_i32, %arg1 : i32, i32
  }
  func.func @transform_2(%arg0: i32, %arg1: i32) -> (i32, i32) {
    %c0_i32 = arith.constant 0 : i32
    %c0_i32_0 = arith.constant 0 : i32
    return %c0_i32, %arg1 : i32, i32
  }
  func.func @transform_3(%arg0: i32, %arg1: i32) -> (i32, i32) {
    %c0_i32 = arith.constant 0 : i32
    return %arg0, %arg1 : i32, i32
  }
}

module attributes {stable_mosaic.version = 11 : i64} {
  func.func @_mm_kernel_single(%arg0: i32, %arg1: i32, %arg2: memref<8x512xbf16, #tpu.memory_space<vmem>>, %arg3: memref<512x256xbf16, #tpu.memory_space<vmem>>, %arg4: memref<1x256xf32, #tpu.memory_space<vmem>>, %arg5: memref<8x256xbf16, #tpu.memory_space<vmem>>) attributes {dimension_semantics = [#tpu.dimension_semantics<parallel>, #tpu.dimension_semantics<parallel>], iteration_bounds = array<i64: 1, 1>, scalar_prefetch = 0 : i64, scratch_operands = 0 : i64, tpu.core_type = #tpu.core_type<tc>, window_params = [{transform_indices = @transform_0, window_bounds = array<i64: 8, 512>}, {transform_indices = @transform_1, window_bounds = array<i64: 512, 256>}, {transform_indices = @transform_2, window_bounds = array<i64: 1, 256>}, {transform_indices = @transform_3, window_bounds = array<i64: 8, 256>}]} {
    %c0 = arith.constant 0 : index
    %c0_0 = arith.constant 0 : index
    %0 = vector.load %arg2[%c0, %c0_0] : memref<8x512xbf16, #tpu.memory_space<vmem>>, vector<8x512xbf16>
    %c0_1 = arith.constant 0 : index
    %c0_2 = arith.constant 0 : index
    %1 = vector.load %arg3[%c0_1, %c0_2] : memref<512x256xbf16, #tpu.memory_space<vmem>>, vector<512x256xbf16>
    %cst = arith.constant dense<0.000000e+00> : vector<8x256xf32>
    %2 = tpu.matmul %0, %1, %cst {dimension_numbers = #tpu.dot_dimension_numbers<[1], [0], [0], [1], [0, 0, 1, 1], [], []>} : vector<8x512xbf16>, vector<512x256xbf16>, vector<8x256xf32> -> vector<8x256xf32>
    %c0_3 = arith.constant 0 : index
    %c0_4 = arith.constant 0 : index
    %3 = vector.load %arg4[%c0_3, %c0_4] : memref<1x256xf32, #tpu.memory_space<vmem>>, vector<1x256xf32>
    %4 = vector.broadcast %3 : vector<1x256xf32> to vector<8x256xf32>
    %5 = arith.addf %2, %4 : vector<8x256xf32>
    %cst_5 = arith.constant 5.000000e-01 : f32
    %6 = vector.broadcast %cst_5 : f32 to vector<8x256xf32>
    %7 = arith.mulf %6, %5 : vector<8x256xf32>
    %cst_6 = arith.constant 4.471500e-02 : f32
    %8 = vector.broadcast %cst_6 : f32 to vector<8x256xf32>
    %9 = arith.mulf %8, %5 : vector<8x256xf32>
    %10 = arith.mulf %9, %5 : vector<8x256xf32>
    %11 = arith.mulf %10, %5 : vector<8x256xf32>
    %12 = arith.addf %5, %11 : vector<8x256xf32>
    %cst_7 = arith.constant 0.797884583 : f32
    %13 = vector.broadcast %cst_7 : f32 to vector<8x256xf32>
    %14 = arith.mulf %13, %12 : vector<8x256xf32>
    %15 = math.tanh %14 : vector<8x256xf32>
    %cst_8 = arith.constant 1.000000e+00 : f32
    %16 = vector.broadcast %cst_8 : f32 to vector<8x256xf32>
    %17 = arith.addf %16, %15 : vector<8x256xf32>
    %18 = arith.mulf %7, %17 : vector<8x256xf32>
    %19 = arith.truncf %18 : vector<8x256xf32> to vector<8x256xbf16>
    %c0_9 = arith.constant 0 : index
    %c0_10 = arith.constant 0 : index
    %20 = vector.load %arg5[%c0_9, %c0_10] : memref<8x256xbf16, #tpu.memory_space<vmem>>, vector<8x256xbf16>
    tpu.vector_store %arg5[%c0_9, %c0_10], %19 {strides = array<i32>} : memref<8x256xbf16, #tpu.memory_space<vmem>>, vector<8x256xbf16>,
    return
  }
  func.func @transform_0(%arg0: i32, %arg1: i32) -> (i32, i32) {
    %c0_i32 = arith.constant 0 : i32
    %c0_i32_0 = arith.constant 0 : i32
    return %arg0, %c0_i32 : i32, i32
  }
  func.func @transform_1(%arg0: i32, %arg1: i32) -> (i32, i32) {
    %c0_i32 = arith.constant 0 : i32
    %c0_i32_0 = arith.constant 0 : i32
    return %c0_i32, %arg1 : i32, i32
  }
  func.func @transform_2(%arg0: i32, %arg1: i32) -> (i32, i32) {
    %c0_i32 = arith.constant 0 : i32
    %c0_i32_0 = arith.constant 0 : i32
    return %c0_i32, %arg1 : i32, i32
  }
  func.func @transform_3(%arg0: i32, %arg1: i32) -> (i32, i32) {
    %c0_i32 = arith.constant 0 : i32
    return %arg0, %arg1 : i32, i32
  }
}

module attributes {stable_mosaic.version = 11 : i64} {
  func.func @_mm_kernel_single(%arg0: i32, %arg1: i32, %arg2: memref<8x256xbf16, #tpu.memory_space<vmem>>, %arg3: memref<256x128xbf16, #tpu.memory_space<vmem>>, %arg4: memref<1x128xf32, #tpu.memory_space<vmem>>, %arg5: memref<8x128xbf16, #tpu.memory_space<vmem>>) attributes {dimension_semantics = [#tpu.dimension_semantics<parallel>, #tpu.dimension_semantics<parallel>], iteration_bounds = array<i64: 1, 1>, scalar_prefetch = 0 : i64, scratch_operands = 0 : i64, tpu.core_type = #tpu.core_type<tc>, window_params = [{transform_indices = @transform_0, window_bounds = array<i64: 8, 256>}, {transform_indices = @transform_1, window_bounds = array<i64: 256, 128>}, {transform_indices = @transform_2, window_bounds = array<i64: 1, 128>}, {transform_indices = @transform_3, window_bounds = array<i64: 8, 128>}]} {
    %c0 = arith.constant 0 : index
    %c0_0 = arith.constant 0 : index
    %0 = vector.load %arg2[%c0, %c0_0] : memref<8x256xbf16, #tpu.memory_space<vmem>>, vector<8x256xbf16>
    %c0_1 = arith.constant 0 : index
    %c0_2 = arith.constant 0 : index
    %1 = vector.load %arg3[%c0_1, %c0_2] : memref<256x128xbf16, #tpu.memory_space<vmem>>, vector<256x128xbf16>
    %cst = arith.constant dense<0.000000e+00> : vector<8x128xf32>
    %2 = tpu.matmul %0, %1, %cst {dimension_numbers = #tpu.dot_dimension_numbers<[1], [0], [0], [1], [0, 0, 1, 1], [], []>} : vector<8x256xbf16>, vector<256x128xbf16>, vector<8x128xf32> -> vector<8x128xf32>
    %c0_3 = arith.constant 0 : index
    %c0_4 = arith.constant 0 : index
    %3 = vector.load %arg4[%c0_3, %c0_4] : memref<1x128xf32, #tpu.memory_space<vmem>>, vector<1x128xf32>
    %4 = vector.broadcast %3 : vector<1x128xf32> to vector<8x128xf32>
    %5 = arith.addf %2, %4 : vector<8x128xf32>
    %6 = arith.truncf %5 : vector<8x128xf32> to vector<8x128xbf16>
    %c0_5 = arith.constant 0 : index
    %c0_6 = arith.constant 0 : index
    %7 = vector.load %arg5[%c0_5, %c0_6] : memref<8x128xbf16, #tpu.memory_space<vmem>>, vector<8x128xbf16>
    tpu.vector_store %arg5[%c0_5, %c0_6], %6 {strides = array<i32>} : memref<8x128xbf16, #tpu.memory_space<vmem>>, vector<8x128xbf16>,
    return
  }
  func.func @transform_0(%arg0: i32, %arg1: i32) -> (i32, i32) {
    %c0_i32 = arith.constant 0 : i32
    %c0_i32_0 = arith.constant 0 : i32
    return %arg0, %c0_i32 : i32, i32
  }
  func.func @transform_1(%arg0: i32, %arg1: i32) -> (i32, i32) {
    %c0_i32 = arith.constant 0 : i32
    %c0_i32_0 = arith.constant 0 : i32
    return %c0_i32, %arg1 : i32, i32
  }
  func.func @transform_2(%arg0: i32, %arg1: i32) -> (i32, i32) {
    %c0_i32 = arith.constant 0 : i32
    %c0_i32_0 = arith.constant 0 : i32
    return %c0_i32, %arg1 : i32, i32
  }
  func.func @transform_3(%arg0: i32, %arg1: i32) -> (i32, i32) {
    %c0_i32 = arith.constant 0 : i32
    return %arg0, %arg1 : i32, i32
  }
}

module attributes {stable_mosaic.version = 11 : i64} {
  func.func @_h_interp_kernel(%arg0: i32, %arg1: i32, %arg2: memref<8x8xbf16, #tpu.memory_space<vmem>>, %arg3: memref<1x8x128xbf16, #tpu.memory_space<vmem>>, %arg4: memref<1x8x128xbf16, #tpu.memory_space<vmem>>) attributes {dimension_semantics = [#tpu.dimension_semantics<parallel>, #tpu.dimension_semantics<arbitrary>], iteration_bounds = array<i64: 2, 1>, scalar_prefetch = 0 : i64, scratch_operands = 0 : i64, tpu.core_type = #tpu.core_type<tc>, window_params = [{transform_indices = @transform_0, window_bounds = array<i64: 8, 8>}, {transform_indices = @transform_1, window_bounds = array<i64: 1, 8, 128>}, {transform_indices = @transform_2, window_bounds = array<i64: 1, 8, 128>}]} {
    %c0 = arith.constant 0 : index
    %c0_0 = arith.constant 0 : index
    %0 = vector.load %arg2[%c0, %c0_0] : memref<8x8xbf16, #tpu.memory_space<vmem>>, vector<8x8xbf16>
    %c0_1 = arith.constant 0 : index
    %c0_2 = arith.constant 0 : index
    %c0_3 = arith.constant 0 : index
    %1 = vector.load %arg3[%c0_1, %c0_2, %c0_3] : memref<1x8x128xbf16, #tpu.memory_space<vmem>>, vector<1x8x128xbf16>
    %2 = vector.shape_cast %1 : vector<1x8x128xbf16> to vector<8x128xbf16>
    %cst = arith.constant dense<0.000000e+00> : vector<8x128xf32>
    %3 = tpu.matmul %0, %2, %cst {dimension_numbers = #tpu.dot_dimension_numbers<[1], [0], [0], [1], [0, 0, 1, 1], [], []>} : vector<8x8xbf16>, vector<8x128xbf16>, vector<8x128xf32> -> vector<8x128xf32>
    %4 = arith.truncf %3 : vector<8x128xf32> to vector<8x128xbf16>
    %c0_4 = arith.constant 0 : index
    %c0_5 = arith.constant 0 : index
    %c0_6 = arith.constant 0 : index
    %5 = vector.load %arg4[%c0_4, %c0_5, %c0_6] : memref<1x8x128xbf16, #tpu.memory_space<vmem>>, vector<1x8x128xbf16>
    %6 = vector.shape_cast %5 : vector<1x8x128xbf16> to vector<8x128xbf16>
    %7 = vector.shape_cast %4 : vector<8x128xbf16> to vector<1x8x128xbf16>
    tpu.vector_store %arg4[%c0_4, %c0_5, %c0_6], %7 {strides = array<i32>} : memref<1x8x128xbf16, #tpu.memory_space<vmem>>, vector<1x8x128xbf16>,
    return
  }
  func.func @transform_0(%arg0: i32, %arg1: i32) -> (i32, i32) {
    %c0_i32 = arith.constant 0 : i32
    %c0_i32_0 = arith.constant 0 : i32
    return %arg1, %c0_i32 : i32, i32
  }
  func.func @transform_1(%arg0: i32, %arg1: i32) -> (i32, i32, i32) {
    %c0_i32 = arith.constant 0 : i32
    %c0_i32_0 = arith.constant 0 : i32
    %c0_i32_1 = arith.constant 0 : i32
    return %arg0, %c0_i32, %c0_i32_0 : i32, i32, i32
  }
  func.func @transform_2(%arg0: i32, %arg1: i32) -> (i32, i32, i32) {
    %c0_i32 = arith.constant 0 : i32
    %c0_i32_0 = arith.constant 0 : i32
    return %arg0, %arg1, %c0_i32 : i32, i32, i32
  }
}

module attributes {stable_mosaic.version = 11 : i64} {
  func.func @_mm_kernel_single(%arg0: i32, %arg1: i32, %arg2: memref<32x128xbf16, #tpu.memory_space<vmem>>, %arg3: memref<128x128xbf16, #tpu.memory_space<vmem>>, %arg4: memref<1x128xf32, #tpu.memory_space<vmem>>, %arg5: memref<32x128xbf16, #tpu.memory_space<vmem>>) attributes {dimension_semantics = [#tpu.dimension_semantics<parallel>, #tpu.dimension_semantics<parallel>], iteration_bounds = array<i64: 1, 1>, scalar_prefetch = 0 : i64, scratch_operands = 0 : i64, tpu.core_type = #tpu.core_type<tc>, window_params = [{transform_indices = @transform_0, window_bounds = array<i64: 32, 128>}, {transform_indices = @transform_1, window_bounds = array<i64: 128, 128>}, {transform_indices = @transform_2, window_bounds = array<i64: 1, 128>}, {transform_indices = @transform_3, window_bounds = array<i64: 32, 128>}]} {
    %c0 = arith.constant 0 : index
    %c0_0 = arith.constant 0 : index
    %0 = vector.load %arg2[%c0, %c0_0] : memref<32x128xbf16, #tpu.memory_space<vmem>>, vector<32x128xbf16>
    %c0_1 = arith.constant 0 : index
    %c0_2 = arith.constant 0 : index
    %1 = vector.load %arg3[%c0_1, %c0_2] : memref<128x128xbf16, #tpu.memory_space<vmem>>, vector<128x128xbf16>
    %cst = arith.constant dense<0.000000e+00> : vector<32x128xf32>
    %2 = tpu.matmul %0, %1, %cst {dimension_numbers = #tpu.dot_dimension_numbers<[1], [0], [0], [1], [0, 0, 1, 1], [], []>} : vector<32x128xbf16>, vector<128x128xbf16>, vector<32x128xf32> -> vector<32x128xf32>
    %c0_3 = arith.constant 0 : index
    %c0_4 = arith.constant 0 : index
    %3 = vector.load %arg4[%c0_3, %c0_4] : memref<1x128xf32, #tpu.memory_space<vmem>>, vector<1x128xf32>
    %4 = vector.broadcast %3 : vector<1x128xf32> to vector<32x128xf32>
    %5 = arith.addf %2, %4 : vector<32x128xf32>
    %6 = arith.truncf %5 : vector<32x128xf32> to vector<32x128xbf16>
    %c0_5 = arith.constant 0 : index
    %c0_6 = arith.constant 0 : index
    %7 = vector.load %arg5[%c0_5, %c0_6] : memref<32x128xbf16, #tpu.memory_space<vmem>>, vector<32x128xbf16>
    tpu.vector_store %arg5[%c0_5, %c0_6], %6 {strides = array<i32>} : memref<32x128xbf16, #tpu.memory_space<vmem>>, vector<32x128xbf16>,
    return
  }
  func.func @transform_0(%arg0: i32, %arg1: i32) -> (i32, i32) {
    %c0_i32 = arith.constant 0 : i32
    %c0_i32_0 = arith.constant 0 : i32
    return %arg0, %c0_i32 : i32, i32
  }
  func.func @transform_1(%arg0: i32, %arg1: i32) -> (i32, i32) {
    %c0_i32 = arith.constant 0 : i32
    %c0_i32_0 = arith.constant 0 : i32
    return %c0_i32, %arg1 : i32, i32
  }
  func.func @transform_2(%arg0: i32, %arg1: i32) -> (i32, i32) {
    %c0_i32 = arith.constant 0 : i32
    %c0_i32_0 = arith.constant 0 : i32
    return %c0_i32, %arg1 : i32, i32
  }
  func.func @transform_3(%arg0: i32, %arg1: i32) -> (i32, i32) {
    %c0_i32 = arith.constant 0 : i32
    return %arg0, %arg1 : i32, i32
  }
}

module attributes {stable_mosaic.version = 11 : i64} {
  func.func @_h_interp_kernel(%arg0: i32, %arg1: i32, %arg2: memref<8x8xbf16, #tpu.memory_space<vmem>>, %arg3: memref<1x8x512xbf16, #tpu.memory_space<vmem>>, %arg4: memref<1x8x512xbf16, #tpu.memory_space<vmem>>) attributes {dimension_semantics = [#tpu.dimension_semantics<parallel>, #tpu.dimension_semantics<arbitrary>], iteration_bounds = array<i64: 2, 1>, scalar_prefetch = 0 : i64, scratch_operands = 0 : i64, tpu.core_type = #tpu.core_type<tc>, window_params = [{transform_indices = @transform_0, window_bounds = array<i64: 8, 8>}, {transform_indices = @transform_1, window_bounds = array<i64: 1, 8, 512>}, {transform_indices = @transform_2, window_bounds = array<i64: 1, 8, 512>}]} {
    %c0 = arith.constant 0 : index
    %c0_0 = arith.constant 0 : index
    %0 = vector.load %arg2[%c0, %c0_0] : memref<8x8xbf16, #tpu.memory_space<vmem>>, vector<8x8xbf16>
    %c0_1 = arith.constant 0 : index
    %c0_2 = arith.constant 0 : index
    %c0_3 = arith.constant 0 : index
    %1 = vector.load %arg3[%c0_1, %c0_2, %c0_3] : memref<1x8x512xbf16, #tpu.memory_space<vmem>>, vector<1x8x512xbf16>
    %2 = vector.shape_cast %1 : vector<1x8x512xbf16> to vector<8x512xbf16>
    %cst = arith.constant dense<0.000000e+00> : vector<8x512xf32>
    %3 = tpu.matmul %0, %2, %cst {dimension_numbers = #tpu.dot_dimension_numbers<[1], [0], [0], [1], [0, 0, 1, 1], [], []>} : vector<8x8xbf16>, vector<8x512xbf16>, vector<8x512xf32> -> vector<8x512xf32>
    %4 = arith.truncf %3 : vector<8x512xf32> to vector<8x512xbf16>
    %c0_4 = arith.constant 0 : index
    %c0_5 = arith.constant 0 : index
    %c0_6 = arith.constant 0 : index
    %5 = vector.load %arg4[%c0_4, %c0_5, %c0_6] : memref<1x8x512xbf16, #tpu.memory_space<vmem>>, vector<1x8x512xbf16>
    %6 = vector.shape_cast %5 : vector<1x8x512xbf16> to vector<8x512xbf16>
    %7 = vector.shape_cast %4 : vector<8x512xbf16> to vector<1x8x512xbf16>
    tpu.vector_store %arg4[%c0_4, %c0_5, %c0_6], %7 {strides = array<i32>} : memref<1x8x512xbf16, #tpu.memory_space<vmem>>, vector<1x8x512xbf16>,
    return
  }
  func.func @transform_0(%arg0: i32, %arg1: i32) -> (i32, i32) {
    %c0_i32 = arith.constant 0 : i32
    %c0_i32_0 = arith.constant 0 : i32
    return %arg1, %c0_i32 : i32, i32
  }
  func.func @transform_1(%arg0: i32, %arg1: i32) -> (i32, i32, i32) {
    %c0_i32 = arith.constant 0 : i32
    %c0_i32_0 = arith.constant 0 : i32
    %c0_i32_1 = arith.constant 0 : i32
    return %arg0, %c0_i32, %c0_i32_0 : i32, i32, i32
  }
  func.func @transform_2(%arg0: i32, %arg1: i32) -> (i32, i32, i32) {
    %c0_i32 = arith.constant 0 : i32
    %c0_i32_0 = arith.constant 0 : i32
    return %arg0, %arg1, %c0_i32 : i32, i32, i32
  }
}

module attributes {stable_mosaic.version = 11 : i64} {
  func.func @_w_interp_kernel(%arg0: i32, %arg1: i32, %arg2: memref<8x8xbf16, #tpu.memory_space<vmem>>, %arg3: memref<1x8x8x128xbf16, #tpu.memory_space<vmem>>, %arg4: memref<1x8x8x128xbf16, #tpu.memory_space<vmem>>) attributes {dimension_semantics = [#tpu.dimension_semantics<parallel>, #tpu.dimension_semantics<parallel>], iteration_bounds = array<i64: 2, 1>, scalar_prefetch = 0 : i64, scratch_operands = 0 : i64, tpu.core_type = #tpu.core_type<tc>, window_params = [{pipeline_mode = #tpu.pipeline_mode<synchronous>, transform_indices = @transform_0, window_bounds = array<i64: 8, 8>}, {transform_indices = @transform_1, window_bounds = array<i64: 1, 8, 8, 128>}, {transform_indices = @transform_2, window_bounds = array<i64: 1, 8, 8, 128>}]} {
    %c0 = arith.constant 0 : index
    %c0_0 = arith.constant 0 : index
    %0 = vector.load %arg2[%c0, %c0_0] : memref<8x8xbf16, #tpu.memory_space<vmem>>, vector<8x8xbf16>
    %c0_1 = arith.constant 0 : index
    %c0_2 = arith.constant 0 : index
    %c0_3 = arith.constant 0 : index
    %c0_4 = arith.constant 0 : index
    %1 = vector.load %arg3[%c0_1, %c0_2, %c0_3, %c0_4] : memref<1x8x8x128xbf16, #tpu.memory_space<vmem>>, vector<1x1x8x128xbf16>
    %2 = vector.shape_cast %1 : vector<1x1x8x128xbf16> to vector<8x128xbf16>
    %cst = arith.constant dense<0.000000e+00> : vector<8x128xf32>
    %3 = tpu.matmul %0, %2, %cst {dimension_numbers = #tpu.dot_dimension_numbers<[1], [0], [0], [1], [0, 0, 1, 1], [], []>} : vector<8x8xbf16>, vector<8x128xbf16>, vector<8x128xf32> -> vector<8x128xf32>
    %4 = arith.truncf %3 : vector<8x128xf32> to vector<8x128xbf16>
    %c0_5 = arith.constant 0 : index
    %c0_6 = arith.constant 0 : index
    %c0_7 = arith.constant 0 : index
    %c0_8 = arith.constant 0 : index
    %5 = vector.load %arg4[%c0_5, %c0_6, %c0_7, %c0_8] : memref<1x8x8x128xbf16, #tpu.memory_space<vmem>>, vector<1x1x8x128xbf16>
    %6 = vector.shape_cast %5 : vector<1x1x8x128xbf16> to vector<8x128xbf16>
    %7 = vector.shape_cast %4 : vector<8x128xbf16> to vector<1x1x8x128xbf16>
    tpu.vector_store %arg4[%c0_5, %c0_6, %c0_7, %c0_8], %7 {strides = array<i32>} : memref<1x8x8x128xbf16, #tpu.memory_space<vmem>>, vector<1x1x8x128xbf16>,
    %c0_9 = arith.constant 0 : index
    %c1 = arith.constant 1 : index
    %c0_10 = arith.constant 0 : index
    %c0_11 = arith.constant 0 : index
    %8 = vector.load %arg3[%c0_9, %c1, %c0_10, %c0_11] : memref<1x8x8x128xbf16, #tpu.memory_space<vmem>>, vector<1x1x8x128xbf16>
    %9 = vector.shape_cast %8 : vector<1x1x8x128xbf16> to vector<8x128xbf16>
    %cst_12 = arith.constant dense<0.000000e+00> : vector<8x128xf32>
    %10 = tpu.matmul %0, %9, %cst_12 {dimension_numbers = #tpu.dot_dimension_numbers<[1], [0], [0], [1], [0, 0, 1, 1], [], []>} : vector<8x8xbf16>, vector<8x128xbf16>, vector<8x128xf32> -> vector<8x128xf32>
    %11 = arith.truncf %10 : vector<8x128xf32> to vector<8x128xbf16>
    %c0_13 = arith.constant 0 : index
    %c1_14 = arith.constant 1 : index
    %c0_15 = arith.constant 0 : index
    %c0_16 = arith.constant 0 : index
    %12 = vector.load %arg4[%c0_13, %c1_14, %c0_15, %c0_16] : memref<1x8x8x128xbf16, #tpu.memory_space<vmem>>, vector<1x1x8x128xbf16>
    %13 = vector.shape_cast %12 : vector<1x1x8x128xbf16> to vector<8x128xbf16>
    %14 = vector.shape_cast %11 : vector<8x128xbf16> to vector<1x1x8x128xbf16>
    tpu.vector_store %arg4[%c0_13, %c1_14, %c0_15, %c0_16], %14 {strides = array<i32>} : memref<1x8x8x128xbf16, #tpu.memory_space<vmem>>, vector<1x1x8x128xbf16>,
    %c0_17 = arith.constant 0 : index
    %c2 = arith.constant 2 : index
    %c0_18 = arith.constant 0 : index
    %c0_19 = arith.constant 0 : index
    %15 = vector.load %arg3[%c0_17, %c2, %c0_18, %c0_19] : memref<1x8x8x128xbf16, #tpu.memory_space<vmem>>, vector<1x1x8x128xbf16>
    %16 = vector.shape_cast %15 : vector<1x1x8x128xbf16> to vector<8x128xbf16>
    %cst_20 = arith.constant dense<0.000000e+00> : vector<8x128xf32>
    %17 = tpu.matmul %0, %16, %cst_20 {dimension_numbers = #tpu.dot_dimension_numbers<[1], [0], [0], [1], [0, 0, 1, 1], [], []>} : vector<8x8xbf16>, vector<8x128xbf16>, vector<8x128xf32> -> vector<8x128xf32>
    %18 = arith.truncf %17 : vector<8x128xf32> to vector<8x128xbf16>
    %c0_21 = arith.constant 0 : index
    %c2_22 = arith.constant 2 : index
    %c0_23 = arith.constant 0 : index
    %c0_24 = arith.constant 0 : index
    %19 = vector.load %arg4[%c0_21, %c2_22, %c0_23, %c0_24] : memref<1x8x8x128xbf16, #tpu.memory_space<vmem>>, vector<1x1x8x128xbf16>
    %20 = vector.shape_cast %19 : vector<1x1x8x128xbf16> to vector<8x128xbf16>
    %21 = vector.shape_cast %18 : vector<8x128xbf16> to vector<1x1x8x128xbf16>
    tpu.vector_store %arg4[%c0_21, %c2_22, %c0_23, %c0_24], %21 {strides = array<i32>} : memref<1x8x8x128xbf16, #tpu.memory_space<vmem>>, vector<1x1x8x128xbf16>,
    %c0_25 = arith.constant 0 : index
    %c3 = arith.constant 3 : index
    %c0_26 = arith.constant 0 : index
    %c0_27 = arith.constant 0 : index
    %22 = vector.load %arg3[%c0_25, %c3, %c0_26, %c0_27] : memref<1x8x8x128xbf16, #tpu.memory_space<vmem>>, vector<1x1x8x128xbf16>
    %23 = vector.shape_cast %22 : vector<1x1x8x128xbf16> to vector<8x128xbf16>
    %cst_28 = arith.constant dense<0.000000e+00> : vector<8x128xf32>
    %24 = tpu.matmul %0, %23, %cst_28 {dimension_numbers = #tpu.dot_dimension_numbers<[1], [0], [0], [1], [0, 0, 1, 1], [], []>} : vector<8x8xbf16>, vector<8x128xbf16>, vector<8x128xf32> -> vector<8x128xf32>
    %25 = arith.truncf %24 : vector<8x128xf32> to vector<8x128xbf16>
    %c0_29 = arith.constant 0 : index
    %c3_30 = arith.constant 3 : index
    %c0_31 = arith.constant 0 : index
    %c0_32 = arith.constant 0 : index
    %26 = vector.load %arg4[%c0_29, %c3_30, %c0_31, %c0_32] : memref<1x8x8x128xbf16, #tpu.memory_space<vmem>>, vector<1x1x8x128xbf16>
    %27 = vector.shape_cast %26 : vector<1x1x8x128xbf16> to vector<8x128xbf16>
    %28 = vector.shape_cast %25 : vector<8x128xbf16> to vector<1x1x8x128xbf16>
    tpu.vector_store %arg4[%c0_29, %c3_30, %c0_31, %c0_32], %28 {strides = array<i32>} : memref<1x8x8x128xbf16, #tpu.memory_space<vmem>>, vector<1x1x8x128xbf16>,
    %c0_33 = arith.constant 0 : index
    %c4 = arith.constant 4 : index
    %c0_34 = arith.constant 0 : index
    %c0_35 = arith.constant 0 : index
    %29 = vector.load %arg3[%c0_33, %c4, %c0_34, %c0_35] : memref<1x8x8x128xbf16, #tpu.memory_space<vmem>>, vector<1x1x8x128xbf16>
    %30 = vector.shape_cast %29 : vector<1x1x8x128xbf16> to vector<8x128xbf16>
    %cst_36 = arith.constant dense<0.000000e+00> : vector<8x128xf32>
    %31 = tpu.matmul %0, %30, %cst_36 {dimension_numbers = #tpu.dot_dimension_numbers<[1], [0], [0], [1], [0, 0, 1, 1], [], []>} : vector<8x8xbf16>, vector<8x128xbf16>, vector<8x128xf32> -> vector<8x128xf32>
    %32 = arith.truncf %31 : vector<8x128xf32> to vector<8x128xbf16>
    %c0_37 = arith.constant 0 : index
    %c4_38 = arith.constant 4 : index
    %c0_39 = arith.constant 0 : index
    %c0_40 = arith.constant 0 : index
    %33 = vector.load %arg4[%c0_37, %c4_38, %c0_39, %c0_40] : memref<1x8x8x128xbf16, #tpu.memory_space<vmem>>, vector<1x1x8x128xbf16>
    %34 = vector.shape_cast %33 : vector<1x1x8x128xbf16> to vector<8x128xbf16>
    %35 = vector.shape_cast %32 : vector<8x128xbf16> to vector<1x1x8x128xbf16>
    tpu.vector_store %arg4[%c0_37, %c4_38, %c0_39, %c0_40], %35 {strides = array<i32>} : memref<1x8x8x128xbf16, #tpu.memory_space<vmem>>, vector<1x1x8x128xbf16>,
    %c0_41 = arith.constant 0 : index
    %c5 = arith.constant 5 : index
    %c0_42 = arith.constant 0 : index
    %c0_43 = arith.constant 0 : index
    %36 = vector.load %arg3[%c0_41, %c5, %c0_42, %c0_43] : memref<1x8x8x128xbf16, #tpu.memory_space<vmem>>, vector<1x1x8x128xbf16>
    %37 = vector.shape_cast %36 : vector<1x1x8x128xbf16> to vector<8x128xbf16>
    %cst_44 = arith.constant dense<0.000000e+00> : vector<8x128xf32>
    %38 = tpu.matmul %0, %37, %cst_44 {dimension_numbers = #tpu.dot_dimension_numbers<[1], [0], [0], [1], [0, 0, 1, 1], [], []>} : vector<8x8xbf16>, vector<8x128xbf16>, vector<8x128xf32> -> vector<8x128xf32>
    %39 = arith.truncf %38 : vector<8x128xf32> to vector<8x128xbf16>
    %c0_45 = arith.constant 0 : index
    %c5_46 = arith.constant 5 : index
    %c0_47 = arith.constant 0 : index
    %c0_48 = arith.constant 0 : index
    %40 = vector.load %arg4[%c0_45, %c5_46, %c0_47, %c0_48] : memref<1x8x8x128xbf16, #tpu.memory_space<vmem>>, vector<1x1x8x128xbf16>
    %41 = vector.shape_cast %40 : vector<1x1x8x128xbf16> to vector<8x128xbf16>
    %42 = vector.shape_cast %39 : vector<8x128xbf16> to vector<1x1x8x128xbf16>
    tpu.vector_store %arg4[%c0_45, %c5_46, %c0_47, %c0_48], %42 {strides = array<i32>} : memref<1x8x8x128xbf16, #tpu.memory_space<vmem>>, vector<1x1x8x128xbf16>,
    %c0_49 = arith.constant 0 : index
    %c6 = arith.constant 6 : index
    %c0_50 = arith.constant 0 : index
    %c0_51 = arith.constant 0 : index
    %43 = vector.load %arg3[%c0_49, %c6, %c0_50, %c0_51] : memref<1x8x8x128xbf16, #tpu.memory_space<vmem>>, vector<1x1x8x128xbf16>
    %44 = vector.shape_cast %43 : vector<1x1x8x128xbf16> to vector<8x128xbf16>
    %cst_52 = arith.constant dense<0.000000e+00> : vector<8x128xf32>
    %45 = tpu.matmul %0, %44, %cst_52 {dimension_numbers = #tpu.dot_dimension_numbers<[1], [0], [0], [1], [0, 0, 1, 1], [], []>} : vector<8x8xbf16>, vector<8x128xbf16>, vector<8x128xf32> -> vector<8x128xf32>
    %46 = arith.truncf %45 : vector<8x128xf32> to vector<8x128xbf16>
    %c0_53 = arith.constant 0 : index
    %c6_54 = arith.constant 6 : index
    %c0_55 = arith.constant 0 : index
    %c0_56 = arith.constant 0 : index
    %47 = vector.load %arg4[%c0_53, %c6_54, %c0_55, %c0_56] : memref<1x8x8x128xbf16, #tpu.memory_space<vmem>>, vector<1x1x8x128xbf16>
    %48 = vector.shape_cast %47 : vector<1x1x8x128xbf16> to vector<8x128xbf16>
    %49 = vector.shape_cast %46 : vector<8x128xbf16> to vector<1x1x8x128xbf16>
    tpu.vector_store %arg4[%c0_53, %c6_54, %c0_55, %c0_56], %49 {strides = array<i32>} : memref<1x8x8x128xbf16, #tpu.memory_space<vmem>>, vector<1x1x8x128xbf16>,
    %c0_57 = arith.constant 0 : index
    %c7 = arith.constant 7 : index
    %c0_58 = arith.constant 0 : index
    %c0_59 = arith.constant 0 : index
    %50 = vector.load %arg3[%c0_57, %c7, %c0_58, %c0_59] : memref<1x8x8x128xbf16, #tpu.memory_space<vmem>>, vector<1x1x8x128xbf16>
    %51 = vector.shape_cast %50 : vector<1x1x8x128xbf16> to vector<8x128xbf16>
    %cst_60 = arith.constant dense<0.000000e+00> : vector<8x128xf32>
    %52 = tpu.matmul %0, %51, %cst_60 {dimension_numbers = #tpu.dot_dimension_numbers<[1], [0], [0], [1], [0, 0, 1, 1], [], []>} : vector<8x8xbf16>, vector<8x128xbf16>, vector<8x128xf32> -> vector<8x128xf32>
    %53 = arith.truncf %52 : vector<8x128xf32> to vector<8x128xbf16>
    %c0_61 = arith.constant 0 : index
    %c7_62 = arith.constant 7 : index
    %c0_63 = arith.constant 0 : index
    %c0_64 = arith.constant 0 : index
    %54 = vector.load %arg4[%c0_61, %c7_62, %c0_63, %c0_64] : memref<1x8x8x128xbf16, #tpu.memory_space<vmem>>, vector<1x1x8x128xbf16>
    %55 = vector.shape_cast %54 : vector<1x1x8x128xbf16> to vector<8x128xbf16>
    %56 = vector.shape_cast %53 : vector<8x128xbf16> to vector<1x1x8x128xbf16>
    tpu.vector_store %arg4[%c0_61, %c7_62, %c0_63, %c0_64], %56 {strides = array<i32>} : memref<1x8x8x128xbf16, #tpu.memory_space<vmem>>, vector<1x1x8x128xbf16>,
    return
  }
  func.func @transform_0(%arg0: i32, %arg1: i32) -> (i32, i32) {
    %c0_i32 = arith.constant 0 : i32
    %c0_i32_0 = arith.constant 0 : i32
    %c0_i32_1 = arith.constant 0 : i32
    return %c0_i32, %c0_i32_0 : i32, i32
  }
  func.func @transform_1(%arg0: i32, %arg1: i32) -> (i32, i32, i32, i32) {
    %c0_i32 = arith.constant 0 : i32
    %c0_i32_0 = arith.constant 0 : i32
    %c0_i32_1 = arith.constant 0 : i32
    return %arg0, %arg1, %c0_i32, %c0_i32_0 : i32, i32, i32, i32
  }
  func.func @transform_2(%arg0: i32, %arg1: i32) -> (i32, i32, i32, i32) {
    %c0_i32 = arith.constant 0 : i32
    %c0_i32_0 = arith.constant 0 : i32
    %c0_i32_1 = arith.constant 0 : i32
    return %arg0, %arg1, %c0_i32, %c0_i32_0 : i32, i32, i32, i32
  }
}

module attributes {stable_mosaic.version = 11 : i64} {
  func.func @_h_interp_kernel(%arg0: i32, %arg1: i32, %arg2: memref<32x8xf32, #tpu.memory_space<vmem>>, %arg3: memref<1x8x1024xf32, #tpu.memory_space<vmem>>, %arg4: memref<1x32x1024xf32, #tpu.memory_space<vmem>>) attributes {dimension_semantics = [#tpu.dimension_semantics<parallel>, #tpu.dimension_semantics<arbitrary>], iteration_bounds = array<i64: 2, 1>, scalar_prefetch = 0 : i64, scratch_operands = 0 : i64, tpu.core_type = #tpu.core_type<tc>, window_params = [{transform_indices = @transform_0, window_bounds = array<i64: 32, 8>}, {transform_indices = @transform_1, window_bounds = array<i64: 1, 8, 1024>}, {transform_indices = @transform_2, window_bounds = array<i64: 1, 32, 1024>}]} {
    %c0 = arith.constant 0 : index
    %c0_0 = arith.constant 0 : index
    %0 = vector.load %arg2[%c0, %c0_0] : memref<32x8xf32, #tpu.memory_space<vmem>>, vector<32x8xf32>
    %c0_1 = arith.constant 0 : index
    %c0_2 = arith.constant 0 : index
    %c0_3 = arith.constant 0 : index
    %1 = vector.load %arg3[%c0_1, %c0_2, %c0_3] : memref<1x8x1024xf32, #tpu.memory_space<vmem>>, vector<1x8x1024xf32>
    %2 = vector.shape_cast %1 : vector<1x8x1024xf32> to vector<8x1024xf32>
    %cst = arith.constant dense<0.000000e+00> : vector<32x1024xf32>
    %3 = tpu.matmul %0, %2, %cst {dimension_numbers = #tpu.dot_dimension_numbers<[1], [0], [0], [1], [0, 0, 1, 1], [], []>} : vector<32x8xf32>, vector<8x1024xf32>, vector<32x1024xf32> -> vector<32x1024xf32>
    %c0_4 = arith.constant 0 : index
    %c0_5 = arith.constant 0 : index
    %c0_6 = arith.constant 0 : index
    %4 = vector.load %arg4[%c0_4, %c0_5, %c0_6] : memref<1x32x1024xf32, #tpu.memory_space<vmem>>, vector<1x32x1024xf32>
    %5 = vector.shape_cast %4 : vector<1x32x1024xf32> to vector<32x1024xf32>
    %6 = vector.shape_cast %3 : vector<32x1024xf32> to vector<1x32x1024xf32>
    tpu.vector_store %arg4[%c0_4, %c0_5, %c0_6], %6 {strides = array<i32>} : memref<1x32x1024xf32, #tpu.memory_space<vmem>>, vector<1x32x1024xf32>,
    return
  }
  func.func @transform_0(%arg0: i32, %arg1: i32) -> (i32, i32) {
    %c0_i32 = arith.constant 0 : i32
    %c0_i32_0 = arith.constant 0 : i32
    return %arg1, %c0_i32 : i32, i32
  }
  func.func @transform_1(%arg0: i32, %arg1: i32) -> (i32, i32, i32) {
    %c0_i32 = arith.constant 0 : i32
    %c0_i32_0 = arith.constant 0 : i32
    %c0_i32_1 = arith.constant 0 : i32
    return %arg0, %c0_i32, %c0_i32_0 : i32, i32, i32
  }
  func.func @transform_2(%arg0: i32, %arg1: i32) -> (i32, i32, i32) {
    %c0_i32 = arith.constant 0 : i32
    %c0_i32_0 = arith.constant 0 : i32
    return %arg0, %arg1, %c0_i32 : i32, i32, i32
  }
}

module attributes {stable_mosaic.version = 11 : i64} {
  func.func @_mm_kernel_single(%arg0: i32, %arg1: i32, %arg2: memref<128x128xbf16, #tpu.memory_space<vmem>>, %arg3: memref<128x128xbf16, #tpu.memory_space<vmem>>, %arg4: memref<1x128xf32, #tpu.memory_space<vmem>>, %arg5: memref<128x128xbf16, #tpu.memory_space<vmem>>) attributes {dimension_semantics = [#tpu.dimension_semantics<parallel>, #tpu.dimension_semantics<parallel>], iteration_bounds = array<i64: 1, 1>, scalar_prefetch = 0 : i64, scratch_operands = 0 : i64, tpu.core_type = #tpu.core_type<tc>, window_params = [{transform_indices = @transform_0, window_bounds = array<i64: 128, 128>}, {transform_indices = @transform_1, window_bounds = array<i64: 128, 128>}, {transform_indices = @transform_2, window_bounds = array<i64: 1, 128>}, {transform_indices = @transform_3, window_bounds = array<i64: 128, 128>}]} {
    %c0 = arith.constant 0 : index
    %c0_0 = arith.constant 0 : index
    %0 = vector.load %arg2[%c0, %c0_0] : memref<128x128xbf16, #tpu.memory_space<vmem>>, vector<128x128xbf16>
    %c0_1 = arith.constant 0 : index
    %c0_2 = arith.constant 0 : index
    %1 = vector.load %arg3[%c0_1, %c0_2] : memref<128x128xbf16, #tpu.memory_space<vmem>>, vector<128x128xbf16>
    %cst = arith.constant dense<0.000000e+00> : vector<128x128xf32>
    %2 = tpu.matmul %0, %1, %cst {dimension_numbers = #tpu.dot_dimension_numbers<[1], [0], [0], [1], [0, 0, 1, 1], [], []>} : vector<128x128xbf16>, vector<128x128xbf16>, vector<128x128xf32> -> vector<128x128xf32>
    %c0_3 = arith.constant 0 : index
    %c0_4 = arith.constant 0 : index
    %3 = vector.load %arg4[%c0_3, %c0_4] : memref<1x128xf32, #tpu.memory_space<vmem>>, vector<1x128xf32>
    %4 = vector.broadcast %3 : vector<1x128xf32> to vector<128x128xf32>
    %5 = arith.addf %2, %4 : vector<128x128xf32>
    %6 = arith.truncf %5 : vector<128x128xf32> to vector<128x128xbf16>
    %c0_5 = arith.constant 0 : index
    %c0_6 = arith.constant 0 : index
    %7 = vector.load %arg5[%c0_5, %c0_6] : memref<128x128xbf16, #tpu.memory_space<vmem>>, vector<128x128xbf16>
    tpu.vector_store %arg5[%c0_5, %c0_6], %6 {strides = array<i32>} : memref<128x128xbf16, #tpu.memory_space<vmem>>, vector<128x128xbf16>,
    return
  }
  func.func @transform_0(%arg0: i32, %arg1: i32) -> (i32, i32) {
    %c0_i32 = arith.constant 0 : i32
    %c0_i32_0 = arith.constant 0 : i32
    return %arg0, %c0_i32 : i32, i32
  }
  func.func @transform_1(%arg0: i32, %arg1: i32) -> (i32, i32) {
    %c0_i32 = arith.constant 0 : i32
    %c0_i32_0 = arith.constant 0 : i32
    return %c0_i32, %arg1 : i32, i32
  }
  func.func @transform_2(%arg0: i32, %arg1: i32) -> (i32, i32) {
    %c0_i32 = arith.constant 0 : i32
    %c0_i32_0 = arith.constant 0 : i32
    return %c0_i32, %arg1 : i32, i32
  }
  func.func @transform_3(%arg0: i32, %arg1: i32) -> (i32, i32) {
    %c0_i32 = arith.constant 0 : i32
    return %arg0, %arg1 : i32, i32
  }
}

module attributes {stable_mosaic.version = 11 : i64} {
  func.func @_fuse_pred_kernel(%arg0: i32, %arg1: memref<128x128xbf16, #tpu.memory_space<vmem>>, %arg2: memref<128x128xbf16, #tpu.memory_space<vmem>>, %arg3: memref<128x128xbf16, #tpu.memory_space<vmem>>, %arg4: memref<128x128xbf16, #tpu.memory_space<vmem>>, %arg5: memref<512x128xbf16, #tpu.memory_space<vmem>>, %arg6: memref<1x128xf32, #tpu.memory_space<vmem>>, %arg7: memref<128x128xbf16, #tpu.memory_space<vmem>>, %arg8: memref<1x128xf32, #tpu.memory_space<vmem>>, %arg9: memref<128x128xf32, #tpu.memory_space<vmem>>) attributes {dimension_semantics = [#tpu.dimension_semantics<parallel>], iteration_bounds = array<i64: 1>, scalar_prefetch = 0 : i64, scratch_operands = 0 : i64, tpu.core_type = #tpu.core_type<tc>, window_params = [{transform_indices = @transform_0, window_bounds = array<i64: 128, 128>}, {transform_indices = @transform_1, window_bounds = array<i64: 128, 128>}, {transform_indices = @transform_2, window_bounds = array<i64: 128, 128>}, {transform_indices = @transform_3, window_bounds = array<i64: 128, 128>}, {pipeline_mode = #tpu.pipeline_mode<synchronous>, transform_indices = @transform_4, window_bounds = array<i64: 512, 128>}, {pipeline_mode = #tpu.pipeline_mode<synchronous>, transform_indices = @transform_5, window_bounds = array<i64: 1, 128>}, {pipeline_mode = #tpu.pipeline_mode<synchronous>, transform_indices = @transform_6, window_bounds = array<i64: 128, 128>}, {pipeline_mode = #tpu.pipeline_mode<synchronous>, transform_indices = @transform_7, window_bounds = array<i64: 1, 128>}, {transform_indices = @transform_8, window_bounds = array<i64: 128, 128>}]} {
    %c0 = arith.constant 0 : index
    %c0_0 = arith.constant 0 : index
    %0 = vector.load %arg1[%c0, %c0_0] : memref<128x128xbf16, #tpu.memory_space<vmem>>, vector<128x128xbf16>
    %c0_1 = arith.constant 0 : index
    %c0_2 = arith.constant 0 : index
    %1 = vector.load %arg5[%c0_1, %c0_2] : memref<512x128xbf16, #tpu.memory_space<vmem>>, vector<128x128xbf16>
    %cst = arith.constant dense<0.000000e+00> : vector<128x128xf32>
    %2 = tpu.matmul %0, %1, %cst {dimension_numbers = #tpu.dot_dimension_numbers<[1], [0], [0], [1], [0, 0, 1, 1], [], []>} : vector<128x128xbf16>, vector<128x128xbf16>, vector<128x128xf32> -> vector<128x128xf32>
    %c0_3 = arith.constant 0 : index
    %c0_4 = arith.constant 0 : index
    %3 = vector.load %arg2[%c0_3, %c0_4] : memref<128x128xbf16, #tpu.memory_space<vmem>>, vector<128x128xbf16>
    %c128 = arith.constant 128 : index
    %c0_5 = arith.constant 0 : index
    %4 = vector.load %arg5[%c128, %c0_5] : memref<512x128xbf16, #tpu.memory_space<vmem>>, vector<128x128xbf16>
    %cst_6 = arith.constant dense<0.000000e+00> : vector<128x128xf32>
    %5 = tpu.matmul %3, %4, %cst_6 {dimension_numbers = #tpu.dot_dimension_numbers<[1], [0], [0], [1], [0, 0, 1, 1], [], []>} : vector<128x128xbf16>, vector<128x128xbf16>, vector<128x128xf32> -> vector<128x128xf32>
    %6 = arith.addf %2, %5 : vector<128x128xf32>
    %c0_7 = arith.constant 0 : index
    %c0_8 = arith.constant 0 : index
    %7 = vector.load %arg3[%c0_7, %c0_8] : memref<128x128xbf16, #tpu.memory_space<vmem>>, vector<128x128xbf16>
    %c256 = arith.constant 256 : index
    %c0_9 = arith.constant 0 : index
    %8 = vector.load %arg5[%c256, %c0_9] : memref<512x128xbf16, #tpu.memory_space<vmem>>, vector<128x128xbf16>
    %cst_10 = arith.constant dense<0.000000e+00> : vector<128x128xf32>
    %9 = tpu.matmul %7, %8, %cst_10 {dimension_numbers = #tpu.dot_dimension_numbers<[1], [0], [0], [1], [0, 0, 1, 1], [], []>} : vector<128x128xbf16>, vector<128x128xbf16>, vector<128x128xf32> -> vector<128x128xf32>
    %10 = arith.addf %6, %9 : vector<128x128xf32>
    %c0_11 = arith.constant 0 : index
    %c0_12 = arith.constant 0 : index
    %11 = vector.load %arg4[%c0_11, %c0_12] : memref<128x128xbf16, #tpu.memory_space<vmem>>, vector<128x128xbf16>
    %c384 = arith.constant 384 : index
    %c0_13 = arith.constant 0 : index
    %12 = vector.load %arg5[%c384, %c0_13] : memref<512x128xbf16, #tpu.memory_space<vmem>>, vector<128x128xbf16>
    %cst_14 = arith.constant dense<0.000000e+00> : vector<128x128xf32>
    %13 = tpu.matmul %11, %12, %cst_14 {dimension_numbers = #tpu.dot_dimension_numbers<[1], [0], [0], [1], [0, 0, 1, 1], [], []>} : vector<128x128xbf16>, vector<128x128xbf16>, vector<128x128xf32> -> vector<128x128xf32>
    %14 = arith.addf %10, %13 : vector<128x128xf32>
    %c0_15 = arith.constant 0 : index
    %c0_16 = arith.constant 0 : index
    %15 = vector.load %arg6[%c0_15, %c0_16] : memref<1x128xf32, #tpu.memory_space<vmem>>, vector<1x128xf32>
    %16 = vector.broadcast %15 : vector<1x128xf32> to vector<128x128xf32>
    %17 = arith.addf %14, %16 : vector<128x128xf32>
    %cst_17 = arith.constant 0.000000e+00 : f32
    %18 = vector.broadcast %cst_17 : f32 to vector<128x128xf32>
    %19 = arith.maximumf %17, %18 : vector<128x128xf32>
    %20 = arith.truncf %19 : vector<128x128xf32> to vector<128x128xbf16>
    %c0_18 = arith.constant 0 : index
    %c0_19 = arith.constant 0 : index
    %21 = vector.load %arg7[%c0_18, %c0_19] : memref<128x128xbf16, #tpu.memory_space<vmem>>, vector<128x128xbf16>
    %cst_20 = arith.constant dense<0.000000e+00> : vector<128x128xf32>
    %22 = tpu.matmul %20, %21, %cst_20 {dimension_numbers = #tpu.dot_dimension_numbers<[1], [0], [0], [1], [0, 0, 1, 1], [], []>} : vector<128x128xbf16>, vector<128x128xbf16>, vector<128x128xf32> -> vector<128x128xf32>
    %c0_21 = arith.constant 0 : index
    %c0_22 = arith.constant 0 : index
    %23 = vector.load %arg8[%c0_21, %c0_22] : memref<1x128xf32, #tpu.memory_space<vmem>>, vector<1x128xf32>
    %24 = vector.broadcast %23 : vector<1x128xf32> to vector<128x128xf32>
    %25 = arith.addf %22, %24 : vector<128x128xf32>
    %c0_23 = arith.constant 0 : index
    %c0_24 = arith.constant 0 : index
    %26 = vector.load %arg9[%c0_23, %c0_24] : memref<128x128xf32, #tpu.memory_space<vmem>>, vector<128x128xf32>
    tpu.vector_store %arg9[%c0_23, %c0_24], %25 {strides = array<i32>} : memref<128x128xf32, #tpu.memory_space<vmem>>, vector<128x128xf32>,
    return
  }
  func.func @transform_0(%arg0: i32) -> (i32, i32) {
    %c0_i32 = arith.constant 0 : i32
    %c0_i32_0 = arith.constant 0 : i32
    return %arg0, %c0_i32 : i32, i32
  }
  func.func @transform_1(%arg0: i32) -> (i32, i32) {
    %c0_i32 = arith.constant 0 : i32
    %c0_i32_0 = arith.constant 0 : i32
    return %arg0, %c0_i32 : i32, i32
  }
  func.func @transform_2(%arg0: i32) -> (i32, i32) {
    %c0_i32 = arith.constant 0 : i32
    %c0_i32_0 = arith.constant 0 : i32
    return %arg0, %c0_i32 : i32, i32
  }
  func.func @transform_3(%arg0: i32) -> (i32, i32) {
    %c0_i32 = arith.constant 0 : i32
    %c0_i32_0 = arith.constant 0 : i32
    return %arg0, %c0_i32 : i32, i32
  }
  func.func @transform_4(%arg0: i32) -> (i32, i32) {
    %c0_i32 = arith.constant 0 : i32
    %c0_i32_0 = arith.constant 0 : i32
    %c0_i32_1 = arith.constant 0 : i32
    return %c0_i32, %c0_i32_0 : i32, i32
  }
  func.func @transform_5(%arg0: i32) -> (i32, i32) {
    %c0_i32 = arith.constant 0 : i32
    %c0_i32_0 = arith.constant 0 : i32
    %c0_i32_1 = arith.constant 0 : i32
    return %c0_i32, %c0_i32_0 : i32, i32
  }
  func.func @transform_6(%arg0: i32) -> (i32, i32) {
    %c0_i32 = arith.constant 0 : i32
    %c0_i32_0 = arith.constant 0 : i32
    %c0_i32_1 = arith.constant 0 : i32
    return %c0_i32, %c0_i32_0 : i32, i32
  }
  func.func @transform_7(%arg0: i32) -> (i32, i32) {
    %c0_i32 = arith.constant 0 : i32
    %c0_i32_0 = arith.constant 0 : i32
    %c0_i32_1 = arith.constant 0 : i32
    return %c0_i32, %c0_i32_0 : i32, i32
  }
  func.func @transform_8(%arg0: i32) -> (i32, i32) {
    %c0_i32 = arith.constant 0 : i32
    %c0_i32_0 = arith.constant 0 : i32
    return %arg0, %c0_i32 : i32, i32
  }
}

module attributes {stable_mosaic.version = 11 : i64} {
  func.func @_w_interp_kernel(%arg0: i32, %arg1: i32, %arg2: memref<32x8xf32, #tpu.memory_space<vmem>>, %arg3: memref<1x8x8x128xf32, #tpu.memory_space<vmem>>, %arg4: memref<1x8x32x128xf32, #tpu.memory_space<vmem>>) attributes {dimension_semantics = [#tpu.dimension_semantics<parallel>, #tpu.dimension_semantics<parallel>], iteration_bounds = array<i64: 2, 4>, scalar_prefetch = 0 : i64, scratch_operands = 0 : i64, tpu.core_type = #tpu.core_type<tc>, window_params = [{pipeline_mode = #tpu.pipeline_mode<synchronous>, transform_indices = @transform_0, window_bounds = array<i64: 32, 8>}, {transform_indices = @transform_1, window_bounds = array<i64: 1, 8, 8, 128>}, {transform_indices = @transform_2, window_bounds = array<i64: 1, 8, 32, 128>}]} {
    %c0 = arith.constant 0 : index
    %c0_0 = arith.constant 0 : index
    %0 = vector.load %arg2[%c0, %c0_0] : memref<32x8xf32, #tpu.memory_space<vmem>>, vector<32x8xf32>
    %c0_1 = arith.constant 0 : index
    %c0_2 = arith.constant 0 : index
    %c0_3 = arith.constant 0 : index
    %c0_4 = arith.constant 0 : index
    %1 = vector.load %arg3[%c0_1, %c0_2, %c0_3, %c0_4] : memref<1x8x8x128xf32, #tpu.memory_space<vmem>>, vector<1x1x8x128xf32>
    %2 = vector.shape_cast %1 : vector<1x1x8x128xf32> to vector<8x128xf32>
    %cst = arith.constant dense<0.000000e+00> : vector<32x128xf32>
    %3 = tpu.matmul %0, %2, %cst {dimension_numbers = #tpu.dot_dimension_numbers<[1], [0], [0], [1], [0, 0, 1, 1], [], []>} : vector<32x8xf32>, vector<8x128xf32>, vector<32x128xf32> -> vector<32x128xf32>
    %c0_5 = arith.constant 0 : index
    %c0_6 = arith.constant 0 : index
    %c0_7 = arith.constant 0 : index
    %c0_8 = arith.constant 0 : index
    %4 = vector.load %arg4[%c0_5, %c0_6, %c0_7, %c0_8] : memref<1x8x32x128xf32, #tpu.memory_space<vmem>>, vector<1x1x32x128xf32>
    %5 = vector.shape_cast %4 : vector<1x1x32x128xf32> to vector<32x128xf32>
    %6 = vector.shape_cast %3 : vector<32x128xf32> to vector<1x1x32x128xf32>
    tpu.vector_store %arg4[%c0_5, %c0_6, %c0_7, %c0_8], %6 {strides = array<i32>} : memref<1x8x32x128xf32, #tpu.memory_space<vmem>>, vector<1x1x32x128xf32>,
    %c0_9 = arith.constant 0 : index
    %c1 = arith.constant 1 : index
    %c0_10 = arith.constant 0 : index
    %c0_11 = arith.constant 0 : index
    %7 = vector.load %arg3[%c0_9, %c1, %c0_10, %c0_11] : memref<1x8x8x128xf32, #tpu.memory_space<vmem>>, vector<1x1x8x128xf32>
    %8 = vector.shape_cast %7 : vector<1x1x8x128xf32> to vector<8x128xf32>
    %cst_12 = arith.constant dense<0.000000e+00> : vector<32x128xf32>
    %9 = tpu.matmul %0, %8, %cst_12 {dimension_numbers = #tpu.dot_dimension_numbers<[1], [0], [0], [1], [0, 0, 1, 1], [], []>} : vector<32x8xf32>, vector<8x128xf32>, vector<32x128xf32> -> vector<32x128xf32>
    %c0_13 = arith.constant 0 : index
    %c1_14 = arith.constant 1 : index
    %c0_15 = arith.constant 0 : index
    %c0_16 = arith.constant 0 : index
    %10 = vector.load %arg4[%c0_13, %c1_14, %c0_15, %c0_16] : memref<1x8x32x128xf32, #tpu.memory_space<vmem>>, vector<1x1x32x128xf32>
    %11 = vector.shape_cast %10 : vector<1x1x32x128xf32> to vector<32x128xf32>
    %12 = vector.shape_cast %9 : vector<32x128xf32> to vector<1x1x32x128xf32>
    tpu.vector_store %arg4[%c0_13, %c1_14, %c0_15, %c0_16], %12 {strides = array<i32>} : memref<1x8x32x128xf32, #tpu.memory_space<vmem>>, vector<1x1x32x128xf32>,
    %c0_17 = arith.constant 0 : index
    %c2 = arith.constant 2 : index
    %c0_18 = arith.constant 0 : index
    %c0_19 = arith.constant 0 : index
    %13 = vector.load %arg3[%c0_17, %c2, %c0_18, %c0_19] : memref<1x8x8x128xf32, #tpu.memory_space<vmem>>, vector<1x1x8x128xf32>
    %14 = vector.shape_cast %13 : vector<1x1x8x128xf32> to vector<8x128xf32>
    %cst_20 = arith.constant dense<0.000000e+00> : vector<32x128xf32>
    %15 = tpu.matmul %0, %14, %cst_20 {dimension_numbers = #tpu.dot_dimension_numbers<[1], [0], [0], [1], [0, 0, 1, 1], [], []>} : vector<32x8xf32>, vector<8x128xf32>, vector<32x128xf32> -> vector<32x128xf32>
    %c0_21 = arith.constant 0 : index
    %c2_22 = arith.constant 2 : index
    %c0_23 = arith.constant 0 : index
    %c0_24 = arith.constant 0 : index
    %16 = vector.load %arg4[%c0_21, %c2_22, %c0_23, %c0_24] : memref<1x8x32x128xf32, #tpu.memory_space<vmem>>, vector<1x1x32x128xf32>
    %17 = vector.shape_cast %16 : vector<1x1x32x128xf32> to vector<32x128xf32>
    %18 = vector.shape_cast %15 : vector<32x128xf32> to vector<1x1x32x128xf32>
    tpu.vector_store %arg4[%c0_21, %c2_22, %c0_23, %c0_24], %18 {strides = array<i32>} : memref<1x8x32x128xf32, #tpu.memory_space<vmem>>, vector<1x1x32x128xf32>,
    %c0_25 = arith.constant 0 : index
    %c3 = arith.constant 3 : index
    %c0_26 = arith.constant 0 : index
    %c0_27 = arith.constant 0 : index
    %19 = vector.load %arg3[%c0_25, %c3, %c0_26, %c0_27] : memref<1x8x8x128xf32, #tpu.memory_space<vmem>>, vector<1x1x8x128xf32>
    %20 = vector.shape_cast %19 : vector<1x1x8x128xf32> to vector<8x128xf32>
    %cst_28 = arith.constant dense<0.000000e+00> : vector<32x128xf32>
    %21 = tpu.matmul %0, %20, %cst_28 {dimension_numbers = #tpu.dot_dimension_numbers<[1], [0], [0], [1], [0, 0, 1, 1], [], []>} : vector<32x8xf32>, vector<8x128xf32>, vector<32x128xf32> -> vector<32x128xf32>
    %c0_29 = arith.constant 0 : index
    %c3_30 = arith.constant 3 : index
    %c0_31 = arith.constant 0 : index
    %c0_32 = arith.constant 0 : index
    %22 = vector.load %arg4[%c0_29, %c3_30, %c0_31, %c0_32] : memref<1x8x32x128xf32, #tpu.memory_space<vmem>>, vector<1x1x32x128xf32>
    %23 = vector.shape_cast %22 : vector<1x1x32x128xf32> to vector<32x128xf32>
    %24 = vector.shape_cast %21 : vector<32x128xf32> to vector<1x1x32x128xf32>
    tpu.vector_store %arg4[%c0_29, %c3_30, %c0_31, %c0_32], %24 {strides = array<i32>} : memref<1x8x32x128xf32, #tpu.memory_space<vmem>>, vector<1x1x32x128xf32>,
    %c0_33 = arith.constant 0 : index
    %c4 = arith.constant 4 : index
    %c0_34 = arith.constant 0 : index
    %c0_35 = arith.constant 0 : index
    %25 = vector.load %arg3[%c0_33, %c4, %c0_34, %c0_35] : memref<1x8x8x128xf32, #tpu.memory_space<vmem>>, vector<1x1x8x128xf32>
    %26 = vector.shape_cast %25 : vector<1x1x8x128xf32> to vector<8x128xf32>
    %cst_36 = arith.constant dense<0.000000e+00> : vector<32x128xf32>
    %27 = tpu.matmul %0, %26, %cst_36 {dimension_numbers = #tpu.dot_dimension_numbers<[1], [0], [0], [1], [0, 0, 1, 1], [], []>} : vector<32x8xf32>, vector<8x128xf32>, vector<32x128xf32> -> vector<32x128xf32>
    %c0_37 = arith.constant 0 : index
    %c4_38 = arith.constant 4 : index
    %c0_39 = arith.constant 0 : index
    %c0_40 = arith.constant 0 : index
    %28 = vector.load %arg4[%c0_37, %c4_38, %c0_39, %c0_40] : memref<1x8x32x128xf32, #tpu.memory_space<vmem>>, vector<1x1x32x128xf32>
    %29 = vector.shape_cast %28 : vector<1x1x32x128xf32> to vector<32x128xf32>
    %30 = vector.shape_cast %27 : vector<32x128xf32> to vector<1x1x32x128xf32>
    tpu.vector_store %arg4[%c0_37, %c4_38, %c0_39, %c0_40], %30 {strides = array<i32>} : memref<1x8x32x128xf32, #tpu.memory_space<vmem>>, vector<1x1x32x128xf32>,
    %c0_41 = arith.constant 0 : index
    %c5 = arith.constant 5 : index
    %c0_42 = arith.constant 0 : index
    %c0_43 = arith.constant 0 : index
    %31 = vector.load %arg3[%c0_41, %c5, %c0_42, %c0_43] : memref<1x8x8x128xf32, #tpu.memory_space<vmem>>, vector<1x1x8x128xf32>
    %32 = vector.shape_cast %31 : vector<1x1x8x128xf32> to vector<8x128xf32>
    %cst_44 = arith.constant dense<0.000000e+00> : vector<32x128xf32>
    %33 = tpu.matmul %0, %32, %cst_44 {dimension_numbers = #tpu.dot_dimension_numbers<[1], [0], [0], [1], [0, 0, 1, 1], [], []>} : vector<32x8xf32>, vector<8x128xf32>, vector<32x128xf32> -> vector<32x128xf32>
    %c0_45 = arith.constant 0 : index
    %c5_46 = arith.constant 5 : index
    %c0_47 = arith.constant 0 : index
    %c0_48 = arith.constant 0 : index
    %34 = vector.load %arg4[%c0_45, %c5_46, %c0_47, %c0_48] : memref<1x8x32x128xf32, #tpu.memory_space<vmem>>, vector<1x1x32x128xf32>
    %35 = vector.shape_cast %34 : vector<1x1x32x128xf32> to vector<32x128xf32>
    %36 = vector.shape_cast %33 : vector<32x128xf32> to vector<1x1x32x128xf32>
    tpu.vector_store %arg4[%c0_45, %c5_46, %c0_47, %c0_48], %36 {strides = array<i32>} : memref<1x8x32x128xf32, #tpu.memory_space<vmem>>, vector<1x1x32x128xf32>,
    %c0_49 = arith.constant 0 : index
    %c6 = arith.constant 6 : index
    %c0_50 = arith.constant 0 : index
    %c0_51 = arith.constant 0 : index
    %37 = vector.load %arg3[%c0_49, %c6, %c0_50, %c0_51] : memref<1x8x8x128xf32, #tpu.memory_space<vmem>>, vector<1x1x8x128xf32>
    %38 = vector.shape_cast %37 : vector<1x1x8x128xf32> to vector<8x128xf32>
    %cst_52 = arith.constant dense<0.000000e+00> : vector<32x128xf32>
    %39 = tpu.matmul %0, %38, %cst_52 {dimension_numbers = #tpu.dot_dimension_numbers<[1], [0], [0], [1], [0, 0, 1, 1], [], []>} : vector<32x8xf32>, vector<8x128xf32>, vector<32x128xf32> -> vector<32x128xf32>
    %c0_53 = arith.constant 0 : index
    %c6_54 = arith.constant 6 : index
    %c0_55 = arith.constant 0 : index
    %c0_56 = arith.constant 0 : index
    %40 = vector.load %arg4[%c0_53, %c6_54, %c0_55, %c0_56] : memref<1x8x32x128xf32, #tpu.memory_space<vmem>>, vector<1x1x32x128xf32>
    %41 = vector.shape_cast %40 : vector<1x1x32x128xf32> to vector<32x128xf32>
    %42 = vector.shape_cast %39 : vector<32x128xf32> to vector<1x1x32x128xf32>
    tpu.vector_store %arg4[%c0_53, %c6_54, %c0_55, %c0_56], %42 {strides = array<i32>} : memref<1x8x32x128xf32, #tpu.memory_space<vmem>>, vector<1x1x32x128xf32>,
    %c0_57 = arith.constant 0 : index
    %c7 = arith.constant 7 : index
    %c0_58 = arith.constant 0 : index
    %c0_59 = arith.constant 0 : index
    %43 = vector.load %arg3[%c0_57, %c7, %c0_58, %c0_59] : memref<1x8x8x128xf32, #tpu.memory_space<vmem>>, vector<1x1x8x128xf32>
    %44 = vector.shape_cast %43 : vector<1x1x8x128xf32> to vector<8x128xf32>
    %cst_60 = arith.constant dense<0.000000e+00> : vector<32x128xf32>
    %45 = tpu.matmul %0, %44, %cst_60 {dimension_numbers = #tpu.dot_dimension_numbers<[1], [0], [0], [1], [0, 0, 1, 1], [], []>} : vector<32x8xf32>, vector<8x128xf32>, vector<32x128xf32> -> vector<32x128xf32>
    %c0_61 = arith.constant 0 : index
    %c7_62 = arith.constant 7 : index
    %c0_63 = arith.constant 0 : index
    %c0_64 = arith.constant 0 : index
    %46 = vector.load %arg4[%c0_61, %c7_62, %c0_63, %c0_64] : memref<1x8x32x128xf32, #tpu.memory_space<vmem>>, vector<1x1x32x128xf32>
    %47 = vector.shape_cast %46 : vector<1x1x32x128xf32> to vector<32x128xf32>
    %48 = vector.shape_cast %45 : vector<32x128xf32> to vector<1x1x32x128xf32>
    tpu.vector_store %arg4[%c0_61, %c7_62, %c0_63, %c0_64], %48 {strides = array<i32>} : memref<1x8x32x128xf32, #tpu.memory_space<vmem>>, vector<1x1x32x128xf32>,
    return
  }
  func.func @transform_0(%arg0: i32, %arg1: i32) -> (i32, i32) {
    %c0_i32 = arith.constant 0 : i32
    %c0_i32_0 = arith.constant 0 : i32
    %c0_i32_1 = arith.constant 0 : i32
    return %c0_i32, %c0_i32_0 : i32, i32
  }
  func.func @transform_1(%arg0: i32, %arg1: i32) -> (i32, i32, i32, i32) {
    %c0_i32 = arith.constant 0 : i32
    %c0_i32_0 = arith.constant 0 : i32
    %c0_i32_1 = arith.constant 0 : i32
    return %arg0, %arg1, %c0_i32, %c0_i32_0 : i32, i32, i32, i32
  }
  func.func @transform_2(%arg0: i32, %arg1: i32) -> (i32, i32, i32, i32) {
    %c0_i32 = arith.constant 0 : i32
    %c0_i32_0 = arith.constant 0 : i32
    %c0_i32_1 = arith.constant 0 : i32
    return %arg0, %arg1, %c0_i32, %c0_i32_0 : i32, i32, i32, i32
  }
}

</mosaic_0001>

<bundles_post_ra>
// kernel: encoder_decoder_forward.17
= control target key start
LH: loop header
LB: loop body
LE: loop exit
PB: predicated region body
PF: predicated region fallthrough
CT: control target
= control target key end

     0   :  { %s907_s1 = inlined_call_operand.vmem [shape: bf16[128,128], index: 1, kind: input, shape index: {}]   ;;  %s908_s0 = inlined_call_operand.vmem [shape: bf16[128,128], index: 0, kind: input, shape index: {}]   ;;  %s909_s2 = inlined_call_operand.vmem [shape: f32[1,128], index: 2, kind: input, shape index: {}]   ;;  %s910_s3 = inlined_call_operand.vmem [shape: bf16[128,128], index: 3, kind: output, shape index: {}]  }
   0x1   :  { %v635_v0 = vld [vmem:[%s907_s1] sm:$0xff]   ;;  %v636_v1 = vld [vmem:[%s907_s1 + $0x8] sm:$0xff]   ;;  %v637_v2 = vld [vmem:[%s907_s1 + $0x10] sm:$0xff]  }
   0x2   :  { %587 = vmatprep.subr.bf16.mxu0 %v635_v0  ;;  %619 = vmatprep.subr.bf16.mxu1 %v635_v0  ;;  %v638_v3 = vld [vmem:[%s907_s1 + $0x18] sm:$0xff]   ;;  %v643_v4 = vld [vmem:[%s908_s0] sm:$0xff]   ;;  %v640_v7 = vld [vmem:[%s907_s1 + $0x28] sm:$0xff]  }
   0x3   :  { %588 = vmatpush3.bf16.msra.mxu0 %v635_v0  ;;  %627 = vmatpush3.bf16.msra.mxu1 %v635_v0  ;;  %v644_v5 = vld [vmem:[%s908_s0 + $0x20] sm:$0xff]   ;;  %v641_v8 = vld [vmem:[%s907_s1 + $0x30] sm:$0xff]   ;;  %v642_v9 = vld [vmem:[%s907_s1 + $0x38] sm:$0xff]  }
   0x4   :  { %589 = vmatprep.subr.bf16.mxu0 %v636_v1  ;;  %620 = vmatprep.subr.bf16.mxu1 %v636_v1  ;;  %v639_v6 = vld [vmem:[%s907_s1 + $0x20] sm:$0xff]   ;;  %v645_v10 = vld [vmem:[%s908_s0 + $0x8] sm:$0xff]   ;;  %v647_v12 = vld [vmem:[%s908_s0 + $0x10] sm:$0xff]  }
   0x5   :  { %603 = vmatprep.mubr.bf16.mxu0 %v643_v4  ;;  %611 = vmatprep.mubr.bf16.mxu1 %v644_v5  ;;  %v646_v11 = vld [vmem:[%s908_s0 + $0x28] sm:$0xff]   ;;  %v648_v13 = vld [vmem:[%s908_s0 + $0x30] sm:$0xff]   ;;  %v649_v14 = vld [vmem:[%s908_s0 + $0x18] sm:$0xff]  }
   0x6   :  { %v650_v15 = vld [vmem:[%s908_s0 + $0x38] sm:$0xff]   ;;  %v754_v16 = vld [vmem:[%s909_s2] ss:$0 sm:$0xff] }
   0x7   :  { %590 = vmatpush3.bf16.msra.mxu0 %v636_v1  ;;  %628 = vmatpush3.bf16.msra.mxu1 %v636_v1 }
   0x8   :  { %591 = vmatprep.subr.bf16.mxu0 %v637_v2  ;;  %621 = vmatprep.subr.bf16.mxu1 %v637_v2 }
   0xb   :  { %592 = vmatpush3.bf16.msra.mxu0 %v637_v2  ;;  %629 = vmatpush3.bf16.msra.mxu1 %v637_v2 }
   0xc   :  { %593 = vmatprep.subr.bf16.mxu0 %v638_v3  ;;  %622 = vmatprep.subr.bf16.mxu1 %v638_v3 }
   0xf   :  { %594 = vmatpush3.bf16.msra.mxu0 %v638_v3  ;;  %630 = vmatpush3.bf16.msra.mxu1 %v638_v3 }
  0x10   :  { %595 = vmatprep.subr.bf16.mxu0 %v639_v6  ;;  %623 = vmatprep.subr.bf16.mxu1 %v639_v6 }
  0x13   :  { %596 = vmatpush3.bf16.msra.mxu0 %v639_v6  ;;  %631 = vmatpush3.bf16.msra.mxu1 %v639_v6 }
  0x14   :  { %597 = vmatprep.subr.bf16.mxu0 %v640_v7  ;;  %624 = vmatprep.subr.bf16.mxu1 %v640_v7 }
  0x17   :  { %598 = vmatpush3.bf16.msra.mxu0 %v640_v7  ;;  %632 = vmatpush3.bf16.msra.mxu1 %v640_v7 }
  0x18   :  { %599 = vmatprep.subr.bf16.mxu0 %v641_v8  ;;  %625 = vmatprep.subr.bf16.mxu1 %v641_v8 }
  0x1b   :  { %600 = vmatpush3.bf16.msra.mxu0 %v641_v8  ;;  %633 = vmatpush3.bf16.msra.mxu1 %v641_v8 }
  0x1c   :  { %601 = vmatprep.subr.bf16.mxu0 %v642_v9  ;;  %626 = vmatprep.subr.bf16.mxu1 %v642_v9 }
  0x1f   :  { %602 = vmatpush3.bf16.msra.mxu0 %v642_v9  ;;  %634 = vmatpush3.bf16.msra.mxu1 %v642_v9 }
  0x22   :  { %604 = vmatmul.mubr.bf16.vlgmr.msra.gmra.mrb[0].mxu0 %v645_v10  ;;  %612 = vmatmul.mubr.bf16.vlgmr.msra.gmra.mrb[0].mxu1 %v646_v11 }
  0x23   :  { %607 = vmatprep.mubr.bf16.mxu0 %v647_v12  ;;  %615 = vmatprep.mubr.bf16.mxu1 %v648_v13 }
  0x2a   :  { %608 = vmatmul.mubr.bf16.gmra.mrb[4].mxu0 %v649_v14  ;;  %616 = vmatmul.mubr.bf16.gmra.mrb[4].mxu1 %v650_v15 }
  0xf5   :  { %v605_v17 = vpop.f32.mrb[0].mxu0  ;;  %v613_v18 = vpop.f32.mrb[0].mxu1 }
  0xf6   :  { %v757_v19 = vadd.f32 %v605_v17, %v754_v16  ;;  %v760_v20 = vadd.f32 %v613_v18, %v754_v16  ;;  %v184_v21 = vpop.f32.mrb[1].mxu0  ;;  %v216_v22 = vpop.f32.mrb[1].mxu1 }
  0xf7   :  { %v763_v23 = vadd.f32 %v754_v16, %v184_v21  ;;  %v766_v24 = vadd.f32 %v754_v16, %v216_v22  ;;  %v606_v25 = vpop.f32.mrb[2].mxu0  ;;  %v614_v26 = vpop.f32.mrb[2].mxu1 }
  0xf8   :  { %v265_v27 = vmul.f32 0.044715, %v757_v19  ;;  %v273_v28 = vmul.f32 0.044715, %v760_v20  ;;  %v775_v33 = vadd.f32 %v606_v25, %v754_v16  ;;  %v778_v34 = vadd.f32 %v614_v26, %v754_v16  ;;  %v187_v35 = vpop.f32.mrb[3].mxu0  ;;  %v219_v36 = vpop.f32.mrb[3].mxu1 }
  0xf9   :  { %v263_v29 = vmul.f32 0.044715, %v763_v23  ;;  %v271_v30 = vmul.f32 0.044715, %v766_v24  ;;  %v783_v39 = vadd.f32 %v754_v16, %v187_v35  ;;  %v795_v51 = vadd.f32 %v754_v16, %v219_v36 }
  0xfa   :  { %v281_v31 = vmul.f32 %v265_v27, %v757_v19  ;;  %v289_v32 = vmul.f32 %v273_v28, %v760_v20  ;;  %v266_v42 = vmul.f32 0.044715, %v775_v33  ;;  %v274_v45 = vmul.f32 0.044715, %v778_v34 }
  0xfb   :  { %v279_v37 = vmul.f32 %v263_v29, %v763_v23  ;;  %v287_v38 = vmul.f32 %v271_v30, %v766_v24  ;;  %v264_v57 = vmul.f32 0.044715, %v783_v39  ;;  %v272_v6 = vmul.f32 0.044715, %v795_v51 }
  0xfc   :  { %v297_v40 = vmul.f32 %v281_v31, %v757_v19  ;;  %v305_v41 = vmul.f32 %v289_v32, %v760_v20  ;;  %v282_v50 = vmul.f32 %v266_v42, %v775_v33  ;;  %v290_v56 = vmul.f32 %v274_v45, %v778_v34 }
  0xfd   :  { %v295_v43 = vmul.f32 %v279_v37, %v763_v23  ;;  %v303_v44 = vmul.f32 %v287_v38, %v766_v24  ;;  %v609_v46 = vpop.f32.mrb[4].mxu0  ;;  %v617_v47 = vpop.f32.mrb[4].mxu1  ;;  %v280_v3 = vmul.f32 %v264_v57, %v783_v39  ;;  %v288_v12 = vmul.f32 %v272_v6, %v795_v51 }
  0xfe   :  { %v313_v48 = vadd.f32 %v297_v40, %v757_v19  ;;  %v321_v49 = vadd.f32 %v305_v41, %v760_v20  ;;  %v200_v52 = vpop.f32.mrb[5].mxu0  ;;  %v232_v53 = vpop.f32.mrb[5].mxu1  ;;  %v298_v62 = vmul.f32 %v282_v50, %v775_v33  ;;  %v306_v2 = vmul.f32 %v290_v56, %v778_v34 }
  0xff   :  { %v311_v54 = vadd.f32 %v295_v43, %v763_v23  ;;  %v319_v55 = vadd.f32 %v303_v44, %v766_v24  ;;  %v610_v58 = vpop.f32.mrb[6].mxu0  ;;  %v618_v59 = vpop.f32.mrb[6].mxu1  ;;  %v811_v7 = vadd.f32 %v609_v46, %v754_v16  ;;  %v296_v9 = vmul.f32 %v280_v3, %v783_v39 }
 0x100   :  { %v329_v60 = vmul.f32 0.7978846, %v313_v48  ;;  %v337_v61 = vmul.f32 0.7978846, %v321_v49  ;;  %v802_v63 = vpop.f32.mrb[7].mxu0  ;;  %v806_v4 = vpop.f32.mrb[7].mxu1  ;;  %v314_v5 = vadd.f32 %v298_v62, %v775_v33  ;;  %v322_v8 = vadd.f32 %v306_v2, %v778_v34 }
 0x101   :  { %v327_v0 = vmul.f32 0.7978846, %v311_v54  ;;  %v335_v1 = vmul.f32 0.7978846, %v319_v55  ;;  %v816_v10 = vadd.f32 %v617_v47, %v754_v16  ;;  %v312_v14 = vadd.f32 %v296_v9, %v783_v39 }
 0x102   :  { %651 = vtanh.f32 %v329_v60  ;;  %v330_v11 = vmul.f32 0.7978846, %v314_v5  ;;  %v338_v13 = vmul.f32 0.7978846, %v322_v8  ;;  %v269_v15 = vmul.f32 0.044715, %v811_v7 }
 0x103   :  { %653 = vtanh.f32 %v337_v61  ;;  %v304_v17 = vmul.f32 %v288_v12, %v795_v51  ;;  %v277_v18 = vmul.f32 0.044715, %v816_v10  ;;  %v328_v21 = vmul.f32 0.7978846, %v312_v14 }
 0x104   :  { %655 = vtanh.f32 %v327_v0  ;;  %v285_v22 = vmul.f32 %v269_v15, %v811_v7  ;;  %v825_v25 = vadd.f32 %v754_v16, %v200_v52  ;;  %v830_v28 = vadd.f32 %v754_v16, %v232_v53 }
 0x105   :  { %657 = vtanh.f32 %v335_v1  ;;  %v320_v26 = vadd.f32 %v304_v17, %v795_v51  ;;  %v293_v27 = vmul.f32 %v277_v18, %v816_v10  ;;  %v833_v29 = vadd.f32 %v610_v58, %v754_v16 }
 0x106   :  { %659 = vtanh.f32 %v330_v11  ;;  %v301_v30 = vmul.f32 %v285_v22, %v811_v7  ;;  %v267_v31 = vmul.f32 0.044715, %v825_v25  ;;  %v275_v36 = vmul.f32 0.044715, %v830_v28 }
 0x107   :  { %661 = vtanh.f32 %v338_v13  ;;  %v336_v32 = vmul.f32 0.7978846, %v320_v26  ;;  %v309_v35 = vmul.f32 %v293_v27, %v816_v10  ;;  %v270_v40 = vmul.f32 0.044715, %v833_v29 }
 0x108   :  { %663 = vtanh.f32 %v328_v21  ;;  %v317_v37 = vadd.f32 %v301_v30, %v811_v7  ;;  %v283_v38 = vmul.f32 %v267_v31, %v825_v25  ;;  %v249_v42 = vmul.f32 0.5, %v757_v19 }
 0x109   :  { %665 = vtanh.f32 %v336_v32  ;;  %v325_v43 = vadd.f32 %v309_v35, %v816_v10  ;;  %v291_v44 = vmul.f32 %v275_v36, %v830_v28  ;;  %v257_v47 = vmul.f32 0.5, %v760_v20 }
 0x10a   :  { %v333_v48 = vmul.f32 0.7978846, %v317_v37  ;;  %v286_v49 = vmul.f32 %v270_v40, %v833_v29  ;;  %v247_v53 = vmul.f32 0.5, %v763_v23  ;;  %v299_v54 = vmul.f32 %v283_v38, %v825_v25 }
 0x10b   :  { %v850_v19 = vadd.f32 %v618_v59, %v754_v16  ;;  %v255_v56 = vmul.f32 0.5, %v766_v24  ;;  %v250_v57 = vmul.f32 0.5, %v775_v33  ;;  %v258_v58 = vmul.f32 0.5, %v778_v34 }
 0x10c   :  { %v652_v41 = vpop.eup %651  ;;  %v248_v20 = vmul.f32 0.5, %v783_v39  ;;  %v256_v62 = vmul.f32 0.5, %v795_v51  ;;  %v341_v0 = vmul.f32 0.7978846, %v325_v43  ;;  %v307_v23 = vmul.f32 %v291_v44, %v830_v28 }
 0x10d   :  { %v654_v45 = vpop.eup %653  ;;  %v361_v46 = vadd.f32 1.0, %v652_v41  ;;  %667 = vtanh.f32 %v333_v48  ;;  %v302_v3 = vmul.f32 %v286_v49, %v833_v29  ;;  %v315_v33 = vadd.f32 %v299_v54, %v825_v25 }
 0x10e   :  { %v656_v50 = vpop.eup %655  ;;  %v369_v52 = vadd.f32 1.0, %v654_v45  ;;  %v278_v34 = vmul.f32 0.044715, %v850_v19  ;;  %v864_v9 = vadd.f32 %v754_v16, %v802_v63  ;;  %v323_v13 = vadd.f32 %v307_v23, %v830_v28 }
 0x10f   :  { %v658_v55 = vpop.eup %657  ;;  %v377_v61 = vmul.f32 %v361_v46, %v249_v42  ;;  %v359_v2 = vadd.f32 1.0, %v656_v50  ;;  %v318_v51 = vadd.f32 %v302_v3, %v833_v29  ;;  %v236_v63 = vadd.f32 %v754_v16, %v806_v4 }
 0x110   :  { %v660_v60 = vpop.eup %659  ;;  %v385_v24 = vmul.f32 %v369_v52, %v257_v47  ;;  %v367_v6 = vadd.f32 1.0, %v658_v55  ;;  %v294_v14 = vmul.f32 %v278_v34, %v850_v19  ;;  %v268_v21 = vmul.f32 0.044715, %v864_v9 }
 0x111   :  { %v662_v1 = vpop.eup %661  ;;  %v362_v59 = vadd.f32 1.0, %v660_v60  ;;  %v375_v15 = vmul.f32 %v359_v2, %v247_v53  ;;  %v334_v18 = vmul.f32 0.7978846, %v318_v51  ;;  %v331_v32 = vmul.f32 0.7978846, %v315_v33 }
 0x112   :  { %v370_v5 = vadd.f32 1.0, %v662_v1  ;;  %v664_v39 = vpop.eup %663  ;;  %v310_v30 = vmul.f32 %v294_v14, %v850_v19  ;;  %v284_v35 = vmul.f32 %v268_v21, %v864_v9  ;;  %v276_v38 = vmul.f32 0.044715, %v236_v63 }
 0x113   :  { %v378_v8 = vmul.f32 %v362_v59, %v250_v57  ;;  %v360_v12 = vadd.f32 1.0, %v664_v39  ;;  %v666_v22 = vpop.eup %665  ;;  %669 = vtanh.f32 %v334_v18  ;;  %v383_v40 = vmul.f32 %v367_v6, %v255_v56 }
 0x114   :  { %v386_v11 = vmul.f32 %v370_v5, %v258_v58  ;;  %v368_v31 = vadd.f32 1.0, %v666_v22  ;;  %671 = vtanh.f32 %v341_v0  ;;  %v326_v37 = vadd.f32 %v310_v30, %v850_v19 }
 0x115   :  { %v532_v17 = vpack.c.bf16 %v378_v8, %v377_v61  ;;  %v376_v27 = vmul.f32 %v360_v12, %v248_v20  ;;  %v300_v4 = vmul.f32 %v284_v35, %v864_v9  ;;  %v339_v41 = vmul.f32 0.7978846, %v323_v13 }
 0x116   :  { %v552_v26 = vpack.c.bf16 %v386_v11, %v385_v24  ;;  %v384_v16 = vmul.f32 %v368_v31, %v256_v62  ;;  %v342_v42 = vmul.f32 0.7978846, %v326_v37  ;;  %v292_v43 = vmul.f32 %v276_v38, %v236_v63 }
 0x117   :  { %564 = vst [vmem:[%s910_s3 + $0x8] sm:$0xff] %v532_v17   ;;  %v527_v36 = vpack.c.bf16 %v376_v27, %v375_v15  ;;  %v668_v44 = vpop.eup %667  ;;  %673 = vtanh.f32 %v331_v32  ;;  %v316_v46 = vadd.f32 %v300_v4, %v864_v9  ;;  %v253_v55 = vmul.f32 0.5, %v811_v7 }
 0x118   :  { %568 = vst [vmem:[%s910_s3 + $0x28] sm:$0xff] %v552_v26   ;;  %v547_v45 = vpack.c.bf16 %v384_v16, %v383_v40  ;;  %675 = vtanh.f32 %v342_v42  ;;  %v308_v47 = vmul.f32 %v292_v43, %v236_v63  ;;  %v365_v50 = vadd.f32 1.0, %v668_v44 }
 0x119   :  { %528 = vst [vmem:[%s910_s3] sm:$0xff] %v527_v36   ;;  %v332_v48 = vmul.f32 0.7978846, %v316_v46  ;;  %677 = vtanh.f32 %v339_v41  ;;  %v254_v56 = vmul.f32 0.5, %v833_v29  ;;  %v261_v23 = vmul.f32 0.5, %v816_v10 }
 0x11a   :  { %567 = vst [vmem:[%s910_s3 + $0x20] sm:$0xff] %v547_v45   ;;  %v324_v49 = vadd.f32 %v308_v47, %v236_v63  ;;  %v381_v58 = vmul.f32 %v365_v50, %v253_v55  ;;  %v262_v1 = vmul.f32 0.5, %v850_v19  ;;  %v251_v5 = vmul.f32 0.5, %v825_v25 }
 0x11b   :  { %679 = vtanh.f32 %v332_v48  ;;  %v252_v33 = vmul.f32 0.5, %v864_v9  ;;  %v259_v51 = vmul.f32 0.5, %v830_v28  ;;  %v260_v11 = vmul.f32 0.5, %v236_v63 }
 0x11c   :  { %v340_v52 = vmul.f32 0.7978846, %v324_v49 }
 0x11d   :  { %v670_v53 = vpop.eup %669 }
 0x11e   :  { %v672_v54 = vpop.eup %671  ;;  %v366_v57 = vadd.f32 1.0, %v670_v53  ;;  %681 = vtanh.f32 %v340_v52 }
 0x11f   :  { %v373_v61 = vadd.f32 1.0, %v672_v54 }
 0x120   :  { %v382_v20 = vmul.f32 %v366_v57, %v254_v56 }
 0x121   :  { %v674_v60 = vpop.eup %673  ;;  %v389_v29 = vmul.f32 %v373_v61, %v261_v23 }
 0x122   :  { %v676_v62 = vpop.eup %675  ;;  %v542_v0 = vpack.c.bf16 %v382_v20, %v381_v58  ;;  %v363_v3 = vadd.f32 1.0, %v674_v60 }
 0x123   :  { %v374_v2 = vadd.f32 1.0, %v676_v62  ;;  %v678_v59 = vpop.eup %677 }
 0x124   :  { %566 = vst [vmem:[%s910_s3 + $0x18] sm:$0xff] %v542_v0   ;;  %v371_v39 = vadd.f32 1.0, %v678_v59  ;;  %v379_v8 = vmul.f32 %v363_v3, %v251_v5 }
 0x125   :  { %v680_v7 = vpop.eup %679  ;;  %v390_v24 = vmul.f32 %v374_v2, %v262_v1 }
 0x126   :  { %v364_v34 = vadd.f32 1.0, %v680_v7  ;;  %v387_v14 = vmul.f32 %v371_v39, %v259_v51 }
 0x127   :  { %v562_v6 = vpack.c.bf16 %v390_v24, %v389_v29 }
 0x128   :  { %v682_v10 = vpop.eup %681  ;;  %v380_v19 = vmul.f32 %v364_v34, %v252_v33 }
 0x129   :  { %570 = vst [vmem:[%s910_s3 + $0x38] sm:$0xff] %v562_v6   ;;  %v372_v12 = vadd.f32 1.0, %v682_v10 }
 0x12a   :  { %v537_v13 = vpack.c.bf16 %v380_v19, %v379_v8 }
 0x12b   :  { %v388_v15 = vmul.f32 %v372_v12, %v260_v11 }
 0x12c   :  { %565 = vst [vmem:[%s910_s3 + $0x10] sm:$0xff] %v537_v13  }
 0x12d   :  { %v557_v25 = vpack.c.bf16 %v388_v15, %v387_v14 }
 0x12f   :  { %569 = vst [vmem:[%s910_s3 + $0x30] sm:$0xff] %v557_v25  }

// kernel: encoder_decoder_forward.18
= control target key start
LH: loop header
LB: loop body
LE: loop exit
PB: predicated region body
PF: predicated region fallthrough
CT: control target
= control target key end

     0   :  { %s801_s1 = inlined_call_operand.vmem [shape: bf16[512,128], index: 1, kind: input, shape index: {}]   ;;  %s802_s0 = inlined_call_operand.vmem [shape: bf16[32,512], index: 0, kind: input, shape index: {}]   ;;  %s803_s2 = inlined_call_operand.vmem [shape: f32[1,128], index: 2, kind: input, shape index: {}]   ;;  %s804_s3 = inlined_call_operand.vmem [shape: bf16[32,128], index: 3, kind: output, shape index: {}]  }
   0x1   :  { %v600_v0 = vld [vmem:[%s801_s1 + $0x40] sm:$0xff]   ;;  %v604_v4 = vld [vmem:[%s801_s1 + $0x48] sm:$0xff]   ;;  %v608_v8 = vld [vmem:[%s801_s1 + $0x50] sm:$0xff]  }
   0x2   :  { %v601_v1 = vld [vmem:[%s801_s1 + $0xc0] sm:$0xff]   ;;  %544 = vmatprep.subr.bf16.mxu0 %v600_v0  ;;  %v605_v5 = vld [vmem:[%s801_s1 + $0xc8] sm:$0xff]   ;;  %v609_v9 = vld [vmem:[%s801_s1 + $0xd0] sm:$0xff]  }
   0x3   :  { %v602_v2 = vld [vmem:[%s801_s1] sm:$0xff]   ;;  %572 = vmatprep.subr.bf16.mxu1 %v601_v1  ;;  %v606_v6 = vld [vmem:[%s801_s1 + $0x8] sm:$0xff]   ;;  %v610_v10 = vld [vmem:[%s801_s1 + $0x10] sm:$0xff]  }
   0x4   :  { %v603_v3 = vld [vmem:[%s801_s1 + $0x80] sm:$0xff]   ;;  %545 = vmatpush3.bf16.msra.mxu0 %v602_v2  ;;  %v607_v7 = vld [vmem:[%s801_s1 + $0x88] sm:$0xff]   ;;  %v611_v11 = vld [vmem:[%s801_s1 + $0x90] sm:$0xff]  }
   0x5   :  { %573 = vmatpush3.bf16.msra.mxu1 %v603_v3  ;;  %546 = vmatprep.subr.bf16.mxu0 %v604_v4  ;;  %v612_v12 = vld [vmem:[%s801_s1 + $0x58] sm:$0xff]   ;;  %v616_v16 = vld [vmem:[%s801_s1 + $0x60] sm:$0xff]   ;;  %v620_v20 = vld [vmem:[%s801_s1 + $0x68] sm:$0xff]  }
   0x6   :  { %574 = vmatprep.subr.bf16.mxu1 %v605_v5  ;;  %v613_v13 = vld [vmem:[%s801_s1 + $0xd8] sm:$0xff]   ;;  %v617_v17 = vld [vmem:[%s801_s1 + $0xe0] sm:$0xff]   ;;  %v621_v21 = vld [vmem:[%s801_s1 + $0xe8] sm:$0xff]  }
   0x7   :  { %v614_v14 = vld [vmem:[%s801_s1 + $0x18] sm:$0xff]   ;;  %v618_v18 = vld [vmem:[%s801_s1 + $0x20] sm:$0xff]   ;;  %v622_v22 = vld [vmem:[%s801_s1 + $0x28] sm:$0xff]  }
   0x8   :  { %547 = vmatpush3.bf16.msra.mxu0 %v606_v6  ;;  %v615_v15 = vld [vmem:[%s801_s1 + $0x98] sm:$0xff]   ;;  %v619_v19 = vld [vmem:[%s801_s1 + $0xa0] sm:$0xff]   ;;  %v623_v23 = vld [vmem:[%s801_s1 + $0xa8] sm:$0xff]  }
   0x9   :  { %575 = vmatpush3.bf16.msra.mxu1 %v607_v7  ;;  %548 = vmatprep.subr.bf16.mxu0 %v608_v8  ;;  %v624_v24 = vld [vmem:[%s801_s1 + $0x70] sm:$0xff]   ;;  %v628_v28 = vld [vmem:[%s801_s1 + $0x78] sm:$0xff]   ;;  %v484_v42 = vld [vmem:[%s803_s2] ss:$0 sm:$0xff] }
   0xa   :  { %576 = vmatprep.subr.bf16.mxu1 %v609_v9  ;;  %v625_v25 = vld [vmem:[%s801_s1 + $0xf0] sm:$0xff]   ;;  %v629_v29 = vld [vmem:[%s801_s1 + $0xf8] sm:$0xff]  }
   0xb   :  { %v626_v26 = vld [vmem:[%s801_s1 + $0x30] sm:$0xff]   ;;  %v630_v30 = vld [vmem:[%s801_s1 + $0x38] sm:$0xff]  }
   0xc   :  { %549 = vmatpush3.bf16.msra.mxu0 %v610_v10  ;;  %v627_v27 = vld [vmem:[%s801_s1 + $0xb0] sm:$0xff]   ;;  %v631_v31 = vld [vmem:[%s801_s1 + $0xb8] sm:$0xff]  }
   0xd   :  { %577 = vmatpush3.bf16.msra.mxu1 %v611_v11  ;;  %550 = vmatprep.subr.bf16.mxu0 %v612_v12  ;;  %v632_v32 = vld [vmem:[%s802_s0] ss:$16 sps:$4 sm:$0xff]   ;;  %v634_v33 = vld [vmem:[%s802_s0 + $0x4] ss:$16 sps:$4 sm:$0xff]   ;;  %v635_v34 = vld [vmem:[%s802_s0 + $0x8] ss:$16 sps:$4 sm:$0xff]  }
   0xe   :  { %578 = vmatprep.subr.bf16.mxu1 %v613_v13  ;;  %v637_v35 = vld [vmem:[%s802_s0 + $0xc] ss:$16 sps:$4 sm:$0xff]   ;;  %358 = vmatprep.mubr.bf16.mxu0 %v634_v33  ;;  %v638_v36 = vld [vmem:[%s802_s0 + $0x24] ss:$16 sps:$4 sm:$0xff]   ;;  %v642_v38 = vld [vmem:[%s802_s0 + $0x20] ss:$16 sps:$4 sm:$0xff]  }
   0xf   :  { %407 = vmatprep.mubr.bf16.mxu1 %v637_v35  ;;  %v640_v37 = vld [vmem:[%s802_s0 + $0x2c] ss:$16 sps:$4 sm:$0xff]   ;;  %v643_v39 = vld [vmem:[%s802_s0 + $0x28] ss:$16 sps:$4 sm:$0xff]  }
  0x10   :  { %551 = vmatpush3.bf16.msra.mxu0 %v614_v14 }
  0x11   :  { %579 = vmatpush3.bf16.msra.mxu1 %v615_v15  ;;  %552 = vmatprep.subr.bf16.mxu0 %v616_v16 }
  0x12   :  { %580 = vmatprep.subr.bf16.mxu1 %v617_v17 }
  0x14   :  { %553 = vmatpush3.bf16.msra.mxu0 %v618_v18 }
  0x15   :  { %581 = vmatpush3.bf16.msra.mxu1 %v619_v19  ;;  %554 = vmatprep.subr.bf16.mxu0 %v620_v20 }
  0x16   :  { %582 = vmatprep.subr.bf16.mxu1 %v621_v21 }
  0x18   :  { %555 = vmatpush3.bf16.msra.mxu0 %v622_v22 }
  0x19   :  { %583 = vmatpush3.bf16.msra.mxu1 %v623_v23  ;;  %556 = vmatprep.subr.bf16.mxu0 %v624_v24 }
  0x1a   :  { %584 = vmatprep.subr.bf16.mxu1 %v625_v25 }
  0x1c   :  { %557 = vmatpush3.bf16.msra.mxu0 %v626_v26 }
  0x1d   :  { %585 = vmatpush3.bf16.msra.mxu1 %v627_v27  ;;  %558 = vmatprep.subr.bf16.mxu0 %v628_v28 }
  0x1e   :  { %586 = vmatprep.subr.bf16.mxu1 %v629_v29 }
  0x20   :  { %559 = vmatpush3.bf16.msra.mxu0 %v630_v30 }
  0x21   :  { %587 = vmatpush3.bf16.msra.mxu1 %v631_v31 }
  0x23   :  { %359 = vmatmul.mubr.bf16.vlgmr.msra.gmra.mrb[0].mxu0 %v632_v32 }
  0x24   :  { %408 = vmatmul.mubr.bf16.vlgmr.msra.gmra.mrb[0].mxu1 %v635_v34  ;;  %366 = vmatprep.mubr.bf16.mxu0 %v638_v36 }
  0x25   :  { %415 = vmatprep.mubr.bf16.mxu1 %v640_v37 }
  0x2b   :  { %367 = vmatmul.mubr.bf16.gmra.mrb[4].mxu0 %v642_v38 }
  0x2c   :  { %416 = vmatmul.mubr.bf16.gmra.mrb[4].mxu1 %v643_v39 }
  0xf6   :  { %v560_v40 = vpop.f32.mrb[0].mxu0 }
  0xf7   :  { %v588_v41 = vpop.f32.mrb[0].mxu1  ;;  %v561_v43 = vpop.f32.mrb[1].mxu0 }
  0xf8   :  { %v562_v44 = vadd.f32 %v561_v43, %v560_v40  ;;  %v589_v45 = vpop.f32.mrb[1].mxu1  ;;  %v563_v46 = vpop.f32.mrb[2].mxu0 }
  0xf9   :  { %v590_v47 = vadd.f32 %v589_v45, %v588_v41  ;;  %v591_v48 = vpop.f32.mrb[2].mxu1  ;;  %v564_v49 = vpop.f32.mrb[3].mxu0 }
  0xfa   :  { %v361_v50 = vadd.f32 %v562_v44, %v484_v42  ;;  %v565_v51 = vadd.f32 %v564_v49, %v563_v46  ;;  %v592_v52 = vpop.f32.mrb[3].mxu1 }
  0xfb   :  { %v593_v53 = vadd.f32 %v592_v52, %v591_v48 }
  0xfc   :  { %v410_v54 = vadd.f32 %v590_v47, %v361_v50  ;;  %v364_v55 = vadd.f32 %v565_v51, %v484_v42 }
  0xfe   :  { %v428_v56 = vmul.f32 0.044715, %v410_v54  ;;  %v413_v57 = vadd.f32 %v593_v53, %v364_v55  ;;  %v566_v58 = vpop.f32.mrb[4].mxu0  ;;  %v424_v32 = vmul.f32 0.5, %v410_v54 }
  0xff   :  { %v594_v59 = vpop.f32.mrb[4].mxu1  ;;  %v567_v60 = vpop.f32.mrb[5].mxu0 }
 0x100   :  { %v432_v61 = vmul.f32 %v428_v56, %v410_v54  ;;  %v429_v62 = vmul.f32 0.044715, %v413_v57  ;;  %v568_v63 = vadd.f32 %v567_v60, %v566_v58  ;;  %v595_v0 = vpop.f32.mrb[5].mxu1  ;;  %v569_v1 = vpop.f32.mrb[6].mxu0  ;;  %v425_v33 = vmul.f32 0.5, %v413_v57 }
 0x101   :  { %v596_v2 = vadd.f32 %v595_v0, %v594_v59  ;;  %v597_v3 = vpop.f32.mrb[6].mxu1  ;;  %v570_v4 = vpop.f32.mrb[7].mxu0 }
 0x102   :  { %v436_v5 = vmul.f32 %v432_v61, %v410_v54  ;;  %v433_v6 = vmul.f32 %v429_v62, %v413_v57  ;;  %v369_v7 = vadd.f32 %v568_v63, %v484_v42  ;;  %v571_v8 = vadd.f32 %v570_v4, %v569_v1  ;;  %v598_v9 = vpop.f32.mrb[7].mxu1 }
 0x103   :  { %v599_v10 = vadd.f32 %v598_v9, %v597_v3 }
 0x104   :  { %v440_v11 = vadd.f32 %v436_v5, %v410_v54  ;;  %v437_v12 = vmul.f32 %v433_v6, %v413_v57  ;;  %v418_v13 = vadd.f32 %v596_v2, %v369_v7  ;;  %v372_v14 = vadd.f32 %v571_v8, %v484_v42 }
 0x106   :  { %v444_v15 = vmul.f32 0.7978846, %v440_v11  ;;  %v441_v16 = vadd.f32 %v437_v12, %v413_v57  ;;  %v430_v17 = vmul.f32 0.044715, %v418_v13  ;;  %v421_v18 = vadd.f32 %v599_v10, %v372_v14 }
 0x107   :  { %v426_v41 = vmul.f32 0.5, %v418_v13 }
 0x108   :  { %644 = vtanh.f32 %v444_v15  ;;  %v445_v19 = vmul.f32 0.7978846, %v441_v16  ;;  %v434_v20 = vmul.f32 %v430_v17, %v418_v13  ;;  %v431_v21 = vmul.f32 0.044715, %v421_v18 }
 0x109   :  { %v427_v42 = vmul.f32 0.5, %v421_v18 }
 0x10a   :  { %646 = vtanh.f32 %v445_v19  ;;  %v438_v22 = vmul.f32 %v434_v20, %v418_v13  ;;  %v435_v23 = vmul.f32 %v431_v21, %v421_v18 }
 0x10c   :  { %v442_v24 = vadd.f32 %v438_v22, %v418_v13  ;;  %v439_v25 = vmul.f32 %v435_v23, %v421_v18 }
 0x10e   :  { %v446_v26 = vmul.f32 0.7978846, %v442_v24  ;;  %v443_v27 = vadd.f32 %v439_v25, %v421_v18 }
 0x110   :  { %648 = vtanh.f32 %v446_v26  ;;  %v447_v28 = vmul.f32 0.7978846, %v443_v27 }
 0x112   :  { %v645_v29 = vpop.eup %644  ;;  %650 = vtanh.f32 %v447_v28 }
 0x113   :  { %v452_v30 = vadd.f32 1.0, %v645_v29 }
 0x114   :  { %v647_v31 = vpop.eup %646 }
 0x115   :  { %v453_v34 = vadd.f32 1.0, %v647_v31  ;;  %v456_v35 = vmul.f32 %v452_v30, %v424_v32 }
 0x117   :  { %v457_v36 = vmul.f32 %v453_v34, %v425_v33 }
 0x119   :  { %v536_v37 = vpack.c.bf16 %v457_v36, %v456_v35 }
 0x11a   :  { %v649_v38 = vpop.eup %648 }
 0x11b   :  { %537 = vst [vmem:[%s804_s3] sm:$0xff] %v536_v37   ;;  %v454_v39 = vadd.f32 1.0, %v649_v38 }
 0x11c   :  { %v651_v40 = vpop.eup %650 }
 0x11d   :  { %v455_v43 = vadd.f32 1.0, %v651_v40  ;;  %v458_v44 = vmul.f32 %v454_v39, %v426_v41 }
 0x11f   :  { %v459_v45 = vmul.f32 %v455_v43, %v427_v42 }
 0x121   :  { %v541_v46 = vpack.c.bf16 %v459_v45, %v458_v44 }
 0x123   :  { %543 = vst [vmem:[%s804_s3 + $0x8] sm:$0xff] %v541_v46  }

// kernel: encoder_decoder_forward.25
= control target key start
LH: loop header
LB: loop body
LE: loop exit
PB: predicated region body
PF: predicated region fallthrough
CT: control target
= control target key end

     0   :  { %v181_v0 = vmov 0.0   ;;  %vm182_vm0 = vmmov 0   ;;  %s236_s1 = inlined_call_operand.vmem [shape: bf16[128,128], index: 1, kind: input, shape index: {}]   ;;  %s237_s0 = inlined_call_operand.vmem [shape: bf16[8,128], index: 0, kind: input, shape index: {}]   ;;  %s238_s2 = inlined_call_operand.vmem [shape: f32[1,128], index: 2, kind: input, shape index: {}]   ;;  %s239_s3 = inlined_call_operand.vmem [shape: bf16[8,128], index: 3, kind: output, shape index: {}]  }
   0x1   :  { %151 = vmatprep.subr.bf16.mxu0 %v181_v0  ;;  %v173_v1 = vld [vmem:[%s236_s1] sm:$0xff]   ;;  %167 = vmatprep.mubr.msk.bf16.mxu0 %vm182_vm0, %v181_v0  ;;  %v174_v2 = vld [vmem:[%s236_s1 + $0x8] sm:$0xff]   ;;  %v175_v3 = vld [vmem:[%s236_s1 + $0x10] sm:$0xff]  }
   0x2   :  { %152 = vmatpush3.bf16.msra.mxu0 %v173_v1  ;;  %v176_v4 = vld [vmem:[%s236_s1 + $0x18] sm:$0xff]   ;;  %v177_v5 = vld [vmem:[%s236_s1 + $0x20] sm:$0xff]   ;;  %v178_v6 = vld [vmem:[%s236_s1 + $0x28] sm:$0xff]  }
   0x3   :  { %153 = vmatprep.subr.bf16.mxu0 %v181_v0  ;;  %v179_v7 = vld [vmem:[%s236_s1 + $0x30] sm:$0xff]   ;;  %v180_v8 = vld [vmem:[%s236_s1 + $0x38] sm:$0xff]   ;;  %v15_v9 = vld [vmem:[%s237_s0] sm:$0xf] }
   0x4   :  { %v133_v10 = vld [vmem:[%s238_s2] ss:$0 sm:$0xff] }
   0x6   :  { %154 = vmatpush3.bf16.msra.mxu0 %v174_v2 }
   0x7   :  { %155 = vmatprep.subr.bf16.mxu0 %v181_v0 }
   0xa   :  { %156 = vmatpush3.bf16.msra.mxu0 %v175_v3 }
   0xb   :  { %157 = vmatprep.subr.bf16.mxu0 %v181_v0 }
   0xe   :  { %158 = vmatpush3.bf16.msra.mxu0 %v176_v4 }
   0xf   :  { %159 = vmatprep.subr.bf16.mxu0 %v181_v0 }
  0x12   :  { %160 = vmatpush3.bf16.msra.mxu0 %v177_v5 }
  0x13   :  { %161 = vmatprep.subr.bf16.mxu0 %v181_v0 }
  0x16   :  { %162 = vmatpush3.bf16.msra.mxu0 %v178_v6 }
  0x17   :  { %163 = vmatprep.subr.bf16.mxu0 %v181_v0 }
  0x1a   :  { %164 = vmatpush3.bf16.msra.mxu0 %v179_v7 }
  0x1b   :  { %165 = vmatprep.subr.bf16.mxu0 %v181_v0 }
  0x1e   :  { %166 = vmatpush3.bf16.msra.mxu0 %v180_v8 }
  0x21   :  { %168 = vmatmul.mubr.bf16.vlgmr.msra.gmra.mrb[0].mxu0 %v15_v9 }
  0xf4   :  { %v121_v11 = vpop.f32.mrb[0].mxu0 }
  0xf5   :  { %v122_v12 = vadd.f32 %v133_v10, %v121_v11  ;;  %v169_v13 = vpop.f32.mrb[1].mxu0 }
  0xf6   :  { %v124_v14 = vpop.f32.mrb[2].mxu0 }
  0xf7   :  { %v127_v15 = vpack.c.bf16 %v122_v12, %v122_v12  ;;  %v170_v16 = vpop.f32.mrb[3].mxu0 }
  0xf9   :  { %128 = vst [vmem:[%s239_s3] sm:$0xf] %v127_v15 }

// kernel: encoder_decoder_forward.26
= control target key start
LH: loop header
LB: loop body
LE: loop exit
PB: predicated region body
PF: predicated region fallthrough
CT: control target
= control target key end

     0   :  { %s438_s9 = smov 0   ;;  %s440_s10 = smov 0   ;;  %s474_s0 = inlined_call_operand.vmem [shape: bf16[8,8], index: 0, kind: input, shape index: {}]   ;;  %s475_s1 = inlined_call_operand.vmem [shape: bf16[2,8,256], index: 1, kind: input, shape index: {}]   ;;  %s476_s2 = inlined_call_operand.vmem [shape: bf16[2,8,256], index: 2, kind: output, shape index: {}]  }
   0x1   :  { %s442_s11 = smov 0  }
   0x2 LB: > { %s24_s12 = sadd.s32 1, %s416_s10  ;;  %p356_p0 = scmp.ge.s32.totalorder %s420_s11, 1  ;;  %s420_s11 = sphi %s442_s11, %s12_s11   ;;  %s416_s10 = sphi %s440_s10, %s478_s10   ;;  %s412_s9 = sphi %s438_s9, %s477_s9  }
   0x3   : > { %p26_p1 = scmp.ge.s32.totalorder %s24_s12, 2  ;;  %p135_p2 = scmp.lt.s32.totalorder %s420_s11, 3 }
   0x5   : > { %s480_s12 = smov (%p26_p1, %s24_s12), 0  ;;  %p136_p3 = pnand %p356_p0, %p135_p2 }
   0x6   : > { %p169_p4 = scmp.lt.s32.totalorder (!%p136_p3), %s412_s9, 1  ;;  %v422_v0 = vmov (!%p136_p3), 0   ;;  %vm195_vm0 = vcmask (!%p136_p3), 1043456   ;;  %v184_v5 = vld [vmem:[%s474_s0] sm:$0xf] (!%p136_p3)  ;;  %vm191_vm1 = vcmask (!%p136_p3), 64512  }
   0x7   : > { %139 = sbr.rel (%p136_p3) target bundleno = 240 (0xf0), region = 28  ;;  %234 = vmatprep.mubr.bf16.mxu0 (!%p136_p3), %v422_v0 }
   0xe   : > { %s482_s9 = smov (!%p169_p4, %s412_s9), 1 }
   0xf   : > { %s368_s13 = sshll.u32 %s482_s9, 3 }
  0x10   : > { %s173_s16 = scalar_lea.vmem %s475_s1, %s368_s13  ;;  %s182_s21 = scalar_lea.vmem %s476_s2, %s368_s13 }
  0x11   : > { %v185_v1 = vld [vmem:[%s173_s16] sm:$0xff] }
  0x12   : > { %v362_v2 = vcombine.high %v185_v1, %v185_v1  ;;  %v361_v3 = vcombine.low %v185_v1, %v185_v1 }
  0x14   : > { %363 = vmatprep.subr.msk.bf16.mxu0 %vm195_vm0, %v362_v2  ;;  %v197_v4 = vsel %vm195_vm0, %v361_v3, 0 }
  0x15   : > { %203 = vmatpush1.bf16.msra.mxu0 %v197_v4 }
  0x18   : > { %364 = vmatmul.mubr.msk.bf16.vlgmr.msra.gmra.mrb[0].mxu0 %vm191_vm1, %v184_v5 }
  0xeb   : > { %v236_v6 = vpop.f32.mrb[0].mxu0 }
  0xec   : > { %v238_v7 = vpop.f32.mrb[1].mxu0 }
  0xed   : > { %v370_v8 = vpack.c.bf16 %v238_v7, %v236_v6  ;;  %v240_v9 = vpop.f32.mrb[2].mxu0 }
  0xee   : > { %v241_v10 = vpop.f32.mrb[3].mxu0 }
  0xef   : > { %251 = vst [vmem:[%s182_s21] sm:$0xff] %v370_v8 }
  0xf0 PF: > { %s12_s11 = sadd.s32 1, %s420_s11   ;;  %s477_s9 = smov %s416_s10 }
  0xf1   : > { %p9_p5 = scmp.ge.s32.totalorder %s12_s11, 4   ;;  %s478_s10 = smov %s480_s12 }
  0xf3   :  { %11 = sbr.rel (!%p9_p5) target bundleno = 2 (0x2), region = 61 }

// kernel: encoder_decoder_forward.19
= control target key start
LH: loop header
LB: loop body
LE: loop exit
PB: predicated region body
PF: predicated region fallthrough
CT: control target
= control target key end

     0   :  { %s636_s1 = inlined_call_operand.vmem [shape: bf16[512,128], index: 1, kind: input, shape index: {}]   ;;  %s637_s0 = inlined_call_operand.vmem [shape: bf16[8,512], index: 0, kind: input, shape index: {}]   ;;  %s638_s2 = inlined_call_operand.vmem [shape: f32[1,128], index: 2, kind: input, shape index: {}]   ;;  %s639_s3 = inlined_call_operand.vmem [shape: bf16[8,128], index: 3, kind: output, shape index: {}]  }
   0x1   :  { %v470_v0 = vld [vmem:[%s636_s1 + $0x40] sm:$0xff]   ;;  %v474_v4 = vld [vmem:[%s636_s1 + $0x48] sm:$0xff]   ;;  %v478_v8 = vld [vmem:[%s636_s1 + $0x50] sm:$0xff]  }
   0x2   :  { %v471_v1 = vld [vmem:[%s636_s1 + $0xc0] sm:$0xff]   ;;  %426 = vmatprep.subr.bf16.mxu0 %v470_v0  ;;  %v475_v5 = vld [vmem:[%s636_s1 + $0xc8] sm:$0xff]   ;;  %v479_v9 = vld [vmem:[%s636_s1 + $0xd0] sm:$0xff]  }
   0x3   :  { %v472_v2 = vld [vmem:[%s636_s1] sm:$0xff]   ;;  %448 = vmatprep.subr.bf16.mxu1 %v471_v1  ;;  %v476_v6 = vld [vmem:[%s636_s1 + $0x8] sm:$0xff]   ;;  %v480_v10 = vld [vmem:[%s636_s1 + $0x10] sm:$0xff]  }
   0x4   :  { %v473_v3 = vld [vmem:[%s636_s1 + $0x80] sm:$0xff]   ;;  %427 = vmatpush3.bf16.msra.mxu0 %v472_v2  ;;  %v477_v7 = vld [vmem:[%s636_s1 + $0x88] sm:$0xff]   ;;  %v481_v11 = vld [vmem:[%s636_s1 + $0x90] sm:$0xff]  }
   0x5   :  { %449 = vmatpush3.bf16.msra.mxu1 %v473_v3  ;;  %428 = vmatprep.subr.bf16.mxu0 %v474_v4  ;;  %v482_v12 = vld [vmem:[%s636_s1 + $0x58] sm:$0xff]   ;;  %v486_v16 = vld [vmem:[%s636_s1 + $0x60] sm:$0xff]   ;;  %v490_v20 = vld [vmem:[%s636_s1 + $0x68] sm:$0xff]  }
   0x6   :  { %450 = vmatprep.subr.bf16.mxu1 %v475_v5  ;;  %v483_v13 = vld [vmem:[%s636_s1 + $0xd8] sm:$0xff]   ;;  %v487_v17 = vld [vmem:[%s636_s1 + $0xe0] sm:$0xff]   ;;  %v491_v21 = vld [vmem:[%s636_s1 + $0xe8] sm:$0xff]  }
   0x7   :  { %v484_v14 = vld [vmem:[%s636_s1 + $0x18] sm:$0xff]   ;;  %v488_v18 = vld [vmem:[%s636_s1 + $0x20] sm:$0xff]   ;;  %v492_v22 = vld [vmem:[%s636_s1 + $0x28] sm:$0xff]  }
   0x8   :  { %429 = vmatpush3.bf16.msra.mxu0 %v476_v6  ;;  %v485_v15 = vld [vmem:[%s636_s1 + $0x98] sm:$0xff]   ;;  %v489_v19 = vld [vmem:[%s636_s1 + $0xa0] sm:$0xff]   ;;  %v493_v23 = vld [vmem:[%s636_s1 + $0xa8] sm:$0xff]  }
   0x9   :  { %451 = vmatpush3.bf16.msra.mxu1 %v477_v7  ;;  %430 = vmatprep.subr.bf16.mxu0 %v478_v8  ;;  %v494_v24 = vld [vmem:[%s636_s1 + $0x70] sm:$0xff]   ;;  %v498_v28 = vld [vmem:[%s636_s1 + $0x78] sm:$0xff]   ;;  %v15_v32 = vld [vmem:[%s637_s0] sm:$0xff] }
   0xa   :  { %452 = vmatprep.subr.bf16.mxu1 %v479_v9  ;;  %v495_v25 = vld [vmem:[%s636_s1 + $0xf0] sm:$0xff]   ;;  %v499_v29 = vld [vmem:[%s636_s1 + $0xf8] sm:$0xff]   ;;  %v16_v33 = vld [vmem:[%s637_s0 + $0x8] sm:$0xff]  ;;  %v390_v34 = vcombine.low %v15_v32, %v15_v32  ;;  %v391_v35 = vcombine.high %v15_v32, %v15_v32 }
   0xb   :  { %v496_v26 = vld [vmem:[%s636_s1 + $0x30] sm:$0xff]   ;;  %v500_v30 = vld [vmem:[%s636_s1 + $0x38] sm:$0xff]   ;;  %v392_v36 = vcombine.low %v16_v33, %v16_v33  ;;  %v393_v37 = vcombine.high %v16_v33, %v16_v33  ;;  %v389_v40 = vld [vmem:[%s638_s2] ss:$0 sm:$0xff] }
   0xc   :  { %431 = vmatpush3.bf16.msra.mxu0 %v480_v10  ;;  %v497_v27 = vld [vmem:[%s636_s1 + $0xb0] sm:$0xff]   ;;  %v501_v31 = vld [vmem:[%s636_s1 + $0xb8] sm:$0xff]   ;;  %326 = vmatprep.mubr.bf16.mxu0 %v391_v35 }
   0xd   :  { %453 = vmatpush3.bf16.msra.mxu1 %v481_v11  ;;  %432 = vmatprep.subr.bf16.mxu0 %v482_v12 }
   0xe   :  { %454 = vmatprep.subr.bf16.mxu1 %v483_v13  ;;  %366 = vmatprep.mubr.bf16.mxu1 %v393_v37 }
  0x10   :  { %433 = vmatpush3.bf16.msra.mxu0 %v484_v14 }
  0x11   :  { %455 = vmatpush3.bf16.msra.mxu1 %v485_v15  ;;  %434 = vmatprep.subr.bf16.mxu0 %v486_v16 }
  0x12   :  { %456 = vmatprep.subr.bf16.mxu1 %v487_v17 }
  0x14   :  { %435 = vmatpush3.bf16.msra.mxu0 %v488_v18 }
  0x15   :  { %457 = vmatpush3.bf16.msra.mxu1 %v489_v19  ;;  %436 = vmatprep.subr.bf16.mxu0 %v490_v20 }
  0x16   :  { %458 = vmatprep.subr.bf16.mxu1 %v491_v21 }
  0x18   :  { %437 = vmatpush3.bf16.msra.mxu0 %v492_v22 }
  0x19   :  { %459 = vmatpush3.bf16.msra.mxu1 %v493_v23  ;;  %438 = vmatprep.subr.bf16.mxu0 %v494_v24 }
  0x1a   :  { %460 = vmatprep.subr.bf16.mxu1 %v495_v25 }
  0x1c   :  { %439 = vmatpush3.bf16.msra.mxu0 %v496_v26 }
  0x1d   :  { %461 = vmatpush3.bf16.msra.mxu1 %v497_v27  ;;  %440 = vmatprep.subr.bf16.mxu0 %v498_v28 }
  0x1e   :  { %462 = vmatprep.subr.bf16.mxu1 %v499_v29 }
  0x20   :  { %441 = vmatpush3.bf16.msra.mxu0 %v500_v30 }
  0x21   :  { %463 = vmatpush3.bf16.msra.mxu1 %v501_v31 }
  0x23   :  { %327 = vmatmul.mubr.bf16.vlgmr.msra.gmra.mrb[0].mxu0 %v390_v34 }
  0x24   :  { %367 = vmatmul.mubr.bf16.vlgmr.msra.gmra.mrb[0].mxu1 %v392_v36 }
  0xf6   :  { %v442_v38 = vpop.f32.mrb[0].mxu0 }
  0xf7   :  { %v464_v39 = vpop.f32.mrb[0].mxu1  ;;  %v443_v41 = vpop.f32.mrb[1].mxu0 }
  0xf8   :  { %v465_v42 = vpop.f32.mrb[1].mxu1  ;;  %v444_v43 = vadd.f32 %v443_v41, %v442_v38  ;;  %v445_v45 = vpop.f32.mrb[2].mxu0 }
  0xf9   :  { %v466_v44 = vadd.f32 %v465_v42, %v464_v39  ;;  %v467_v46 = vpop.f32.mrb[2].mxu1  ;;  %v446_v47 = vpop.f32.mrb[3].mxu0 }
  0xfa   :  { %v468_v48 = vpop.f32.mrb[3].mxu1  ;;  %v329_v49 = vadd.f32 %v444_v43, %v389_v40 }
  0xfc   :  { %v369_v50 = vadd.f32 %v466_v44, %v329_v49 }
  0xfe   :  { %v375_v51 = vmul.f32 0.044715, %v369_v50  ;;  %v374_v57 = vmul.f32 0.5, %v369_v50 }
 0x100   :  { %v376_v52 = vmul.f32 %v375_v51, %v369_v50 }
 0x102   :  { %v377_v53 = vmul.f32 %v376_v52, %v369_v50 }
 0x104   :  { %v378_v54 = vadd.f32 %v377_v53, %v369_v50 }
 0x106   :  { %v379_v55 = vmul.f32 0.7978846, %v378_v54 }
 0x108   :  { %506 = vtanh.f32 %v379_v55 }
 0x112   :  { %v507_v56 = vpop.eup %506 }
 0x113   :  { %v381_v58 = vadd.f32 1.0, %v507_v56 }
 0x115   :  { %v382_v59 = vmul.f32 %v381_v58, %v374_v57 }
 0x117   :  { %v383_v60 = vpack.c.bf16 %v382_v59, %v382_v59 }
 0x119   :  { %384 = vst [vmem:[%s639_s3] sm:$0xf] %v383_v60 }

// kernel: encoder_decoder_forward.20
= control target key start
LH: loop header
LB: loop body
LE: loop exit
PB: predicated region body
PF: predicated region fallthrough
CT: control target
= control target key end

     0   :  { %s941_s1 = inlined_call_operand.vmem [shape: bf16[512,256], index: 1, kind: input, shape index: {}]   ;;  %s942_s0 = inlined_call_operand.vmem [shape: bf16[8,512], index: 0, kind: input, shape index: {}]   ;;  %s943_s2 = inlined_call_operand.vmem [shape: f32[1,256], index: 2, kind: input, shape index: {}]   ;;  %s944_s3 = inlined_call_operand.vmem [shape: bf16[8,256], index: 3, kind: output, shape index: {}]  }
   0x1   :  { %v613_v0 = vld [vmem:[%s941_s1 + $0x4] ss:$8 sps:$4 sm:$0xff]   ;;  %v617_v2 = vld [vmem:[%s941_s1] ss:$8 sps:$4 sm:$0xff]   ;;  %v619_v4 = vld [vmem:[%s941_s1 + $0x14] ss:$8 sps:$4 sm:$0xff]  }
   0x2   :  { %v615_v1 = vld [vmem:[%s941_s1 + $0x104] ss:$8 sps:$4 sm:$0xff]   ;;  %426 = vmatprep.subr.bf16.mxu1 %v613_v0  ;;  %v618_v3 = vld [vmem:[%s941_s1 + $0x100] ss:$8 sps:$4 sm:$0xff]   ;;  %v621_v5 = vld [vmem:[%s941_s1 + $0x114] ss:$8 sps:$4 sm:$0xff]  }
   0x3   :  { %467 = vmatprep.subr.bf16.mxu0 %v615_v1  ;;  %427 = vmatpush1.bf16.msra.mxu1 %v617_v2  ;;  %v623_v6 = vld [vmem:[%s941_s1 + $0x10] ss:$8 sps:$4 sm:$0xff]   ;;  %v625_v8 = vld [vmem:[%s941_s1 + $0x24] ss:$8 sps:$4 sm:$0xff]   ;;  %v629_v10 = vld [vmem:[%s941_s1 + $0x20] ss:$8 sps:$4 sm:$0xff]  }
   0x4   :  { %468 = vmatpush1.bf16.msra.mxu0 %v618_v3  ;;  %428 = vmatprep.subr.bf16.mxu1 %v619_v4  ;;  %v624_v7 = vld [vmem:[%s941_s1 + $0x110] ss:$8 sps:$4 sm:$0xff]   ;;  %v627_v9 = vld [vmem:[%s941_s1 + $0x124] ss:$8 sps:$4 sm:$0xff]   ;;  %v630_v11 = vld [vmem:[%s941_s1 + $0x120] ss:$8 sps:$4 sm:$0xff]  }
   0x5   :  { %469 = vmatprep.subr.bf16.mxu0 %v621_v5  ;;  %v631_v12 = vld [vmem:[%s941_s1 + $0x34] ss:$8 sps:$4 sm:$0xff]   ;;  %v635_v14 = vld [vmem:[%s941_s1 + $0x30] ss:$8 sps:$4 sm:$0xff]   ;;  %v637_v16 = vld [vmem:[%s941_s1 + $0x44] ss:$8 sps:$4 sm:$0xff]  }
   0x6   :  { %v633_v13 = vld [vmem:[%s941_s1 + $0x134] ss:$8 sps:$4 sm:$0xff]   ;;  %v636_v15 = vld [vmem:[%s941_s1 + $0x130] ss:$8 sps:$4 sm:$0xff]   ;;  %v639_v17 = vld [vmem:[%s941_s1 + $0x144] ss:$8 sps:$4 sm:$0xff]  }
   0x7   :  { %429 = vmatpush1.bf16.msra.mxu1 %v623_v6  ;;  %v641_v18 = vld [vmem:[%s941_s1 + $0x40] ss:$8 sps:$4 sm:$0xff]   ;;  %v643_v20 = vld [vmem:[%s941_s1 + $0x54] ss:$8 sps:$4 sm:$0xff]   ;;  %v647_v22 = vld [vmem:[%s941_s1 + $0x50] ss:$8 sps:$4 sm:$0xff]   ;;  %v82_v6 = vlaneseq }
   0x8   :  { %470 = vmatpush1.bf16.msra.mxu0 %v624_v7  ;;  %430 = vmatprep.subr.bf16.mxu1 %v625_v8  ;;  %v642_v19 = vld [vmem:[%s941_s1 + $0x140] ss:$8 sps:$4 sm:$0xff]   ;;  %v645_v21 = vld [vmem:[%s941_s1 + $0x154] ss:$8 sps:$4 sm:$0xff]   ;;  %v648_v23 = vld [vmem:[%s941_s1 + $0x150] ss:$8 sps:$4 sm:$0xff]  }
   0x9   :  { %471 = vmatprep.subr.bf16.mxu0 %v627_v9  ;;  %v649_v24 = vld [vmem:[%s941_s1 + $0x64] ss:$8 sps:$4 sm:$0xff]   ;;  %v653_v26 = vld [vmem:[%s941_s1 + $0x60] ss:$8 sps:$4 sm:$0xff]   ;;  %v655_v28 = vld [vmem:[%s941_s1 + $0x74] ss:$8 sps:$4 sm:$0xff]  }
   0xa   :  { %v651_v25 = vld [vmem:[%s941_s1 + $0x164] ss:$8 sps:$4 sm:$0xff]   ;;  %v654_v27 = vld [vmem:[%s941_s1 + $0x160] ss:$8 sps:$4 sm:$0xff]   ;;  %v657_v29 = vld [vmem:[%s941_s1 + $0x174] ss:$8 sps:$4 sm:$0xff]  }
   0xb   :  { %431 = vmatpush1.bf16.msra.mxu1 %v629_v10  ;;  %v659_v30 = vld [vmem:[%s941_s1 + $0x70] ss:$8 sps:$4 sm:$0xff]   ;;  %v661_v32 = vld [vmem:[%s941_s1 + $0x84] ss:$8 sps:$4 sm:$0xff]   ;;  %v665_v34 = vld [vmem:[%s941_s1 + $0x80] ss:$8 sps:$4 sm:$0xff]  }
   0xc   :  { %472 = vmatpush1.bf16.msra.mxu0 %v630_v11  ;;  %432 = vmatprep.subr.bf16.mxu1 %v631_v12  ;;  %v660_v31 = vld [vmem:[%s941_s1 + $0x170] ss:$8 sps:$4 sm:$0xff]   ;;  %v663_v33 = vld [vmem:[%s941_s1 + $0x184] ss:$8 sps:$4 sm:$0xff]   ;;  %v666_v35 = vld [vmem:[%s941_s1 + $0x180] ss:$8 sps:$4 sm:$0xff]  }
   0xd   :  { %473 = vmatprep.subr.bf16.mxu0 %v633_v13  ;;  %v667_v36 = vld [vmem:[%s941_s1 + $0x94] ss:$8 sps:$4 sm:$0xff]   ;;  %v671_v38 = vld [vmem:[%s941_s1 + $0x90] ss:$8 sps:$4 sm:$0xff]   ;;  %v673_v40 = vld [vmem:[%s941_s1 + $0xa4] ss:$8 sps:$4 sm:$0xff]  }
   0xe   :  { %v669_v37 = vld [vmem:[%s941_s1 + $0x194] ss:$8 sps:$4 sm:$0xff]   ;;  %v672_v39 = vld [vmem:[%s941_s1 + $0x190] ss:$8 sps:$4 sm:$0xff]   ;;  %v675_v41 = vld [vmem:[%s941_s1 + $0x1a4] ss:$8 sps:$4 sm:$0xff]  }
   0xf   :  { %433 = vmatpush1.bf16.msra.mxu1 %v635_v14  ;;  %v677_v42 = vld [vmem:[%s941_s1 + $0xa0] ss:$8 sps:$4 sm:$0xff]   ;;  %v679_v44 = vld [vmem:[%s941_s1 + $0xb4] ss:$8 sps:$4 sm:$0xff]   ;;  %v683_v49 = vld [vmem:[%s941_s1 + $0xb0] ss:$8 sps:$4 sm:$0xff]  }
  0x10   :  { %474 = vmatpush1.bf16.msra.mxu0 %v636_v15  ;;  %434 = vmatprep.subr.bf16.mxu1 %v637_v16  ;;  %v678_v43 = vld [vmem:[%s941_s1 + $0x1a0] ss:$8 sps:$4 sm:$0xff]   ;;  %v681_v45 = vld [vmem:[%s941_s1 + $0x1b4] ss:$8 sps:$4 sm:$0xff]   ;;  %v684_v50 = vld [vmem:[%s941_s1 + $0x1b0] ss:$8 sps:$4 sm:$0xff]  }
  0x11   :  { %475 = vmatprep.subr.bf16.mxu0 %v639_v17  ;;  %v14_v46 = vld [vmem:[%s942_s0] sm:$0xff]  ;;  %v15_v48 = vld [vmem:[%s942_s0 + $0x8] sm:$0xff]  ;;  %v691_v56 = vld [vmem:[%s941_s1 + $0xd4] ss:$8 sps:$4 sm:$0xff]   ;;  %v83_v7 = vshrl.u32 %v82_v6, 7 }
  0x12   :  { %v540_v47 = vcombine.high %v14_v46, %v14_v46  ;;  %v542_v51 = vcombine.high %v15_v48, %v15_v48  ;;  %v685_v52 = vld [vmem:[%s941_s1 + $0xc4] ss:$8 sps:$4 sm:$0xff]   ;;  %v689_v54 = vld [vmem:[%s941_s1 + $0xc0] ss:$8 sps:$4 sm:$0xff]   ;;  %v693_v57 = vld [vmem:[%s941_s1 + $0x1d4] ss:$8 sps:$4 sm:$0xff]   ;;  %v539_v4 = vcombine.low %v14_v46, %v14_v46  ;;  %v541_v5 = vcombine.low %v15_v48, %v15_v48 }
  0x13   :  { %435 = vmatpush1.bf16.msra.mxu1 %v641_v18  ;;  %v687_v53 = vld [vmem:[%s941_s1 + $0x1c4] ss:$8 sps:$4 sm:$0xff]   ;;  %v690_v55 = vld [vmem:[%s941_s1 + $0x1c0] ss:$8 sps:$4 sm:$0xff]   ;;  %v695_v58 = vld [vmem:[%s941_s1 + $0xd0] ss:$8 sps:$4 sm:$0xff]  }
  0x14   :  { %476 = vmatpush1.bf16.msra.mxu0 %v642_v19  ;;  %436 = vmatprep.subr.bf16.mxu1 %v643_v20  ;;  %v696_v59 = vld [vmem:[%s941_s1 + $0x1d0] ss:$8 sps:$4 sm:$0xff]   ;;  %v697_v60 = vld [vmem:[%s941_s1 + $0xe4] ss:$8 sps:$4 sm:$0xff]   ;;  %v701_v62 = vld [vmem:[%s941_s1 + $0xe0] ss:$8 sps:$4 sm:$0xff]  }
  0x15   :  { %477 = vmatprep.subr.bf16.mxu0 %v645_v21  ;;  %458 = vmatprep.mubr.bf16.mxu1 %v540_v47  ;;  %v699_v61 = vld [vmem:[%s941_s1 + $0x1e4] ss:$8 sps:$4 sm:$0xff]   ;;  %v702_v63 = vld [vmem:[%s941_s1 + $0x1e0] ss:$8 sps:$4 sm:$0xff]   ;;  %v703_v0 = vld [vmem:[%s941_s1 + $0xf4] ss:$8 sps:$4 sm:$0xff]  }
  0x16   :  { %499 = vmatprep.mubr.bf16.mxu0 %v542_v51  ;;  %v705_v1 = vld [vmem:[%s941_s1 + $0x1f4] ss:$8 sps:$4 sm:$0xff]   ;;  %v707_v2 = vld [vmem:[%s941_s1 + $0xf0] ss:$8 sps:$4 sm:$0xff]   ;;  %v84_v8 = vsub.s32 0, %v83_v7  ;;  %v88_v10 = vsub.s32 1, %v83_v7 }
  0x17   :  { %437 = vmatpush1.bf16.msra.mxu1 %v647_v22  ;;  %v708_v3 = vld [vmem:[%s941_s1 + $0x1f0] ss:$8 sps:$4 sm:$0xff]   ;;  %v80_v9 = vld [vmem:[%s943_s2] sm:$0x3] }
  0x18   :  { %478 = vmatpush1.bf16.msra.mxu0 %v648_v23  ;;  %438 = vmatprep.subr.bf16.mxu1 %v649_v24  ;;  %v85_v11 = vrot.slane %v80_v9, %v84_v8  ;;  %v89_v12 = vrot.slane %v80_v9, %v88_v10 }
  0x19   :  { %479 = vmatprep.subr.bf16.mxu0 %v651_v25 }
  0x1b   :  { %439 = vmatpush1.bf16.msra.mxu1 %v653_v26 }
  0x1c   :  { %480 = vmatpush1.bf16.msra.mxu0 %v654_v27  ;;  %440 = vmatprep.subr.bf16.mxu1 %v655_v28 }
  0x1d   :  { %481 = vmatprep.subr.bf16.mxu0 %v657_v29 }
  0x1f   :  { %441 = vmatpush1.bf16.msra.mxu1 %v659_v30 }
  0x20   :  { %482 = vmatpush1.bf16.msra.mxu0 %v660_v31  ;;  %442 = vmatprep.subr.bf16.mxu1 %v661_v32 }
  0x21   :  { %483 = vmatprep.subr.bf16.mxu0 %v663_v33 }
  0x23   :  { %443 = vmatpush1.bf16.msra.mxu1 %v665_v34 }
  0x24   :  { %484 = vmatpush1.bf16.msra.mxu0 %v666_v35  ;;  %444 = vmatprep.subr.bf16.mxu1 %v667_v36 }
  0x25   :  { %485 = vmatprep.subr.bf16.mxu0 %v669_v37 }
  0x27   :  { %445 = vmatpush1.bf16.msra.mxu1 %v671_v38 }
  0x28   :  { %486 = vmatpush1.bf16.msra.mxu0 %v672_v39  ;;  %446 = vmatprep.subr.bf16.mxu1 %v673_v40 }
  0x29   :  { %487 = vmatprep.subr.bf16.mxu0 %v675_v41 }
  0x2b   :  { %447 = vmatpush1.bf16.msra.mxu1 %v677_v42 }
  0x2c   :  { %488 = vmatpush1.bf16.msra.mxu0 %v678_v43  ;;  %448 = vmatprep.subr.bf16.mxu1 %v679_v44 }
  0x2d   :  { %489 = vmatprep.subr.bf16.mxu0 %v681_v45 }
  0x2f   :  { %449 = vmatpush1.bf16.msra.mxu1 %v683_v49 }
  0x30   :  { %490 = vmatpush1.bf16.msra.mxu0 %v684_v50  ;;  %450 = vmatprep.subr.bf16.mxu1 %v685_v52 }
  0x31   :  { %491 = vmatprep.subr.bf16.mxu0 %v687_v53 }
  0x33   :  { %451 = vmatpush1.bf16.msra.mxu1 %v689_v54 }
  0x34   :  { %492 = vmatpush1.bf16.msra.mxu0 %v690_v55  ;;  %452 = vmatprep.subr.bf16.mxu1 %v691_v56 }
  0x35   :  { %493 = vmatprep.subr.bf16.mxu0 %v693_v57 }
  0x37   :  { %453 = vmatpush1.bf16.msra.mxu1 %v695_v58 }
  0x38   :  { %494 = vmatpush1.bf16.msra.mxu0 %v696_v59  ;;  %454 = vmatprep.subr.bf16.mxu1 %v697_v60 }
  0x39   :  { %495 = vmatprep.subr.bf16.mxu0 %v699_v61 }
  0x3b   :  { %455 = vmatpush1.bf16.msra.mxu1 %v701_v62 }
  0x3c   :  { %496 = vmatpush1.bf16.msra.mxu0 %v702_v63  ;;  %456 = vmatprep.subr.bf16.mxu1 %v703_v0 }
  0x3d   :  { %497 = vmatprep.subr.bf16.mxu0 %v705_v1 }
  0x3f   :  { %457 = vmatpush1.bf16.msra.mxu1 %v707_v2 }
  0x40   :  { %498 = vmatpush1.bf16.msra.mxu0 %v708_v3 }
  0x42   :  { %459 = vmatmul.mubr.bf16.vlgmr.msra.gmra.mrb[0].mxu1 %v539_v4 }
  0x43   :  { %500 = vmatmul.mubr.bf16.vlgmr.msra.gmra.mrb[0].mxu0 %v541_v5 }
 0x115   :  { %v460_v13 = vpop.f32.mrb[0].mxu1 }
 0x116   :  { %v501_v14 = vpop.f32.mrb[0].mxu0  ;;  %v461_v15 = vadd.f32 %v460_v13, %v85_v11  ;;  %v462_v16 = vpop.f32.mrb[1].mxu1 }
 0x117   :  { %v503_v17 = vpop.f32.mrb[1].mxu0  ;;  %v463_v18 = vadd.f32 %v462_v16, %v89_v12  ;;  %v464_v19 = vpop.f32.mrb[2].mxu1 }
 0x118   :  { %v505_v20 = vpop.f32.mrb[2].mxu0  ;;  %v502_v21 = vadd.f32 %v501_v14, %v461_v15  ;;  %v465_v22 = vpop.f32.mrb[3].mxu1 }
 0x119   :  { %v506_v23 = vpop.f32.mrb[3].mxu0  ;;  %v504_v24 = vadd.f32 %v503_v17, %v463_v18 }
 0x11a   :  { %v510_v25 = vmul.f32 0.044715, %v502_v21  ;;  %v508_v37 = vmul.f32 0.5, %v502_v21 }
 0x11b   :  { %v511_v26 = vmul.f32 0.044715, %v504_v24  ;;  %v509_v39 = vmul.f32 0.5, %v504_v24 }
 0x11c   :  { %v512_v27 = vmul.f32 %v510_v25, %v502_v21 }
 0x11d   :  { %v513_v28 = vmul.f32 %v511_v26, %v504_v24 }
 0x11e   :  { %v514_v29 = vmul.f32 %v512_v27, %v502_v21 }
 0x11f   :  { %v515_v30 = vmul.f32 %v513_v28, %v504_v24 }
 0x120   :  { %v516_v31 = vadd.f32 %v514_v29, %v502_v21 }
 0x121   :  { %v517_v32 = vadd.f32 %v515_v30, %v504_v24 }
 0x122   :  { %v518_v33 = vmul.f32 0.7978846, %v516_v31 }
 0x123   :  { %v519_v34 = vmul.f32 0.7978846, %v517_v32 }
 0x124   :  { %713 = vtanh.f32 %v518_v33 }
 0x125   :  { %715 = vtanh.f32 %v519_v34 }
 0x12e   :  { %v714_v35 = vpop.eup %713 }
 0x12f   :  { %v716_v36 = vpop.eup %715  ;;  %v522_v38 = vadd.f32 1.0, %v714_v35 }
 0x130   :  { %v523_v40 = vadd.f32 1.0, %v716_v36 }
 0x131   :  { %v524_v41 = vmul.f32 %v522_v38, %v508_v37 }
 0x132   :  { %v525_v42 = vmul.f32 %v523_v40, %v509_v39 }
 0x134   :  { %v608_v43 = vpack.c.bf16 %v525_v42, %v524_v41 }
 0x136   :  { %534 = vst [vmem:[%s944_s3] sm:$0xff] %v608_v43 }

// kernel: encoder_decoder_forward.28
= control target key start
LH: loop header
LB: loop body
LE: loop exit
PB: predicated region body
PF: predicated region fallthrough
CT: control target
= control target key end

     0   :  { %s340_s1 = inlined_call_operand.vmem [shape: bf16[256,128], index: 1, kind: input, shape index: {}]   ;;  %s341_s0 = inlined_call_operand.vmem [shape: bf16[8,256], index: 0, kind: input, shape index: {}]   ;;  %s342_s2 = inlined_call_operand.vmem [shape: f32[1,128], index: 2, kind: input, shape index: {}]   ;;  %s343_s3 = inlined_call_operand.vmem [shape: bf16[8,128], index: 3, kind: output, shape index: {}]  }
   0x1   :  { %v245_v0 = vld [vmem:[%s340_s1 + $0x40] sm:$0xff]   ;;  %v247_v2 = vld [vmem:[%s340_s1 + $0x48] sm:$0xff]   ;;  %v249_v4 = vld [vmem:[%s340_s1 + $0x50] sm:$0xff]  }
   0x2   :  { %v246_v1 = vld [vmem:[%s340_s1] sm:$0xff]   ;;  %223 = vmatprep.subr.bf16.mxu0 %v245_v0  ;;  %v248_v3 = vld [vmem:[%s340_s1 + $0x8] sm:$0xff]   ;;  %v250_v5 = vld [vmem:[%s340_s1 + $0x10] sm:$0xff]  }
   0x3   :  { %224 = vmatpush3.bf16.msra.mxu0 %v246_v1  ;;  %v251_v6 = vld [vmem:[%s340_s1 + $0x58] sm:$0xff]   ;;  %v253_v8 = vld [vmem:[%s340_s1 + $0x60] sm:$0xff]   ;;  %v255_v10 = vld [vmem:[%s340_s1 + $0x68] sm:$0xff]  }
   0x4   :  { %225 = vmatprep.subr.bf16.mxu0 %v247_v2  ;;  %v252_v7 = vld [vmem:[%s340_s1 + $0x18] sm:$0xff]   ;;  %v254_v9 = vld [vmem:[%s340_s1 + $0x20] sm:$0xff]   ;;  %v256_v13 = vld [vmem:[%s340_s1 + $0x28] sm:$0xff]  }
   0x5   :  { %v15_v11 = vld [vmem:[%s341_s0] sm:$0xff]  ;;  %v257_v14 = vld [vmem:[%s340_s1 + $0x70] sm:$0xff]   ;;  %v259_v16 = vld [vmem:[%s340_s1 + $0x78] sm:$0xff]  }
   0x6   :  { %v206_v12 = vcombine.high %v15_v11, %v15_v11  ;;  %v258_v15 = vld [vmem:[%s340_s1 + $0x30] sm:$0xff]   ;;  %v260_v17 = vld [vmem:[%s340_s1 + $0x38] sm:$0xff]   ;;  %v205_v18 = vcombine.low %v15_v11, %v15_v11  ;;  %v204_v20 = vld [vmem:[%s342_s2] ss:$0 sm:$0xff] }
   0x7   :  { %226 = vmatpush3.bf16.msra.mxu0 %v248_v3 }
   0x8   :  { %227 = vmatprep.subr.bf16.mxu0 %v249_v4  ;;  %190 = vmatprep.mubr.bf16.mxu0 %v206_v12 }
   0xb   :  { %228 = vmatpush3.bf16.msra.mxu0 %v250_v5 }
   0xc   :  { %229 = vmatprep.subr.bf16.mxu0 %v251_v6 }
   0xf   :  { %230 = vmatpush3.bf16.msra.mxu0 %v252_v7 }
  0x10   :  { %231 = vmatprep.subr.bf16.mxu0 %v253_v8 }
  0x13   :  { %232 = vmatpush3.bf16.msra.mxu0 %v254_v9 }
  0x14   :  { %233 = vmatprep.subr.bf16.mxu0 %v255_v10 }
  0x17   :  { %234 = vmatpush3.bf16.msra.mxu0 %v256_v13 }
  0x18   :  { %235 = vmatprep.subr.bf16.mxu0 %v257_v14 }
  0x1b   :  { %236 = vmatpush3.bf16.msra.mxu0 %v258_v15 }
  0x1c   :  { %237 = vmatprep.subr.bf16.mxu0 %v259_v16 }
  0x1f   :  { %238 = vmatpush3.bf16.msra.mxu0 %v260_v17 }
  0x22   :  { %191 = vmatmul.mubr.bf16.vlgmr.msra.gmra.mrb[0].mxu0 %v205_v18 }
  0xf5   :  { %v239_v19 = vpop.f32.mrb[0].mxu0 }
  0xf6   :  { %v240_v21 = vpop.f32.mrb[1].mxu0 }
  0xf7   :  { %v241_v22 = vadd.f32 %v240_v21, %v239_v19  ;;  %v242_v23 = vpop.f32.mrb[2].mxu0 }
  0xf8   :  { %v243_v24 = vpop.f32.mrb[3].mxu0 }
  0xf9   :  { %v193_v25 = vadd.f32 %v241_v22, %v204_v20 }
  0xfb   :  { %v198_v26 = vpack.c.bf16 %v193_v25, %v193_v25 }
  0xfd   :  { %199 = vst [vmem:[%s343_s3] sm:$0xf] %v198_v26 }

// kernel: encoder_decoder_forward.29
= control target key start
LH: loop header
LB: loop body
LE: loop exit
PB: predicated region body
PF: predicated region fallthrough
CT: control target
= control target key end

     0   :  { %s402_s9 = smov 0   ;;  %s404_s10 = smov 0   ;;  %s435_s0 = inlined_call_operand.vmem [shape: bf16[8,8], index: 0, kind: input, shape index: {}]   ;;  %s436_s1 = inlined_call_operand.vmem [shape: bf16[2,8,128], index: 1, kind: input, shape index: {}]   ;;  %s437_s2 = inlined_call_operand.vmem [shape: bf16[2,8,128], index: 2, kind: output, shape index: {}]  }
   0x1   :  { %s406_s11 = smov 0  }
   0x2 LB: > { %s24_s12 = sadd.s32 1, %s379_s10  ;;  %p321_p0 = scmp.ge.s32.totalorder %s383_s11, 1  ;;  %s383_s11 = sphi %s406_s11, %s12_s11   ;;  %s379_s10 = sphi %s404_s10, %s439_s10   ;;  %s375_s9 = sphi %s402_s9, %s438_s9  }
   0x3   : > { %p26_p1 = scmp.ge.s32.totalorder %s24_s12, 2  ;;  %p134_p2 = scmp.lt.s32.totalorder %s383_s11, 3 }
   0x5   : > { %s441_s12 = smov (%p26_p1, %s24_s12), 0  ;;  %p135_p3 = pnand %p321_p0, %p134_p2 }
   0x6   : > { %p165_p4 = scmp.lt.s32.totalorder (!%p135_p3), %s375_s9, 1  ;;  %v385_v0 = vmov (!%p135_p3), 0.0   ;;  %vm386_vm0 = vmmov (!%p135_p3), 0   ;;  %vm183_vm1 = vcmask (!%p135_p3), 1043456   ;;  %v177_v3 = vld [vmem:[%s435_s0] sm:$0xf] (!%p135_p3) }
   0x7   : > { %138 = sbr.rel (%p135_p3) target bundleno = 237 (0xed), region = 28  ;;  %329 = vmatprep.subr.bf16.mxu0 (!%p135_p3), %v385_v0  ;;  %331 = vmatprep.mubr.msk.bf16.mxu0 (!%p135_p3), %vm386_vm0, %v385_v0  ;;  %vm179_vm2 = vcmask (!%p135_p3), 64512  }
   0xe   : > { %s443_s9 = smov (!%p165_p4, %s375_s9), 1 }
   0xf   : > { %s322_s13 = sshll.u32 %s443_s9, 2 }
  0x10   : > { %s168_s16 = scalar_lea.vmem %s436_s1, %s322_s13  ;;  %s175_s21 = scalar_lea.vmem %s437_s2, %s322_s13 }
  0x11   : > { %v178_v1 = vld [vmem:[%s168_s16] sm:$0xf] }
  0x12   : > { %v185_v2 = vsel %vm183_vm1, %v178_v1, 0 }
  0x13   : > { %330 = vmatpush3.bf16.msra.mxu0 %v185_v2 }
  0x16   : > { %332 = vmatmul.mubr.msk.bf16.vlgmr.msra.gmra.mrb[0].mxu0 %vm179_vm2, %v177_v3 }
  0xe9   : > { %v221_v4 = vpop.f32.mrb[0].mxu0 }
  0xea   : > { %v227_v5 = vpack.c.bf16 %v221_v4, %v221_v4  ;;  %v333_v6 = vpop.f32.mrb[1].mxu0 }
  0xeb   : > { %v224_v7 = vpop.f32.mrb[2].mxu0 }
  0xec   : > { %228 = vst [vmem:[%s175_s21] sm:$0xf] %v227_v5  ;;  %v334_v8 = vpop.f32.mrb[3].mxu0 }
  0xed PF: > { %s12_s11 = sadd.s32 1, %s383_s11   ;;  %s438_s9 = smov %s379_s10 }
  0xee   : > { %p9_p5 = scmp.ge.s32.totalorder %s12_s11, 4   ;;  %s439_s10 = smov %s441_s12 }
  0xf0   :  { %11 = sbr.rel (!%p9_p5) target bundleno = 2 (0x2), region = 61 }

// kernel: encoder_decoder_forward.22
= control target key start
LH: loop header
LB: loop body
LE: loop exit
PB: predicated region body
PF: predicated region fallthrough
CT: control target
= control target key end

     0   :  { %s304_s1 = inlined_call_operand.vmem [shape: bf16[128,128], index: 1, kind: input, shape index: {}]   ;;  %s305_s0 = inlined_call_operand.vmem [shape: bf16[32,128], index: 0, kind: input, shape index: {}]   ;;  %s306_s2 = inlined_call_operand.vmem [shape: f32[1,128], index: 2, kind: input, shape index: {}]   ;;  %s307_s3 = inlined_call_operand.vmem [shape: bf16[32,128], index: 3, kind: output, shape index: {}]  }
   0x1   :  { %v235_v0 = vld [vmem:[%s304_s1] sm:$0xff]   ;;  %v236_v1 = vld [vmem:[%s304_s1 + $0x8] sm:$0xff]   ;;  %v237_v2 = vld [vmem:[%s304_s1 + $0x10] sm:$0xff]  }
   0x2   :  { %215 = vmatprep.subr.bf16.mxu0 %v235_v0  ;;  %v238_v3 = vld [vmem:[%s304_s1 + $0x18] sm:$0xff]   ;;  %v243_v4 = vld [vmem:[%s305_s0] sm:$0xff]   ;;  %v240_v6 = vld [vmem:[%s304_s1 + $0x28] sm:$0xff]  }
   0x3   :  { %216 = vmatpush3.bf16.msra.mxu0 %v235_v0  ;;  %231 = vmatprep.mubr.bf16.mxu0 %v243_v4  ;;  %v239_v5 = vld [vmem:[%s304_s1 + $0x20] sm:$0xff]   ;;  %v241_v7 = vld [vmem:[%s304_s1 + $0x30] sm:$0xff]   ;;  %v242_v8 = vld [vmem:[%s304_s1 + $0x38] sm:$0xff]  }
   0x4   :  { %217 = vmatprep.subr.bf16.mxu0 %v236_v1  ;;  %v244_v9 = vld [vmem:[%s305_s0 + $0x8] sm:$0xff]   ;;  %v175_v11 = vld [vmem:[%s306_s2] ss:$0 sm:$0xff] }
   0x7   :  { %218 = vmatpush3.bf16.msra.mxu0 %v236_v1 }
   0x8   :  { %219 = vmatprep.subr.bf16.mxu0 %v237_v2 }
   0xb   :  { %220 = vmatpush3.bf16.msra.mxu0 %v237_v2 }
   0xc   :  { %221 = vmatprep.subr.bf16.mxu0 %v238_v3 }
   0xf   :  { %222 = vmatpush3.bf16.msra.mxu0 %v238_v3 }
  0x10   :  { %223 = vmatprep.subr.bf16.mxu0 %v239_v5 }
  0x13   :  { %224 = vmatpush3.bf16.msra.mxu0 %v239_v5 }
  0x14   :  { %225 = vmatprep.subr.bf16.mxu0 %v240_v6 }
  0x17   :  { %226 = vmatpush3.bf16.msra.mxu0 %v240_v6 }
  0x18   :  { %227 = vmatprep.subr.bf16.mxu0 %v241_v7 }
  0x1b   :  { %228 = vmatpush3.bf16.msra.mxu0 %v241_v7 }
  0x1c   :  { %229 = vmatprep.subr.bf16.mxu0 %v242_v8 }
  0x1f   :  { %230 = vmatpush3.bf16.msra.mxu0 %v242_v8 }
  0x22   :  { %232 = vmatmul.mubr.bf16.vlgmr.msra.gmra.mrb[0].mxu0 %v244_v9 }
  0xf5   :  { %v233_v10 = vpop.f32.mrb[0].mxu0 }
  0xf6   :  { %v136_v12 = vpop.f32.mrb[1].mxu0  ;;  %v145_v14 = vadd.f32 %v233_v10, %v175_v11 }
  0xf7   :  { %v234_v13 = vpop.f32.mrb[2].mxu0  ;;  %v137_v17 = vadd.f32 %v175_v11, %v136_v12 }
  0xf8   :  { %v148_v15 = vadd.f32 %v234_v13, %v175_v11  ;;  %v139_v16 = vpop.f32.mrb[3].mxu0 }
  0xf9   :  { %v140_v18 = vadd.f32 %v175_v11, %v139_v16 }
  0xfa   :  { %v202_v19 = vpack.c.bf16 %v148_v15, %v145_v14 }
  0xfb   :  { %v197_v20 = vpack.c.bf16 %v140_v18, %v137_v17 }
  0xfc   :  { %204 = vst [vmem:[%s307_s3 + $0x8] sm:$0xff] %v202_v19  }
  0xfd   :  { %198 = vst [vmem:[%s307_s3] sm:$0xff] %v197_v20  }

// kernel: encoder_decoder_forward.23
= control target key start
LH: loop header
LB: loop body
LE: loop exit
PB: predicated region body
PF: predicated region fallthrough
CT: control target
= control target key end

     0   :  { %s508_s9 = smov 0   ;;  %s510_s10 = smov 0   ;;  %s544_s0 = inlined_call_operand.vmem [shape: bf16[8,8], index: 0, kind: input, shape index: {}]   ;;  %s545_s1 = inlined_call_operand.vmem [shape: bf16[2,8,512], index: 1, kind: input, shape index: {}]   ;;  %s546_s2 = inlined_call_operand.vmem [shape: bf16[2,8,512], index: 2, kind: output, shape index: {}]  }
   0x1   :  { %s512_s11 = smov 0  }
   0x2 LB: > { %s24_s12 = sadd.s32 1, %s486_s10  ;;  %p418_p0 = scmp.ge.s32.totalorder %s490_s11, 1  ;;  %s490_s11 = sphi %s512_s11, %s12_s11   ;;  %s486_s10 = sphi %s510_s10, %s548_s10   ;;  %s482_s9 = sphi %s508_s9, %s547_s9  }
   0x3   : > { %p26_p1 = scmp.ge.s32.totalorder %s24_s12, 2  ;;  %p135_p2 = scmp.lt.s32.totalorder %s490_s11, 3 }
   0x5   : > { %s550_s12 = smov (%p26_p1, %s24_s12), 0  ;;  %p136_p3 = pnand %p418_p0, %p135_p2 }
   0x6   : > { %p169_p4 = scmp.lt.s32.totalorder (!%p136_p3), %s482_s9, 1  ;;  %v492_v0 = vmov (!%p136_p3), 0   ;;  %vm201_vm0 = vcmask (!%p136_p3), 1043456   ;;  %v184_v9 = vld [vmem:[%s544_s0] sm:$0xf] (!%p136_p3)  ;;  %vm197_vm1 = vcmask (!%p136_p3), 64512  }
   0x7   : > { %139 = sbr.rel (%p136_p3) target bundleno = 240 (0xf0), region = 28  ;;  %246 = vmatprep.mubr.bf16.mxu0 (!%p136_p3), %v492_v0  ;;  %287 = vmatprep.mubr.bf16.mxu1 (!%p136_p3), %v492_v0 }
   0xe   : > { %s552_s9 = smov (!%p169_p4, %s482_s9), 1 }
   0xf   : > { %s435_s13 = sshll.u32 %s552_s9, 4 }
  0x10   : > { %s173_s16 = scalar_lea.vmem %s545_s1, %s435_s13  ;;  %s182_s21 = scalar_lea.vmem %s546_s2, %s435_s13 }
  0x11   : > { %v185_v1 = vld [vmem:[%s173_s16] sm:$0xff]  ;;  %v186_v2 = vld [vmem:[%s173_s16 + $0x8] sm:$0xff] }
  0x12   : > { %v424_v3 = vcombine.high %v185_v1, %v185_v1  ;;  %v426_v4 = vcombine.high %v186_v2, %v186_v2  ;;  %v423_v5 = vcombine.low %v185_v1, %v185_v1  ;;  %v425_v6 = vcombine.low %v186_v2, %v186_v2 }
  0x14   : > { %427 = vmatprep.subr.msk.bf16.mxu0 %vm201_vm0, %v424_v3  ;;  %429 = vmatprep.subr.msk.bf16.mxu1 %vm201_vm0, %v426_v4  ;;  %v203_v7 = vsel %vm201_vm0, %v423_v5, 0  ;;  %v209_v8 = vsel %vm201_vm0, %v425_v6, 0 }
  0x15   : > { %215 = vmatpush1.bf16.msra.mxu0 %v203_v7  ;;  %256 = vmatpush1.bf16.msra.mxu1 %v209_v8 }
  0x18   : > { %428 = vmatmul.mubr.msk.bf16.vlgmr.msra.gmra.mrb[0].mxu0 %vm197_vm1, %v184_v9  ;;  %430 = vmatmul.mubr.msk.bf16.vlgmr.msra.gmra.mrb[0].mxu1 %vm197_vm1, %v184_v9 }
  0xeb   : > { %v248_v10 = vpop.f32.mrb[0].mxu0  ;;  %v289_v11 = vpop.f32.mrb[0].mxu1 }
  0xec   : > { %v250_v12 = vpop.f32.mrb[1].mxu0  ;;  %v291_v13 = vpop.f32.mrb[1].mxu1 }
  0xed   : > { %v437_v14 = vpack.c.bf16 %v250_v12, %v248_v10  ;;  %v438_v15 = vpack.c.bf16 %v291_v13, %v289_v11  ;;  %v252_v16 = vpop.f32.mrb[2].mxu0  ;;  %v293_v17 = vpop.f32.mrb[2].mxu1 }
  0xee   : > { %v253_v18 = vpop.f32.mrb[3].mxu0  ;;  %v294_v19 = vpop.f32.mrb[3].mxu1 }
  0xef   : > { %312 = vst [vmem:[%s182_s21] sm:$0xff] %v437_v14  ;;  %313 = vst [vmem:[%s182_s21 + $0x8] sm:$0xff] %v438_v15 }
  0xf0 PF: > { %s12_s11 = sadd.s32 1, %s490_s11   ;;  %s547_s9 = smov %s486_s10 }
  0xf1   : > { %p9_p5 = scmp.ge.s32.totalorder %s12_s11, 4   ;;  %s548_s10 = smov %s550_s12 }
  0xf3   :  { %11 = sbr.rel (!%p9_p5) target bundleno = 2 (0x2), region = 61 }

// kernel: encoder_decoder_forward.24
= control target key start
LH: loop header
LB: loop body
LE: loop exit
PB: predicated region body
PF: predicated region fallthrough
CT: control target
= control target key end

     0   :  { %s825_s9 = smov 0   ;;  %s827_s10 = smov 0   ;;  %s912_s0 = inlined_call_operand.vmem [shape: bf16[8,8], index: 0, kind: input, shape index: {}]   ;;  %s913_s1 = inlined_call_operand.vmem [shape: bf16[2,8,8,128], index: 1, kind: input, shape index: {}]   ;;  %s914_s2 = inlined_call_operand.vmem [shape: bf16[2,8,8,128], index: 2, kind: output, shape index: {}]  }
   0x1   :  { %s829_s11 = smov 0  }
   0x2 LB: > { %s24_s12 = sadd.s32 1, %s802_s10  ;;  %p663_p0 = scmp.ge.s32.totalorder %s806_s11, 1  ;;  %s806_s11 = sphi %s829_s11, %s12_s11   ;;  %s802_s10 = sphi %s827_s10, %s916_s10   ;;  %s798_s9 = sphi %s825_s9, %s915_s9  }
   0x3   : > { %p26_p1 = scmp.ge.s32.totalorder %s24_s12, 2  ;;  %p133_p2 = scmp.lt.s32.totalorder %s806_s11, 3 }
   0x5   : > { %s918_s12 = smov (%p26_p1, %s24_s12), 0  ;;  %p134_p3 = pnand %p663_p0, %p133_p2 }
   0x6   : > { %p164_p4 = scmp.lt.s32.totalorder (!%p134_p3), %s798_s9, 1  ;;  %v808_v0 = vmov (!%p134_p3), 0.0   ;;  %vm809_vm0 = vmmov (!%p134_p3), 0   ;;  %vm190_vm1 = vcmask (!%p134_p3), 1043456   ;;  %v184_v7 = vld [vmem:[%s912_s0] sm:$0xf] (!%p134_p3) }
   0x7   : > { %137 = sbr.rel (%p134_p3) target bundleno = 261 (0x105), region = 28  ;;  %710 = vmatprep.subr.bf16.mxu0 (!%p134_p3), %v808_v0  ;;  %716 = vmatprep.subr.bf16.mxu1 (!%p134_p3), %v808_v0  ;;  %vm186_vm2 = vcmask (!%p134_p3), 64512  }
   0x8   : > { %712 = vmatprep.mubr.msk.bf16.mxu0 (!%p134_p3), %vm809_vm0, %v808_v0  ;;  %718 = vmatprep.mubr.msk.bf16.mxu1 (!%p134_p3), %vm809_vm0, %v808_v0 }
   0xe   : > { %s920_s9 = smov (!%p164_p4, %s798_s9), 1 }
   0xf   : > { %s692_s13 = sshll.u32 %s920_s9, 5 }
  0x10   : > { %s853_s16 = scalar_lea.vmem %s913_s1, %s692_s13  ;;  %s893_s21 = scalar_lea.vmem %s914_s2, %s692_s13 }
  0x11   : > { %v185_v1 = vld [vmem:[%s853_s16] sm:$0xf]  ;;  %v669_v2 = vld [vmem:[%s853_s16 + $0x4] sm:$0xf]  ;;  %v672_v3 = vld [vmem:[%s853_s16 + $0x8] sm:$0xf] }
  0x12   : > { %v192_v4 = vsel %vm190_vm1, %v185_v1, 0  ;;  %v239_v5 = vsel %vm190_vm1, %v669_v2, 0  ;;  %v675_v6 = vld [vmem:[%s853_s16 + $0xc] sm:$0xf]  ;;  %v287_v8 = vsel %vm190_vm1, %v672_v3, 0 }
  0x13   : > { %711 = vmatpush3.bf16.msra.mxu0 %v192_v4  ;;  %717 = vmatpush3.bf16.msra.mxu1 %v239_v5  ;;  %v335_v9 = vsel %vm190_vm1, %v675_v6, 0  ;;  %v678_v10 = vld [vmem:[%s853_s16 + $0x10] sm:$0xf]  ;;  %v681_v11 = vld [vmem:[%s853_s16 + $0x14] sm:$0xf] }
  0x14   : > { %722 = vmatprep.subr.bf16.mxu0 %v808_v0  ;;  %728 = vmatprep.subr.bf16.mxu1 %v808_v0  ;;  %v383_v12 = vsel %vm190_vm1, %v678_v10, 0  ;;  %v431_v13 = vsel %vm190_vm1, %v681_v11, 0  ;;  %v684_v14 = vld [vmem:[%s853_s16 + $0x18] sm:$0xf]  ;;  %v687_v15 = vld [vmem:[%s853_s16 + $0x1c] sm:$0xf] }
  0x15   : > { %v479_v16 = vsel %vm190_vm1, %v684_v14, 0  ;;  %v527_v17 = vsel %vm190_vm1, %v687_v15, 0 }
  0x16   : > { %713 = vmatmul.mubr.msk.bf16.vlgmr.msra.gmra.mrb[0].mxu0 %vm186_vm2, %v184_v7  ;;  %719 = vmatmul.mubr.msk.bf16.vlgmr.msra.gmra.mrb[0].mxu1 %vm186_vm2, %v184_v7 }
  0x17   : > { %723 = vmatpush3.bf16.msra.mxu0 %v287_v8  ;;  %729 = vmatpush3.bf16.msra.mxu1 %v335_v9 }
  0x18   : > { %724 = vmatprep.mubr.msk.bf16.mxu0 %vm809_vm0, %v808_v0  ;;  %730 = vmatprep.mubr.msk.bf16.mxu1 %vm809_vm0, %v808_v0 }
  0x19   : > { %734 = vmatprep.subr.bf16.mxu0 %v808_v0  ;;  %740 = vmatprep.subr.bf16.mxu1 %v808_v0 }
  0x1e   : > { %725 = vmatmul.mubr.msk.bf16.vlgmr.msra.gmra.mrb[4].mxu0 %vm186_vm2, %v184_v7  ;;  %731 = vmatmul.mubr.msk.bf16.vlgmr.msra.gmra.mrb[4].mxu1 %vm186_vm2, %v184_v7 }
  0x1f   : > { %735 = vmatpush3.bf16.msra.mxu0 %v383_v12  ;;  %741 = vmatpush3.bf16.msra.mxu1 %v431_v13 }
  0x20   : > { %736 = vmatprep.mubr.msk.bf16.mxu0 %vm809_vm0, %v808_v0  ;;  %742 = vmatprep.mubr.msk.bf16.mxu1 %vm809_vm0, %v808_v0 }
  0x21   : > { %746 = vmatprep.subr.bf16.mxu0 %v808_v0  ;;  %752 = vmatprep.subr.bf16.mxu1 %v808_v0 }
  0x26   : > { %737 = vmatmul.mubr.msk.bf16.vlgmr.msra.gmra.mrb[8].mxu0 %vm186_vm2, %v184_v7  ;;  %743 = vmatmul.mubr.msk.bf16.vlgmr.msra.gmra.mrb[8].mxu1 %vm186_vm2, %v184_v7 }
  0x27   : > { %747 = vmatpush3.bf16.msra.mxu0 %v479_v16  ;;  %753 = vmatpush3.bf16.msra.mxu1 %v527_v17 }
  0x28   : > { %748 = vmatprep.mubr.msk.bf16.mxu0 %vm809_vm0, %v808_v0  ;;  %754 = vmatprep.mubr.msk.bf16.mxu1 %vm809_vm0, %v808_v0 }
  0x2e   : > { %749 = vmatmul.mubr.msk.bf16.vlgmr.msra.gmra.mrb[12].mxu0 %vm186_vm2, %v184_v7  ;;  %755 = vmatmul.mubr.msk.bf16.vlgmr.msra.gmra.mrb[12].mxu1 %vm186_vm2, %v184_v7 }
  0xe9   : > { %v228_v18 = vpop.f32.mrb[0].mxu0  ;;  %v275_v19 = vpop.f32.mrb[0].mxu1 }
  0xea   : > { %v234_v20 = vpack.c.bf16 %v228_v18, %v228_v18  ;;  %v281_v21 = vpack.c.bf16 %v275_v19, %v275_v19  ;;  %v714_v22 = vpop.f32.mrb[1].mxu0  ;;  %v720_v23 = vpop.f32.mrb[1].mxu1 }
  0xeb   : > { %v231_v24 = vpop.f32.mrb[2].mxu0  ;;  %v278_v25 = vpop.f32.mrb[2].mxu1 }
  0xec   : > { %235 = vst [vmem:[%s893_s21] sm:$0xf] %v234_v20  ;;  %671 = vst [vmem:[%s893_s21 + $0x4] sm:$0xf] %v281_v21  ;;  %v715_v26 = vpop.f32.mrb[3].mxu0  ;;  %v721_v27 = vpop.f32.mrb[3].mxu1 }
  0xf1   : > { %v323_v28 = vpop.f32.mrb[4].mxu0  ;;  %v371_v29 = vpop.f32.mrb[4].mxu1 }
  0xf2   : > { %v329_v30 = vpack.c.bf16 %v323_v28, %v323_v28  ;;  %v377_v31 = vpack.c.bf16 %v371_v29, %v371_v29  ;;  %v726_v32 = vpop.f32.mrb[5].mxu0  ;;  %v732_v33 = vpop.f32.mrb[5].mxu1 }
  0xf3   : > { %v326_v34 = vpop.f32.mrb[6].mxu0  ;;  %v374_v35 = vpop.f32.mrb[6].mxu1 }
  0xf4   : > { %674 = vst [vmem:[%s893_s21 + $0x8] sm:$0xf] %v329_v30  ;;  %677 = vst [vmem:[%s893_s21 + $0xc] sm:$0xf] %v377_v31  ;;  %v727_v36 = vpop.f32.mrb[7].mxu0  ;;  %v733_v37 = vpop.f32.mrb[7].mxu1 }
  0xf9   : > { %v419_v38 = vpop.f32.mrb[8].mxu0  ;;  %v467_v39 = vpop.f32.mrb[8].mxu1 }
  0xfa   : > { %v425_v40 = vpack.c.bf16 %v419_v38, %v419_v38  ;;  %v473_v41 = vpack.c.bf16 %v467_v39, %v467_v39  ;;  %v738_v42 = vpop.f32.mrb[9].mxu0  ;;  %v744_v43 = vpop.f32.mrb[9].mxu1 }
  0xfb   : > { %v422_v44 = vpop.f32.mrb[10].mxu0  ;;  %v470_v45 = vpop.f32.mrb[10].mxu1 }
  0xfc   : > { %680 = vst [vmem:[%s893_s21 + $0x10] sm:$0xf] %v425_v40  ;;  %683 = vst [vmem:[%s893_s21 + $0x14] sm:$0xf] %v473_v41  ;;  %v739_v46 = vpop.f32.mrb[11].mxu0  ;;  %v745_v47 = vpop.f32.mrb[11].mxu1 }
 0x101   : > { %v515_v48 = vpop.f32.mrb[12].mxu0  ;;  %v563_v49 = vpop.f32.mrb[12].mxu1 }
 0x102   : > { %v521_v50 = vpack.c.bf16 %v515_v48, %v515_v48  ;;  %v569_v51 = vpack.c.bf16 %v563_v49, %v563_v49  ;;  %v750_v52 = vpop.f32.mrb[13].mxu0  ;;  %v756_v53 = vpop.f32.mrb[13].mxu1 }
 0x103   : > { %v518_v54 = vpop.f32.mrb[14].mxu0  ;;  %v566_v55 = vpop.f32.mrb[14].mxu1 }
 0x104   : > { %686 = vst [vmem:[%s893_s21 + $0x18] sm:$0xf] %v521_v50  ;;  %689 = vst [vmem:[%s893_s21 + $0x1c] sm:$0xf] %v569_v51  ;;  %v751_v56 = vpop.f32.mrb[15].mxu0  ;;  %v757_v57 = vpop.f32.mrb[15].mxu1 }
 0x105 PF: > { %s12_s11 = sadd.s32 1, %s806_s11   ;;  %s915_s9 = smov %s802_s10 }
 0x106   : > { %p9_p5 = scmp.ge.s32.totalorder %s12_s11, 4   ;;  %s916_s10 = smov %s918_s12 }
 0x108   :  { %11 = sbr.rel (!%p9_p5) target bundleno = 2 (0x2), region = 72 }

// kernel: encoder_decoder_forward.32
= control target key start
LH: loop header
LB: loop body
LE: loop exit
PB: predicated region body
PF: predicated region fallthrough
CT: control target
= control target key end

     0   :  { %s801_s9 = smov 0   ;;  %s803_s10 = smov 0   ;;  %s900_s0 = inlined_call_operand.vmem [shape: f32[32,8], index: 0, kind: input, shape index: {}]   ;;  %s901_s1 = inlined_call_operand.vmem [shape: f32[2,8,1024], index: 1, kind: input, shape index: {}]   ;;  %s902_s2 = inlined_call_operand.vmem [shape: f32[2,32,1024], index: 2, kind: output, shape index: {}]  }
   0x1   :  { %s805_s11 = smov 0  }
   0x2 LB: > { %s24_s12 = sadd.s32 1, %s779_s10  ;;  %p711_p0 = scmp.ge.s32.totalorder %s783_s11, 1  ;;  %s783_s11 = sphi %s805_s11, %s12_s11   ;;  %s779_s10 = sphi %s803_s10, %s904_s10   ;;  %s775_s9 = sphi %s801_s9, %s903_s9  }
   0x3   : > { %p26_p1 = scmp.ge.s32.totalorder %s24_s12, 2  ;;  %p137_p2 = scmp.lt.s32.totalorder %s783_s11, 3 }
   0x5   : > { %s906_s12 = smov (%p26_p1, %s24_s12), 0  ;;  %p138_p3 = pnand %p711_p0, %p137_p2 }
   0x6   : > { %p175_p4 = scmp.lt.s32.totalorder (!%p138_p3), %s775_s9, 1  ;;  %v785_v0 = vmov (!%p138_p3), 0.0   ;;  %v191_v1 = vld [vmem:[%s900_s0] sm:$0xff] (!%p138_p3)  ;;  %vm203_vm0 = vcmask (!%p138_p3), 64512   ;;  %v192_v10 = vld [vmem:[%s900_s0 + $0x8] sm:$0xff] (!%p138_p3)  ;;  %v193_v11 = vld [vmem:[%s900_s0 + $0x10] sm:$0xff] (!%p138_p3) }
   0x7   : > { %141 = sbr.rel (%p138_p3) target bundleno = 262 (0x106), region = 28  ;;  %280 = vmatprep.mubr.f32.mxu0 (!%p138_p3), %v785_v0  ;;  %369 = vmatprep.mubr.f32.mxu1 (!%p138_p3), %v785_v0  ;;  %v194_v12 = vld [vmem:[%s900_s0 + $0x18] sm:$0xff] (!%p138_p3) }
   0xe   : > { %s908_s9 = smov (!%p175_p4, %s775_s9), 1 }
   0xf   : > { %s734_s13 = sshll.u32 %s908_s9, 6  ;;  %s735_s25 = sshll.u32 %s908_s9, 8 }
  0x10   : > { %s179_s16 = scalar_lea.vmem %s901_s1, %s734_s13  ;;  %s857_s28 = scalar_lea.vmem %s902_s2, %s735_s25 }
  0x11   : > { %v196_v2 = vld [vmem:[%s179_s16 + $0x8] sm:$0xff]  ;;  %v198_v3 = vld [vmem:[%s179_s16 + $0x18] sm:$0xff]  ;;  %v195_v4 = vld [vmem:[%s179_s16] sm:$0xff] }
  0x12   : > { %216 = vmatprep.subr.mxu0 %v196_v2  ;;  %305 = vmatprep.subr.mxu1 %v198_v3  ;;  %v197_v5 = vld [vmem:[%s179_s16 + $0x10] sm:$0xff]  ;;  %v200_v6 = vld [vmem:[%s179_s16 + $0x28] sm:$0xff]  ;;  %v202_v7 = vld [vmem:[%s179_s16 + $0x38] sm:$0xff] }
  0x13   : > { %217 = vmatpush1.msra.mxu0 %v195_v4  ;;  %306 = vmatpush1.msra.mxu1 %v197_v5  ;;  %v199_v8 = vld [vmem:[%s179_s16 + $0x20] sm:$0xff]  ;;  %v201_v9 = vld [vmem:[%s179_s16 + $0x30] sm:$0xff] }
  0x14   : > { %716 = vmatmul.mubr.msk.f32.vlgmr.msra.gmra.mrb[0].mxu0 %vm203_vm0, %v191_v1  ;;  %720 = vmatmul.mubr.msk.f32.vlgmr.msra.gmra.mrb[0].mxu1 %vm203_vm0, %v191_v1 }
  0x15   : > { %394 = vmatprep.subr.mxu0 %v200_v6  ;;  %483 = vmatprep.subr.mxu1 %v202_v7 }
  0x16   : > { %395 = vmatpush1.msra.mxu0 %v199_v8  ;;  %484 = vmatpush1.msra.mxu1 %v201_v9 }
  0x17   : > { %286 = vmatprep.mubr.f32.mxu0 %v785_v0  ;;  %375 = vmatprep.mubr.f32.mxu1 %v785_v0 }
  0x18   : > { %717 = vmatmul.mubr.msk.f32.gmra.mrb[2].mxu0 %vm203_vm0, %v192_v10  ;;  %721 = vmatmul.mubr.msk.f32.gmra.mrb[2].mxu1 %vm203_vm0, %v192_v10 }
  0x19   : > { %292 = vmatprep.mubr.f32.mxu0 %v785_v0  ;;  %381 = vmatprep.mubr.f32.mxu1 %v785_v0 }
  0x1c   : > { %718 = vmatmul.mubr.msk.f32.gmra.mrb[4].mxu0 %vm203_vm0, %v193_v11  ;;  %722 = vmatmul.mubr.msk.f32.gmra.mrb[4].mxu1 %vm203_vm0, %v193_v11 }
  0x1d   : > { %298 = vmatprep.mubr.f32.mxu0 %v785_v0  ;;  %387 = vmatprep.mubr.f32.mxu1 %v785_v0 }
  0x20   : > { %719 = vmatmul.mubr.msk.f32.gmra.mrb[6].mxu0 %vm203_vm0, %v194_v12  ;;  %723 = vmatmul.mubr.msk.f32.gmra.mrb[6].mxu1 %vm203_vm0, %v194_v12 }
  0x21   : > { %458 = vmatprep.mubr.f32.mxu0 %v785_v0  ;;  %547 = vmatprep.mubr.f32.mxu1 %v785_v0 }
  0x24   : > { %724 = vmatmul.mubr.msk.f32.vlgmr.msra.gmra.mrb[8].mxu0 %vm203_vm0, %v191_v1  ;;  %728 = vmatmul.mubr.msk.f32.vlgmr.msra.gmra.mrb[8].mxu1 %vm203_vm0, %v191_v1 }
  0x25   : > { %464 = vmatprep.mubr.f32.mxu0 %v785_v0  ;;  %553 = vmatprep.mubr.f32.mxu1 %v785_v0 }
  0x28   : > { %725 = vmatmul.mubr.msk.f32.gmra.mrb[10].mxu0 %vm203_vm0, %v192_v10  ;;  %729 = vmatmul.mubr.msk.f32.gmra.mrb[10].mxu1 %vm203_vm0, %v192_v10 }
  0x29   : > { %470 = vmatprep.mubr.f32.mxu0 %v785_v0  ;;  %559 = vmatprep.mubr.f32.mxu1 %v785_v0 }
  0x2c   : > { %726 = vmatmul.mubr.msk.f32.gmra.mrb[12].mxu0 %vm203_vm0, %v193_v11  ;;  %730 = vmatmul.mubr.msk.f32.gmra.mrb[12].mxu1 %vm203_vm0, %v193_v11 }
  0x2d   : > { %476 = vmatprep.mubr.f32.mxu0 %v785_v0  ;;  %565 = vmatprep.mubr.f32.mxu1 %v785_v0 }
  0x30   : > { %727 = vmatmul.mubr.msk.f32.gmra.mrb[14].mxu0 %vm203_vm0, %v194_v12  ;;  %731 = vmatmul.mubr.msk.f32.gmra.mrb[14].mxu1 %vm203_vm0, %v194_v12 }
  0xe7   : > { %v282_v13 = vpop.f32.mrb[0].mxu0  ;;  %v371_v14 = vpop.f32.mrb[0].mxu1 }
  0xe8   : > { %572 = vst [vmem:[%s857_s28] sm:$0xff] %v282_v13  ;;  %574 = vst [vmem:[%s857_s28 + $0x10] sm:$0xff] %v371_v14  ;;  %v284_v15 = vpop.f32.mrb[1].mxu0  ;;  %v373_v16 = vpop.f32.mrb[1].mxu1 }
  0xe9   : > { %573 = vst [vmem:[%s857_s28 + $0x8] sm:$0xff] %v284_v15  ;;  %575 = vst [vmem:[%s857_s28 + $0x18] sm:$0xff] %v373_v16 }
  0xeb   : > { %v288_v17 = vpop.f32.mrb[2].mxu0  ;;  %v377_v18 = vpop.f32.mrb[2].mxu1 }
  0xec   : > { %580 = vst [vmem:[%s857_s28 + $0x40] sm:$0xff] %v288_v17  ;;  %582 = vst [vmem:[%s857_s28 + $0x50] sm:$0xff] %v377_v18  ;;  %v290_v19 = vpop.f32.mrb[3].mxu0  ;;  %v379_v20 = vpop.f32.mrb[3].mxu1 }
  0xed   : > { %581 = vst [vmem:[%s857_s28 + $0x48] sm:$0xff] %v290_v19  ;;  %583 = vst [vmem:[%s857_s28 + $0x58] sm:$0xff] %v379_v20 }
  0xef   : > { %v294_v21 = vpop.f32.mrb[4].mxu0  ;;  %v383_v22 = vpop.f32.mrb[4].mxu1 }
  0xf0   : > { %588 = vst [vmem:[%s857_s28 + $0x80] sm:$0xff] %v294_v21  ;;  %590 = vst [vmem:[%s857_s28 + $0x90] sm:$0xff] %v383_v22  ;;  %v296_v23 = vpop.f32.mrb[5].mxu0  ;;  %v385_v24 = vpop.f32.mrb[5].mxu1 }
  0xf1   : > { %589 = vst [vmem:[%s857_s28 + $0x88] sm:$0xff] %v296_v23  ;;  %591 = vst [vmem:[%s857_s28 + $0x98] sm:$0xff] %v385_v24 }
  0xf3   : > { %v300_v25 = vpop.f32.mrb[6].mxu0  ;;  %v389_v26 = vpop.f32.mrb[6].mxu1 }
  0xf4   : > { %596 = vst [vmem:[%s857_s28 + $0xc0] sm:$0xff] %v300_v25  ;;  %598 = vst [vmem:[%s857_s28 + $0xd0] sm:$0xff] %v389_v26  ;;  %v302_v27 = vpop.f32.mrb[7].mxu0  ;;  %v391_v28 = vpop.f32.mrb[7].mxu1 }
  0xf5   : > { %597 = vst [vmem:[%s857_s28 + $0xc8] sm:$0xff] %v302_v27  ;;  %599 = vst [vmem:[%s857_s28 + $0xd8] sm:$0xff] %v391_v28 }
  0xf7   : > { %v460_v29 = vpop.f32.mrb[8].mxu0  ;;  %v549_v30 = vpop.f32.mrb[8].mxu1 }
  0xf8   : > { %576 = vst [vmem:[%s857_s28 + $0x20] sm:$0xff] %v460_v29  ;;  %578 = vst [vmem:[%s857_s28 + $0x30] sm:$0xff] %v549_v30  ;;  %v462_v31 = vpop.f32.mrb[9].mxu0  ;;  %v551_v32 = vpop.f32.mrb[9].mxu1 }
  0xf9   : > { %577 = vst [vmem:[%s857_s28 + $0x28] sm:$0xff] %v462_v31  ;;  %579 = vst [vmem:[%s857_s28 + $0x38] sm:$0xff] %v551_v32 }
  0xfb   : > { %v466_v33 = vpop.f32.mrb[10].mxu0  ;;  %v555_v34 = vpop.f32.mrb[10].mxu1 }
  0xfc   : > { %584 = vst [vmem:[%s857_s28 + $0x60] sm:$0xff] %v466_v33  ;;  %586 = vst [vmem:[%s857_s28 + $0x70] sm:$0xff] %v555_v34  ;;  %v468_v35 = vpop.f32.mrb[11].mxu0  ;;  %v557_v36 = vpop.f32.mrb[11].mxu1 }
  0xfd   : > { %585 = vst [vmem:[%s857_s28 + $0x68] sm:$0xff] %v468_v35  ;;  %587 = vst [vmem:[%s857_s28 + $0x78] sm:$0xff] %v557_v36 }
  0xff   : > { %v472_v37 = vpop.f32.mrb[12].mxu0  ;;  %v561_v38 = vpop.f32.mrb[12].mxu1 }
 0x100   : > { %592 = vst [vmem:[%s857_s28 + $0xa0] sm:$0xff] %v472_v37  ;;  %594 = vst [vmem:[%s857_s28 + $0xb0] sm:$0xff] %v561_v38  ;;  %v474_v39 = vpop.f32.mrb[13].mxu0  ;;  %v563_v40 = vpop.f32.mrb[13].mxu1 }
 0x101   : > { %593 = vst [vmem:[%s857_s28 + $0xa8] sm:$0xff] %v474_v39  ;;  %595 = vst [vmem:[%s857_s28 + $0xb8] sm:$0xff] %v563_v40 }
 0x103   : > { %v478_v41 = vpop.f32.mrb[14].mxu0  ;;  %v567_v42 = vpop.f32.mrb[14].mxu1 }
 0x104   : > { %600 = vst [vmem:[%s857_s28 + $0xe0] sm:$0xff] %v478_v41  ;;  %602 = vst [vmem:[%s857_s28 + $0xf0] sm:$0xff] %v567_v42  ;;  %v480_v43 = vpop.f32.mrb[15].mxu0  ;;  %v569_v44 = vpop.f32.mrb[15].mxu1 }
 0x105   : > { %601 = vst [vmem:[%s857_s28 + $0xe8] sm:$0xff] %v480_v43  ;;  %603 = vst [vmem:[%s857_s28 + $0xf8] sm:$0xff] %v569_v44 }
 0x106 PF: > { %s12_s11 = sadd.s32 1, %s783_s11   ;;  %s903_s9 = smov %s779_s10 }
 0x107   : > { %p9_p5 = scmp.ge.s32.totalorder %s12_s11, 4   ;;  %s904_s10 = smov %s906_s12 }
 0x109   :  { %11 = sbr.rel (!%p9_p5) target bundleno = 2 (0x2), region = 61 }

// kernel: encoder_decoder_forward.21
= control target key start
LH: loop header
LB: loop body
LE: loop exit
PB: predicated region body
PF: predicated region fallthrough
CT: control target
= control target key end

     0   :  { %s602_s1 = inlined_call_operand.vmem [shape: bf16[128,128], index: 1, kind: input, shape index: {}]   ;;  %s603_s0 = inlined_call_operand.vmem [shape: bf16[128,128], index: 0, kind: input, shape index: {}]   ;;  %s604_s2 = inlined_call_operand.vmem [shape: f32[1,128], index: 2, kind: input, shape index: {}]   ;;  %s605_s3 = inlined_call_operand.vmem [shape: bf16[128,128], index: 3, kind: output, shape index: {}]  }
   0x1   :  { %v491_v0 = vld [vmem:[%s602_s1] sm:$0xff]   ;;  %v492_v1 = vld [vmem:[%s602_s1 + $0x8] sm:$0xff]   ;;  %v493_v2 = vld [vmem:[%s602_s1 + $0x10] sm:$0xff]  }
   0x2   :  { %443 = vmatprep.subr.bf16.mxu0 %v491_v0  ;;  %475 = vmatprep.subr.bf16.mxu1 %v491_v0  ;;  %v494_v3 = vld [vmem:[%s602_s1 + $0x18] sm:$0xff]   ;;  %v499_v4 = vld [vmem:[%s603_s0] sm:$0xff]   ;;  %v496_v7 = vld [vmem:[%s602_s1 + $0x28] sm:$0xff]  }
   0x3   :  { %444 = vmatpush3.bf16.msra.mxu0 %v491_v0  ;;  %483 = vmatpush3.bf16.msra.mxu1 %v491_v0  ;;  %v500_v5 = vld [vmem:[%s603_s0 + $0x20] sm:$0xff]   ;;  %v497_v8 = vld [vmem:[%s602_s1 + $0x30] sm:$0xff]   ;;  %v498_v9 = vld [vmem:[%s602_s1 + $0x38] sm:$0xff]  }
   0x4   :  { %445 = vmatprep.subr.bf16.mxu0 %v492_v1  ;;  %476 = vmatprep.subr.bf16.mxu1 %v492_v1  ;;  %v495_v6 = vld [vmem:[%s602_s1 + $0x20] sm:$0xff]   ;;  %v501_v10 = vld [vmem:[%s603_s0 + $0x8] sm:$0xff]   ;;  %v503_v12 = vld [vmem:[%s603_s0 + $0x10] sm:$0xff]  }
   0x5   :  { %459 = vmatprep.mubr.bf16.mxu0 %v499_v4  ;;  %467 = vmatprep.mubr.bf16.mxu1 %v500_v5  ;;  %v502_v11 = vld [vmem:[%s603_s0 + $0x28] sm:$0xff]   ;;  %v504_v13 = vld [vmem:[%s603_s0 + $0x30] sm:$0xff]   ;;  %v505_v14 = vld [vmem:[%s603_s0 + $0x18] sm:$0xff]  }
   0x6   :  { %v506_v15 = vld [vmem:[%s603_s0 + $0x38] sm:$0xff]   ;;  %v331_v17 = vld [vmem:[%s604_s2] ss:$0 sm:$0xff] }
   0x7   :  { %446 = vmatpush3.bf16.msra.mxu0 %v492_v1  ;;  %484 = vmatpush3.bf16.msra.mxu1 %v492_v1 }
   0x8   :  { %447 = vmatprep.subr.bf16.mxu0 %v493_v2  ;;  %477 = vmatprep.subr.bf16.mxu1 %v493_v2 }
   0xb   :  { %448 = vmatpush3.bf16.msra.mxu0 %v493_v2  ;;  %485 = vmatpush3.bf16.msra.mxu1 %v493_v2 }
   0xc   :  { %449 = vmatprep.subr.bf16.mxu0 %v494_v3  ;;  %478 = vmatprep.subr.bf16.mxu1 %v494_v3 }
   0xf   :  { %450 = vmatpush3.bf16.msra.mxu0 %v494_v3  ;;  %486 = vmatpush3.bf16.msra.mxu1 %v494_v3 }
  0x10   :  { %451 = vmatprep.subr.bf16.mxu0 %v495_v6  ;;  %479 = vmatprep.subr.bf16.mxu1 %v495_v6 }
  0x13   :  { %452 = vmatpush3.bf16.msra.mxu0 %v495_v6  ;;  %487 = vmatpush3.bf16.msra.mxu1 %v495_v6 }
  0x14   :  { %453 = vmatprep.subr.bf16.mxu0 %v496_v7  ;;  %480 = vmatprep.subr.bf16.mxu1 %v496_v7 }
  0x17   :  { %454 = vmatpush3.bf16.msra.mxu0 %v496_v7  ;;  %488 = vmatpush3.bf16.msra.mxu1 %v496_v7 }
  0x18   :  { %455 = vmatprep.subr.bf16.mxu0 %v497_v8  ;;  %481 = vmatprep.subr.bf16.mxu1 %v497_v8 }
  0x1b   :  { %456 = vmatpush3.bf16.msra.mxu0 %v497_v8  ;;  %489 = vmatpush3.bf16.msra.mxu1 %v497_v8 }
  0x1c   :  { %457 = vmatprep.subr.bf16.mxu0 %v498_v9  ;;  %482 = vmatprep.subr.bf16.mxu1 %v498_v9 }
  0x1f   :  { %458 = vmatpush3.bf16.msra.mxu0 %v498_v9  ;;  %490 = vmatpush3.bf16.msra.mxu1 %v498_v9 }
  0x22   :  { %460 = vmatmul.mubr.bf16.vlgmr.msra.gmra.mrb[0].mxu0 %v501_v10  ;;  %468 = vmatmul.mubr.bf16.vlgmr.msra.gmra.mrb[0].mxu1 %v502_v11 }
  0x23   :  { %463 = vmatprep.mubr.bf16.mxu0 %v503_v12  ;;  %471 = vmatprep.mubr.bf16.mxu1 %v504_v13 }
  0x2a   :  { %464 = vmatmul.mubr.bf16.gmra.mrb[4].mxu0 %v505_v14  ;;  %472 = vmatmul.mubr.bf16.gmra.mrb[4].mxu1 %v506_v15 }
  0xf5   :  { %v461_v16 = vpop.f32.mrb[0].mxu0  ;;  %v469_v18 = vpop.f32.mrb[0].mxu1 }
  0xf6   :  { %v184_v19 = vpop.f32.mrb[1].mxu0  ;;  %v216_v20 = vpop.f32.mrb[1].mxu1  ;;  %v193_v23 = vadd.f32 %v461_v16, %v331_v17  ;;  %v225_v24 = vadd.f32 %v469_v18, %v331_v17 }
  0xf7   :  { %v462_v21 = vpop.f32.mrb[2].mxu0  ;;  %v470_v22 = vpop.f32.mrb[2].mxu1  ;;  %v185_v29 = vadd.f32 %v331_v17, %v184_v19  ;;  %v217_v30 = vadd.f32 %v331_v17, %v216_v20 }
  0xf8   :  { %v196_v25 = vadd.f32 %v462_v21, %v331_v17  ;;  %v228_v26 = vadd.f32 %v470_v22, %v331_v17  ;;  %v187_v27 = vpop.f32.mrb[3].mxu0  ;;  %v219_v28 = vpop.f32.mrb[3].mxu1 }
  0xf9   :  { %v188_v31 = vadd.f32 %v331_v17, %v187_v27  ;;  %v220_v32 = vadd.f32 %v331_v17, %v219_v28 }
  0xfa   :  { %v388_v33 = vpack.c.bf16 %v196_v25, %v193_v23  ;;  %v408_v34 = vpack.c.bf16 %v228_v26, %v225_v24 }
  0xfb   :  { %v383_v35 = vpack.c.bf16 %v188_v31, %v185_v29  ;;  %v403_v36 = vpack.c.bf16 %v220_v32, %v217_v30 }
  0xfc   :  { %420 = vst [vmem:[%s605_s3 + $0x8] sm:$0xff] %v388_v33   ;;  %424 = vst [vmem:[%s605_s3 + $0x28] sm:$0xff] %v408_v34  }
  0xfd   :  { %384 = vst [vmem:[%s605_s3] sm:$0xff] %v383_v35   ;;  %423 = vst [vmem:[%s605_s3 + $0x20] sm:$0xff] %v403_v36   ;;  %v465_v37 = vpop.f32.mrb[4].mxu0  ;;  %v473_v38 = vpop.f32.mrb[4].mxu1 }
  0xfe   :  { %v200_v39 = vpop.f32.mrb[5].mxu0  ;;  %v232_v40 = vpop.f32.mrb[5].mxu1  ;;  %v209_v43 = vadd.f32 %v465_v37, %v331_v17  ;;  %v241_v44 = vadd.f32 %v473_v38, %v331_v17 }
  0xff   :  { %v466_v41 = vpop.f32.mrb[6].mxu0  ;;  %v474_v42 = vpop.f32.mrb[6].mxu1  ;;  %v201_v49 = vadd.f32 %v331_v17, %v200_v39  ;;  %v233_v50 = vadd.f32 %v331_v17, %v232_v40 }
 0x100   :  { %v212_v45 = vadd.f32 %v466_v41, %v331_v17  ;;  %v244_v46 = vadd.f32 %v474_v42, %v331_v17  ;;  %v203_v47 = vpop.f32.mrb[7].mxu0  ;;  %v235_v48 = vpop.f32.mrb[7].mxu1 }
 0x101   :  { %v204_v51 = vadd.f32 %v331_v17, %v203_v47  ;;  %v236_v52 = vadd.f32 %v331_v17, %v235_v48 }
 0x102   :  { %v398_v53 = vpack.c.bf16 %v212_v45, %v209_v43  ;;  %v418_v54 = vpack.c.bf16 %v244_v46, %v241_v44 }
 0x103   :  { %v393_v55 = vpack.c.bf16 %v204_v51, %v201_v49  ;;  %v413_v56 = vpack.c.bf16 %v236_v52, %v233_v50 }
 0x104   :  { %422 = vst [vmem:[%s605_s3 + $0x18] sm:$0xff] %v398_v53   ;;  %426 = vst [vmem:[%s605_s3 + $0x38] sm:$0xff] %v418_v54  }
 0x105   :  { %421 = vst [vmem:[%s605_s3 + $0x10] sm:$0xff] %v393_v55   ;;  %425 = vst [vmem:[%s605_s3 + $0x30] sm:$0xff] %v413_v56  }

// kernel: encoder_decoder_forward.33
= control target key start
LH: loop header
LB: loop body
LE: loop exit
PB: predicated region body
PF: predicated region fallthrough
CT: control target
= control target key end

     0   :  { %s1312_s9 = smov 0   ;;  %s1314_s10 = smov 0   ;;  %s1464_s0 = inlined_call_operand.vmem [shape: f32[32,8], index: 0, kind: input, shape index: {}]   ;;  %s1465_s1 = inlined_call_operand.vmem [shape: f32[2,32,8,128], index: 1, kind: input, shape index: {}]   ;;  %s1466_s2 = inlined_call_operand.vmem [shape: f32[2,32,32,128], index: 2, kind: output, shape index: {}]  }
   0x1   :  { %s1316_s11 = smov 0   ;;  %s1318_s12 = smov 0  }
   0x2   :  { %s1320_s13 = smov 0  }
   0x3 LB: > { %s21_s14 = sadd.s32 1, %s1287_s11  ;;  %s24_s15 = sadd.s32 1, %s1291_s12  ;;  %s1295_s13 = sphi %s1320_s13, %s12_s13   ;;  %s1291_s12 = sphi %s1318_s12, %s1470_s12   ;;  %s1287_s11 = sphi %s1316_s11, %s1469_s11   ;;  %s1283_s10 = sphi %s1314_s10, %s1468_s10   ;;  %s1279_s9 = sphi %s1312_s9, %s1467_s9  }
   0x4   : > { %p22_p0 = scmp.ge.s32.totalorder %s21_s14, 4  ;;  %p1036_p1 = scmp.ge.s32.totalorder %s1295_s13, 1 }
   0x5   : > { %p133_p2 = scmp.lt.s32.totalorder %s1295_s13, 9 }
   0x6   : > { %s1472_s14 = smov (%p22_p0, %s21_s14), 0  ;;  %s1474_s15 = smov (!%p22_p0, %s24_s15), %s1291_s12 }
   0x7   : > { %p134_p3 = pnand %p1036_p1, %p133_p2  ;;  %p26_p4 = scmp.ge.s32.totalorder %s1474_s15, 2 }
   0x8   : > { %s1037_s16 = sshll.u32 (!%p134_p3), %s1279_s9, 3  ;;  %p165_p5 = scmp.lt.s32.totalorder (!%p134_p3), %s1283_s10, 1  ;;  %v1345_v0 = vld [vmem:[%s1464_s0] sm:$0xff] (!%p134_p3)  ;;  %vm190_vm0 = vcmask (!%p134_p3), 64512   ;;  %v186_v3 = vld [vmem:[%s1464_s0 + $0x8] sm:$0xff] (!%p134_p3)  ;;  %v187_v6 = vld [vmem:[%s1464_s0 + $0x10] sm:$0xff] (!%p134_p3) }
   0x9   : > { %s1476_s15 = smov (%p26_p4, %s1474_s15), 0  ;;  %137 = sbr.rel (%p134_p3) target bundleno = 266 (0x10a), region = 28 }
   0xa   : > { %p167_p6 = scmp.lt.s32.totalorder (!%p134_p3), %s1037_s16, 31  ;;  %1155 = vmatprep.mubr.msk.f32.mxu0 (!%p134_p3), %vm190_vm0, %v1345_v0  ;;  %1163 = vmatprep.mubr.msk.f32.mxu1 (!%p134_p3), %vm190_vm0, %v1345_v0  ;;  %v188_v7 = vld [vmem:[%s1464_s0 + $0x18] sm:$0xff] (!%p134_p3) }
  0x10   : > { %s1478_s10 = smov (!%p165_p5, %s1283_s10), 1  ;;  %s1480_s16 = smov (!%p167_p6, %s1037_s16), 31 }
  0x11   : > { %s1038_s19 = sshll.u32 %s1478_s10, 5  ;;  %s1042_s20 = sshll.u32 %s1478_s10, 7 }
  0x12   : > { %s170_s21 = sadd.s32 %s1038_s19, %s1480_s16  ;;  %s1041_s22 = sshll.u32 %s1480_s16, 2 }
  0x13   : > { %s1039_s23 = sshll.u32 %s170_s21, 3  ;;  %s1351_s24 = sadd.s32 %s1042_s20, %s1041_s22 }
  0x14   : > { %s1356_s27 = scalar_lea.vmem %s1465_s1, %s1039_s23  ;;  %s1043_s6 = sshll.u32 %s1351_s24, 3 }
  0x15   : > { %v189_v1 = vld [vmem:[%s1356_s27] sm:$0xff]  ;;  %v1048_v2 = vld [vmem:[%s1356_s27 + $0x8] sm:$0xff]  ;;  %v1057_v4 = vld [vmem:[%s1356_s27 + $0x10] sm:$0xff]  ;;  %s1415_s9 = scalar_lea.vmem %s1466_s2, %s1043_s6 }
  0x16   : > { %1153 = vmatprep.subr.mxu0 %v189_v1  ;;  %1161 = vmatprep.subr.mxu1 %v1048_v2  ;;  %v1066_v5 = vld [vmem:[%s1356_s27 + $0x18] sm:$0xff]  ;;  %v1075_v8 = vld [vmem:[%s1356_s27 + $0x20] sm:$0xff]  ;;  %v1084_v9 = vld [vmem:[%s1356_s27 + $0x28] sm:$0xff] }
  0x17   : > { %1154 = vmatpush3.msra.mxu0 %v189_v1  ;;  %1162 = vmatpush3.msra.mxu1 %v1048_v2  ;;  %v1093_v10 = vld [vmem:[%s1356_s27 + $0x30] sm:$0xff]  ;;  %v1102_v11 = vld [vmem:[%s1356_s27 + $0x38] sm:$0xff] }
  0x18   : > { %1156 = vmatmul.mubr.msk.f32.vlgmr.msra.gmra.mrb[0].mxu0 %vm190_vm0, %v186_v3  ;;  %1164 = vmatmul.mubr.msk.f32.vlgmr.msra.gmra.mrb[0].mxu1 %vm190_vm0, %v186_v3 }
  0x19   : > { %1169 = vmatprep.subr.mxu0 %v1057_v4  ;;  %1177 = vmatprep.subr.mxu1 %v1066_v5 }
  0x1a   : > { %1170 = vmatpush3.msra.mxu0 %v1057_v4  ;;  %1178 = vmatpush3.msra.mxu1 %v1066_v5 }
  0x1b   : > { %1158 = vmatprep.mubr.msk.f32.mxu0 %vm190_vm0, %v187_v6  ;;  %1166 = vmatprep.mubr.msk.f32.mxu1 %vm190_vm0, %v187_v6 }
  0x1c   : > { %1159 = vmatmul.mubr.msk.f32.gmra.mrb[2].mxu0 %vm190_vm0, %v188_v7  ;;  %1167 = vmatmul.mubr.msk.f32.gmra.mrb[2].mxu1 %vm190_vm0, %v188_v7 }
  0x1d   : > { %1171 = vmatprep.mubr.msk.f32.mxu0 %vm190_vm0, %v1345_v0  ;;  %1179 = vmatprep.mubr.msk.f32.mxu1 %vm190_vm0, %v1345_v0 }
  0x1e   : > { %1185 = vmatprep.subr.mxu0 %v1075_v8  ;;  %1193 = vmatprep.subr.mxu1 %v1084_v9 }
  0x20   : > { %1172 = vmatmul.mubr.msk.f32.vlgmr.msra.gmra.mrb[4].mxu0 %vm190_vm0, %v186_v3  ;;  %1180 = vmatmul.mubr.msk.f32.vlgmr.msra.gmra.mrb[4].mxu1 %vm190_vm0, %v186_v3 }
  0x21   : > { %1186 = vmatpush3.msra.mxu0 %v1075_v8  ;;  %1194 = vmatpush3.msra.mxu1 %v1084_v9 }
  0x22   : > { %1174 = vmatprep.mubr.msk.f32.mxu0 %vm190_vm0, %v187_v6  ;;  %1182 = vmatprep.mubr.msk.f32.mxu1 %vm190_vm0, %v187_v6 }
  0x23   : > { %1201 = vmatprep.subr.mxu0 %v1093_v10  ;;  %1209 = vmatprep.subr.mxu1 %v1102_v11 }
  0x24   : > { %1175 = vmatmul.mubr.msk.f32.gmra.mrb[6].mxu0 %vm190_vm0, %v188_v7  ;;  %1183 = vmatmul.mubr.msk.f32.gmra.mrb[6].mxu1 %vm190_vm0, %v188_v7 }
  0x25   : > { %1187 = vmatprep.mubr.msk.f32.mxu0 %vm190_vm0, %v1345_v0  ;;  %1195 = vmatprep.mubr.msk.f32.mxu1 %vm190_vm0, %v1345_v0 }
  0x28   : > { %1188 = vmatmul.mubr.msk.f32.vlgmr.msra.gmra.mrb[8].mxu0 %vm190_vm0, %v186_v3  ;;  %1196 = vmatmul.mubr.msk.f32.vlgmr.msra.gmra.mrb[8].mxu1 %vm190_vm0, %v186_v3 }
  0x29   : > { %1202 = vmatpush3.msra.mxu0 %v1093_v10  ;;  %1210 = vmatpush3.msra.mxu1 %v1102_v11 }
  0x2a   : > { %1190 = vmatprep.mubr.msk.f32.mxu0 %vm190_vm0, %v187_v6  ;;  %1198 = vmatprep.mubr.msk.f32.mxu1 %vm190_vm0, %v187_v6 }
  0x2c   : > { %1191 = vmatmul.mubr.msk.f32.gmra.mrb[10].mxu0 %vm190_vm0, %v188_v7  ;;  %1199 = vmatmul.mubr.msk.f32.gmra.mrb[10].mxu1 %vm190_vm0, %v188_v7 }
  0x2d   : > { %1203 = vmatprep.mubr.msk.f32.mxu0 %vm190_vm0, %v1345_v0  ;;  %1211 = vmatprep.mubr.msk.f32.mxu1 %vm190_vm0, %v1345_v0 }
  0x30   : > { %1204 = vmatmul.mubr.msk.f32.vlgmr.msra.gmra.mrb[12].mxu0 %vm190_vm0, %v186_v3  ;;  %1212 = vmatmul.mubr.msk.f32.vlgmr.msra.gmra.mrb[12].mxu1 %vm190_vm0, %v186_v3 }
  0x31   : > { %1206 = vmatprep.mubr.msk.f32.mxu0 %vm190_vm0, %v187_v6  ;;  %1214 = vmatprep.mubr.msk.f32.mxu1 %vm190_vm0, %v187_v6 }
  0x34   : > { %1207 = vmatmul.mubr.msk.f32.gmra.mrb[14].mxu0 %vm190_vm0, %v188_v7  ;;  %1215 = vmatmul.mubr.msk.f32.gmra.mrb[14].mxu1 %vm190_vm0, %v188_v7 }
  0xeb   : > { %v1157_v12 = vpop.f32.mrb[0].mxu0  ;;  %v1165_v13 = vpop.f32.mrb[0].mxu1 }
  0xec   : > { %289 = vst [vmem:[%s1415_s9 + $0x8] sm:$0xff] %v1157_v12  ;;  %1054 = vst [vmem:[%s1415_s9 + $0x28] sm:$0xff] %v1165_v13  ;;  %v269_v14 = vpop.f32.mrb[1].mxu0  ;;  %v360_v15 = vpop.f32.mrb[1].mxu1 }
  0xed   : > { %288 = vst [vmem:[%s1415_s9] sm:$0xff] %v269_v14  ;;  %1053 = vst [vmem:[%s1415_s9 + $0x20] sm:$0xff] %v360_v15 }
  0xef   : > { %v1160_v16 = vpop.f32.mrb[2].mxu0  ;;  %v1168_v17 = vpop.f32.mrb[2].mxu1 }
  0xf0   : > { %291 = vst [vmem:[%s1415_s9 + $0x18] sm:$0xff] %v1160_v16  ;;  %1056 = vst [vmem:[%s1415_s9 + $0x38] sm:$0xff] %v1168_v17  ;;  %v279_v18 = vpop.f32.mrb[3].mxu0  ;;  %v370_v19 = vpop.f32.mrb[3].mxu1 }
  0xf1   : > { %290 = vst [vmem:[%s1415_s9 + $0x10] sm:$0xff] %v279_v18  ;;  %1055 = vst [vmem:[%s1415_s9 + $0x30] sm:$0xff] %v370_v19 }
  0xf3   : > { %v1173_v20 = vpop.f32.mrb[4].mxu0  ;;  %v1181_v21 = vpop.f32.mrb[4].mxu1 }
  0xf4   : > { %1063 = vst [vmem:[%s1415_s9 + $0x48] sm:$0xff] %v1173_v20  ;;  %1072 = vst [vmem:[%s1415_s9 + $0x68] sm:$0xff] %v1181_v21  ;;  %v452_v22 = vpop.f32.mrb[5].mxu0  ;;  %v544_v23 = vpop.f32.mrb[5].mxu1 }
  0xf5   : > { %1062 = vst [vmem:[%s1415_s9 + $0x40] sm:$0xff] %v452_v22  ;;  %1071 = vst [vmem:[%s1415_s9 + $0x60] sm:$0xff] %v544_v23 }
  0xf7   : > { %v1176_v24 = vpop.f32.mrb[6].mxu0  ;;  %v1184_v25 = vpop.f32.mrb[6].mxu1 }
  0xf8   : > { %1065 = vst [vmem:[%s1415_s9 + $0x58] sm:$0xff] %v1176_v24  ;;  %1074 = vst [vmem:[%s1415_s9 + $0x78] sm:$0xff] %v1184_v25  ;;  %v462_v26 = vpop.f32.mrb[7].mxu0  ;;  %v554_v27 = vpop.f32.mrb[7].mxu1 }
  0xf9   : > { %1064 = vst [vmem:[%s1415_s9 + $0x50] sm:$0xff] %v462_v26  ;;  %1073 = vst [vmem:[%s1415_s9 + $0x70] sm:$0xff] %v554_v27 }
  0xfb   : > { %v1189_v28 = vpop.f32.mrb[8].mxu0  ;;  %v1197_v29 = vpop.f32.mrb[8].mxu1 }
  0xfc   : > { %1081 = vst [vmem:[%s1415_s9 + $0x88] sm:$0xff] %v1189_v28  ;;  %1090 = vst [vmem:[%s1415_s9 + $0xa8] sm:$0xff] %v1197_v29  ;;  %v636_v30 = vpop.f32.mrb[9].mxu0  ;;  %v728_v31 = vpop.f32.mrb[9].mxu1 }
  0xfd   : > { %1080 = vst [vmem:[%s1415_s9 + $0x80] sm:$0xff] %v636_v30  ;;  %1089 = vst [vmem:[%s1415_s9 + $0xa0] sm:$0xff] %v728_v31 }
  0xff   : > { %v1192_v32 = vpop.f32.mrb[10].mxu0  ;;  %v1200_v33 = vpop.f32.mrb[10].mxu1 }
 0x100   : > { %1083 = vst [vmem:[%s1415_s9 + $0x98] sm:$0xff] %v1192_v32  ;;  %1092 = vst [vmem:[%s1415_s9 + $0xb8] sm:$0xff] %v1200_v33  ;;  %v646_v34 = vpop.f32.mrb[11].mxu0  ;;  %v738_v35 = vpop.f32.mrb[11].mxu1 }
 0x101   : > { %1082 = vst [vmem:[%s1415_s9 + $0x90] sm:$0xff] %v646_v34  ;;  %1091 = vst [vmem:[%s1415_s9 + $0xb0] sm:$0xff] %v738_v35 }
 0x103   : > { %v1205_v36 = vpop.f32.mrb[12].mxu0  ;;  %v1213_v37 = vpop.f32.mrb[12].mxu1 }
 0x104   : > { %1099 = vst [vmem:[%s1415_s9 + $0xc8] sm:$0xff] %v1205_v36  ;;  %1108 = vst [vmem:[%s1415_s9 + $0xe8] sm:$0xff] %v1213_v37  ;;  %v820_v38 = vpop.f32.mrb[13].mxu0  ;;  %v912_v39 = vpop.f32.mrb[13].mxu1 }
 0x105   : > { %1098 = vst [vmem:[%s1415_s9 + $0xc0] sm:$0xff] %v820_v38  ;;  %1107 = vst [vmem:[%s1415_s9 + $0xe0] sm:$0xff] %v912_v39 }
 0x107   : > { %v1208_v40 = vpop.f32.mrb[14].mxu0  ;;  %v1216_v41 = vpop.f32.mrb[14].mxu1 }
 0x108   : > { %1101 = vst [vmem:[%s1415_s9 + $0xd8] sm:$0xff] %v1208_v40  ;;  %1110 = vst [vmem:[%s1415_s9 + $0xf8] sm:$0xff] %v1216_v41  ;;  %v830_v42 = vpop.f32.mrb[15].mxu0  ;;  %v922_v43 = vpop.f32.mrb[15].mxu1 }
 0x109   : > { %1100 = vst [vmem:[%s1415_s9 + $0xd0] sm:$0xff] %v830_v42  ;;  %1109 = vst [vmem:[%s1415_s9 + $0xf0] sm:$0xff] %v922_v43 }
 0x10a PF: > { %s12_s13 = sadd.s32 1, %s1295_s13   ;;  %s1467_s9 = smov %s1287_s11 }
 0x10b   : > { %p9_p7 = scmp.ge.s32.totalorder %s12_s13, 10   ;;  %s1468_s10 = smov %s1291_s12 }
 0x10c   : > { %s1469_s11 = smov %s1472_s14  ;;  %s1470_s12 = smov %s1476_s15 }
 0x10d   :  { %11 = sbr.rel (!%p9_p7) target bundleno = 3 (0x3), region = 72 }

// kernel: encoder_decoder_forward.31
= control target key start
LH: loop header
LB: loop body
LE: loop exit
PB: predicated region body
PF: predicated region fallthrough
CT: control target
= control target key end

     0   :  { %s1976_s4 = inlined_call_operand.vmem [shape: bf16[512,128], index: 4, kind: input, shape index: {}]   ;;  %s1977_s0 = inlined_call_operand.vmem [shape: bf16[128,128], index: 0, kind: input, shape index: {}]   ;;  %s1978_s2 = inlined_call_operand.vmem [shape: bf16[128,128], index: 2, kind: input, shape index: {}]   ;;  %s1979_s1 = inlined_call_operand.vmem [shape: bf16[128,128], index: 1, kind: input, shape index: {}]   ;;  %s1980_s3 = inlined_call_operand.vmem [shape: bf16[128,128], index: 3, kind: input, shape index: {}]   ;;  %s1981_s6 = inlined_call_operand.vmem [shape: bf16[128,128], index: 6, kind: input, shape index: {}]   ;;  %s1982_s5 = inlined_call_operand.vmem [shape: f32[1,128], index: 5, kind: input, shape index: {}]   ;;  %s1983_s7 = inlined_call_operand.vmem [shape: f32[1,128], index: 7, kind: input, shape index: {}]   ;;  %s1984_s8 = inlined_call_operand.vmem [shape: f32[128,128], index: 8, kind: output, shape index: {}]  }
   0x1   :  { %v1559_v0 = vld [vmem:[%s1976_s4] sm:$0xff]   ;;  %v1560_v1 = vld [vmem:[%s1976_s4 + $0x8] sm:$0xff]   ;;  %v1561_v2 = vld [vmem:[%s1976_s4 + $0x10] sm:$0xff]  }
   0x2   :  { %1383 = vmatprep.subr.bf16.mxu0 %v1559_v0  ;;  %v1562_v3 = vld [vmem:[%s1976_s4 + $0x18] sm:$0xff]   ;;  %v1567_v4 = vld [vmem:[%s1977_s0] sm:$0xff]   ;;  %v1564_v6 = vld [vmem:[%s1976_s4 + $0x28] sm:$0xff]  }
   0x3   :  { %1384 = vmatpush3.bf16.msra.mxu0 %v1559_v0  ;;  %1399 = vmatprep.mubr.bf16.mxu0 %v1567_v4  ;;  %v1563_v5 = vld [vmem:[%s1976_s4 + $0x20] sm:$0xff]   ;;  %v1565_v7 = vld [vmem:[%s1976_s4 + $0x30] sm:$0xff]   ;;  %v1566_v8 = vld [vmem:[%s1976_s4 + $0x38] sm:$0xff]  }
   0x4   :  { %1385 = vmatprep.subr.bf16.mxu0 %v1560_v1  ;;  %v1583_v9 = vld [vmem:[%s1976_s4 + $0x40] sm:$0xff]   ;;  %v1587_v11 = vld [vmem:[%s1976_s4 + $0x48] sm:$0xff]   ;;  %v1589_v13 = vld [vmem:[%s1976_s4 + $0x50] sm:$0xff]  }
   0x5   :  { %1351 = vmatprep.subr.bf16.mxu1 %v1583_v9  ;;  %v1569_v10 = vld [vmem:[%s1976_s4 + $0x80] sm:$0xff]   ;;  %v1568_v12 = vld [vmem:[%s1977_s0 + $0x8] sm:$0xff]   ;;  %v1571_v14 = vld [vmem:[%s1977_s0 + $0x10] sm:$0xff]  }
   0x6   :  { %1352 = vmatpush3.bf16.msra.mxu1 %v1583_v9  ;;  %v1570_v15 = vld [vmem:[%s1976_s4 + $0x88] sm:$0xff]   ;;  %v1593_v16 = vld [vmem:[%s1976_s4 + $0x58] sm:$0xff]   ;;  %v1573_v17 = vld [vmem:[%s1976_s4 + $0x90] sm:$0xff]  }
   0x7   :  { %1386 = vmatpush3.bf16.msra.mxu0 %v1560_v1  ;;  %1353 = vmatprep.subr.bf16.mxu1 %v1587_v11  ;;  %v1595_v18 = vld [vmem:[%s1976_s4 + $0x60] sm:$0xff]   ;;  %v1572_v19 = vld [vmem:[%s1977_s0 + $0x18] sm:$0xff]   ;;  %v1599_v22 = vld [vmem:[%s1976_s4 + $0x68] sm:$0xff]  }
   0x8   :  { %1387 = vmatprep.subr.bf16.mxu0 %v1561_v2  ;;  %v1575_v20 = vld [vmem:[%s1977_s0 + $0x20] sm:$0xff]   ;;  %v1574_v21 = vld [vmem:[%s1976_s4 + $0x98] sm:$0xff]   ;;  %v1576_v23 = vld [vmem:[%s1977_s0 + $0x28] sm:$0xff]  }
   0x9   :  { %v1577_v24 = vld [vmem:[%s1976_s4 + $0xa0] sm:$0xff]   ;;  %v1601_v25 = vld [vmem:[%s1976_s4 + $0x70] sm:$0xff]   ;;  %v1578_v26 = vld [vmem:[%s1976_s4 + $0xa8] sm:$0xff]  }
   0xa   :  { %1354 = vmatpush3.bf16.msra.mxu1 %v1587_v11  ;;  %v1579_v27 = vld [vmem:[%s1977_s0 + $0x30] sm:$0xff]   ;;  %v1607_v28 = vld [vmem:[%s1979_s1] sm:$0xff]   ;;  %v1605_v29 = vld [vmem:[%s1976_s4 + $0x78] sm:$0xff]  }
   0xb   :  { %1388 = vmatpush3.bf16.msra.mxu0 %v1561_v2  ;;  %1355 = vmatprep.subr.bf16.mxu1 %v1589_v13  ;;  %v1581_v30 = vld [vmem:[%s1976_s4 + $0xb0] sm:$0xff]   ;;  %v1580_v31 = vld [vmem:[%s1977_s0 + $0x38] sm:$0xff]   ;;  %v1584_v33 = vld [vmem:[%s1978_s2] sm:$0xff]  }
   0xc   :  { %1389 = vmatprep.subr.bf16.mxu0 %v1562_v3  ;;  %1367 = vmatprep.mubr.bf16.mxu1 %v1607_v28  ;;  %v1582_v32 = vld [vmem:[%s1976_s4 + $0xb8] sm:$0xff]   ;;  %v1608_v34 = vld [vmem:[%s1979_s1 + $0x8] sm:$0xff]   ;;  %v1611_v35 = vld [vmem:[%s1979_s1 + $0x10] sm:$0xff]  }
   0xd   :  { %v1586_v36 = vld [vmem:[%s1976_s4 + $0xc0] sm:$0xff]   ;;  %v1585_v37 = vld [vmem:[%s1978_s2 + $0x8] sm:$0xff]   ;;  %v1590_v39 = vld [vmem:[%s1978_s2 + $0x10] sm:$0xff]  }
   0xe   :  { %1356 = vmatpush3.bf16.msra.mxu1 %v1589_v13  ;;  %v1588_v38 = vld [vmem:[%s1976_s4 + $0xc8] sm:$0xff]   ;;  %v1612_v40 = vld [vmem:[%s1979_s1 + $0x18] sm:$0xff]   ;;  %v1623_v41 = vld [vmem:[%s1981_s6] sm:$0xff]  }
   0xf   :  { %1390 = vmatpush3.bf16.msra.mxu0 %v1562_v3  ;;  %1357 = vmatprep.subr.bf16.mxu1 %v1593_v16  ;;  %v1615_v42 = vld [vmem:[%s1979_s1 + $0x20] sm:$0xff]   ;;  %v1624_v43 = vld [vmem:[%s1981_s6 + $0x8] sm:$0xff]   ;;  %v1592_v44 = vld [vmem:[%s1976_s4 + $0xd0] sm:$0xff]  }
  0x10   :  { %1391 = vmatprep.subr.bf16.mxu0 %v1563_v5  ;;  %v1591_v45 = vld [vmem:[%s1978_s2 + $0x18] sm:$0xff]   ;;  %v1625_v46 = vld [vmem:[%s1981_s6 + $0x10] sm:$0xff]   ;;  %v1596_v47 = vld [vmem:[%s1978_s2 + $0x20] sm:$0xff]  }
  0x11   :  { %v1594_v48 = vld [vmem:[%s1976_s4 + $0xd8] sm:$0xff]   ;;  %v1616_v49 = vld [vmem:[%s1979_s1 + $0x28] sm:$0xff]   ;;  %v1619_v50 = vld [vmem:[%s1979_s1 + $0x30] sm:$0xff]  }
  0x12   :  { %1358 = vmatpush3.bf16.msra.mxu1 %v1593_v16  ;;  %v1626_v51 = vld [vmem:[%s1981_s6 + $0x18] sm:$0xff]   ;;  %v1598_v52 = vld [vmem:[%s1976_s4 + $0xe0] sm:$0xff]   ;;  %v1597_v53 = vld [vmem:[%s1978_s2 + $0x28] sm:$0xff]  }
  0x13   :  { %1392 = vmatpush3.bf16.msra.mxu0 %v1563_v5  ;;  %1359 = vmatprep.subr.bf16.mxu1 %v1595_v18  ;;  %v1627_v54 = vld [vmem:[%s1981_s6 + $0x20] sm:$0xff]   ;;  %v1602_v55 = vld [vmem:[%s1978_s2 + $0x30] sm:$0xff]   ;;  %v1600_v56 = vld [vmem:[%s1976_s4 + $0xe8] sm:$0xff]  }
  0x14   :  { %1393 = vmatprep.subr.bf16.mxu0 %v1564_v6  ;;  %v1620_v57 = vld [vmem:[%s1979_s1 + $0x38] sm:$0xff]   ;;  %v1604_v58 = vld [vmem:[%s1976_s4 + $0xf0] sm:$0xff]   ;;  %v1609_v60 = vld [vmem:[%s1980_s3] sm:$0xff]  }
  0x15   :  { %v1603_v59 = vld [vmem:[%s1978_s2 + $0x38] sm:$0xff]   ;;  %v1610_v62 = vld [vmem:[%s1980_s3 + $0x8] sm:$0xff]   ;;  %v1613_v63 = vld [vmem:[%s1980_s3 + $0x10] sm:$0xff]  }
  0x16   :  { %1360 = vmatpush3.bf16.msra.mxu1 %v1595_v18  ;;  %v1606_v61 = vld [vmem:[%s1976_s4 + $0xf8] sm:$0xff]   ;;  %v1617_v1 = vld [vmem:[%s1980_s3 + $0x20] sm:$0xff]   ;;  %v1618_v2 = vld [vmem:[%s1980_s3 + $0x28] sm:$0xff]  }
  0x17   :  { %1394 = vmatpush3.bf16.msra.mxu0 %v1564_v6  ;;  %1361 = vmatprep.subr.bf16.mxu1 %v1599_v22  ;;  %v1614_v0 = vld [vmem:[%s1980_s3 + $0x18] sm:$0xff]   ;;  %v1621_v3 = vld [vmem:[%s1980_s3 + $0x30] sm:$0xff]   ;;  %v1628_v5 = vld [vmem:[%s1981_s6 + $0x28] sm:$0xff]  }
  0x18   :  { %1395 = vmatprep.subr.bf16.mxu0 %v1565_v7  ;;  %v1622_v4 = vld [vmem:[%s1980_s3 + $0x38] sm:$0xff]   ;;  %v1629_v6 = vld [vmem:[%s1981_s6 + $0x30] sm:$0xff]  }
  0x1a   :  { %1362 = vmatpush3.bf16.msra.mxu1 %v1599_v22 }
  0x1b   :  { %1396 = vmatpush3.bf16.msra.mxu0 %v1565_v7  ;;  %1363 = vmatprep.subr.bf16.mxu1 %v1601_v25  ;;  %v1630_v7 = vld [vmem:[%s1981_s6 + $0x38] sm:$0xff]  }
  0x1c   :  { %1397 = vmatprep.subr.bf16.mxu0 %v1566_v8 }
  0x1e   :  { %1364 = vmatpush3.bf16.msra.mxu1 %v1601_v25  ;;  %v1903_v25 = vld [vmem:[%s1982_s5] ss:$0 sm:$0xff] }
  0x1f   :  { %1398 = vmatpush3.bf16.msra.mxu0 %v1566_v8  ;;  %1365 = vmatprep.subr.bf16.mxu1 %v1605_v29 }
  0x20   :  { %1415 = vmatprep.subr.bf16.mxu0 %v1569_v10 }
  0x22   :  { %1400 = vmatmul.mubr.bf16.vlgmr.msra.gmra.mrb[0].mxu0 %v1568_v12  ;;  %1366 = vmatpush3.bf16.msra.mxu1 %v1605_v29 }
  0x23   :  { %1416 = vmatpush3.bf16.msra.mxu0 %v1569_v10  ;;  %1403 = vmatprep.mubr.bf16.mxu0 %v1571_v14 }
  0x24   :  { %1417 = vmatprep.subr.bf16.mxu0 %v1570_v15  ;;  %1479 = vmatprep.subr.bf16.mxu1 %v1623_v41 }
  0x25   :  { %1368 = vmatmul.mubr.bf16.vlgmr.msra.gmra.mrb[0].mxu1 %v1608_v34 }
  0x26   :  { %1371 = vmatprep.mubr.bf16.mxu1 %v1611_v35  ;;  %1480 = vmatpush3.bf16.msra.mxu1 %v1623_v41 }
  0x27   :  { %1418 = vmatpush3.bf16.msra.mxu0 %v1570_v15  ;;  %1481 = vmatprep.subr.bf16.mxu1 %v1624_v43 }
  0x28   :  { %1419 = vmatprep.subr.bf16.mxu0 %v1573_v17 }
  0x2a   :  { %1404 = vmatmul.mubr.bf16.gmra.mrb[4].mxu0 %v1572_v19  ;;  %1482 = vmatpush3.bf16.msra.mxu1 %v1624_v43 }
  0x2b   :  { %1420 = vmatpush3.bf16.msra.mxu0 %v1573_v17  ;;  %1407 = vmatprep.mubr.bf16.mxu0 %v1575_v20 }
  0x2c   :  { %1421 = vmatprep.subr.bf16.mxu0 %v1574_v21  ;;  %1483 = vmatprep.subr.bf16.mxu1 %v1625_v46 }
  0x2d   :  { %1372 = vmatmul.mubr.bf16.gmra.mrb[4].mxu1 %v1612_v40 }
  0x2e   :  { %1375 = vmatprep.mubr.bf16.mxu1 %v1615_v42  ;;  %1484 = vmatpush3.bf16.msra.mxu1 %v1625_v46 }
  0x2f   :  { %1422 = vmatpush3.bf16.msra.mxu0 %v1574_v21  ;;  %1485 = vmatprep.subr.bf16.mxu1 %v1626_v51 }
  0x30   :  { %1423 = vmatprep.subr.bf16.mxu0 %v1577_v24 }
  0x32   :  { %1408 = vmatmul.mubr.bf16.gmra.mrb[8].mxu0 %v1576_v23  ;;  %1486 = vmatpush3.bf16.msra.mxu1 %v1626_v51 }
  0x33   :  { %1424 = vmatpush3.bf16.msra.mxu0 %v1577_v24  ;;  %1411 = vmatprep.mubr.bf16.mxu0 %v1579_v27 }
  0x34   :  { %1425 = vmatprep.subr.bf16.mxu0 %v1578_v26  ;;  %1487 = vmatprep.subr.bf16.mxu1 %v1627_v54 }
  0x35   :  { %1376 = vmatmul.mubr.bf16.gmra.mrb[8].mxu1 %v1616_v49 }
  0x36   :  { %1379 = vmatprep.mubr.bf16.mxu1 %v1619_v50  ;;  %1488 = vmatpush3.bf16.msra.mxu1 %v1627_v54 }
  0x37   :  { %1426 = vmatpush3.bf16.msra.mxu0 %v1578_v26  ;;  %1489 = vmatprep.subr.bf16.mxu1 %v1628_v5 }
  0x38   :  { %1427 = vmatprep.subr.bf16.mxu0 %v1581_v30 }
  0x3a   :  { %1412 = vmatmul.mubr.bf16.gmra.mrb[12].mxu0 %v1580_v31  ;;  %1490 = vmatpush3.bf16.msra.mxu1 %v1628_v5 }
  0x3b   :  { %1428 = vmatpush3.bf16.msra.mxu0 %v1581_v30  ;;  %1431 = vmatprep.mubr.bf16.mxu0 %v1584_v33 }
  0x3c   :  { %1429 = vmatprep.subr.bf16.mxu0 %v1582_v32  ;;  %1491 = vmatprep.subr.bf16.mxu1 %v1629_v6 }
  0x3d   :  { %1380 = vmatmul.mubr.bf16.gmra.mrb[12].mxu1 %v1620_v57 }
  0x3e   :  { %1492 = vmatpush3.bf16.msra.mxu1 %v1629_v6 }
  0x3f   :  { %1430 = vmatpush3.bf16.msra.mxu0 %v1582_v32  ;;  %1493 = vmatprep.subr.bf16.mxu1 %v1630_v7 }
  0x40   :  { %1447 = vmatprep.subr.bf16.mxu0 %v1586_v36 }
  0x42   :  { %1432 = vmatmul.mubr.bf16.vlgmr.msra.gmra.mrb[0].mxu0 %v1585_v37  ;;  %1494 = vmatpush3.bf16.msra.mxu1 %v1630_v7 }
  0x43   :  { %1448 = vmatpush3.bf16.msra.mxu0 %v1586_v36  ;;  %1435 = vmatprep.mubr.bf16.mxu0 %v1590_v39 }
  0x44   :  { %1449 = vmatprep.subr.bf16.mxu0 %v1588_v38 }
  0x47   :  { %1450 = vmatpush3.bf16.msra.mxu0 %v1588_v38 }
  0x48   :  { %1451 = vmatprep.subr.bf16.mxu0 %v1592_v44 }
  0x4a   :  { %1436 = vmatmul.mubr.bf16.gmra.mrb[4].mxu0 %v1591_v45 }
  0x4b   :  { %1452 = vmatpush3.bf16.msra.mxu0 %v1592_v44  ;;  %1439 = vmatprep.mubr.bf16.mxu0 %v1596_v47 }
  0x4c   :  { %1453 = vmatprep.subr.bf16.mxu0 %v1594_v48 }
  0x4f   :  { %1454 = vmatpush3.bf16.msra.mxu0 %v1594_v48 }
  0x50   :  { %1455 = vmatprep.subr.bf16.mxu0 %v1598_v52 }
  0x52   :  { %1440 = vmatmul.mubr.bf16.gmra.mrb[8].mxu0 %v1597_v53 }
  0x53   :  { %1456 = vmatpush3.bf16.msra.mxu0 %v1598_v52  ;;  %1443 = vmatprep.mubr.bf16.mxu0 %v1602_v55 }
  0x54   :  { %1457 = vmatprep.subr.bf16.mxu0 %v1600_v56 }
  0x57   :  { %1458 = vmatpush3.bf16.msra.mxu0 %v1600_v56 }
  0x58   :  { %1459 = vmatprep.subr.bf16.mxu0 %v1604_v58 }
  0x5a   :  { %1444 = vmatmul.mubr.bf16.gmra.mrb[12].mxu0 %v1603_v59 }
  0x5b   :  { %1460 = vmatpush3.bf16.msra.mxu0 %v1604_v58  ;;  %1463 = vmatprep.mubr.bf16.mxu0 %v1609_v60 }
  0x5c   :  { %1461 = vmatprep.subr.bf16.mxu0 %v1606_v61 }
  0x5f   :  { %1462 = vmatpush3.bf16.msra.mxu0 %v1606_v61 }
  0x62   :  { %1464 = vmatmul.mubr.bf16.vlgmr.msra.gmra.mrb[0].mxu0 %v1610_v62 }
  0x63   :  { %1467 = vmatprep.mubr.bf16.mxu0 %v1613_v63 }
  0x6a   :  { %1468 = vmatmul.mubr.bf16.gmra.mrb[4].mxu0 %v1614_v0 }
  0x6b   :  { %1471 = vmatprep.mubr.bf16.mxu0 %v1617_v1 }
  0x72   :  { %1472 = vmatmul.mubr.bf16.gmra.mrb[8].mxu0 %v1618_v2 }
  0x73   :  { %1475 = vmatprep.mubr.bf16.mxu0 %v1621_v3 }
  0x7a   :  { %1476 = vmatmul.mubr.bf16.gmra.mrb[12].mxu0 %v1622_v4 }
  0xf8   :  { %v1369_v8 = vpop.f32.mrb[0].mxu1 }
  0xf9   :  { %v224_v9 = vpop.f32.mrb[1].mxu1 }
  0xfa   :  { %v1370_v10 = vpop.f32.mrb[2].mxu1 }
  0xfb   :  { %v227_v11 = vpop.f32.mrb[3].mxu1 }
 0x100   :  { %v1373_v12 = vpop.f32.mrb[4].mxu1 }
 0x101   :  { %v240_v13 = vpop.f32.mrb[5].mxu1 }
 0x102   :  { %v1374_v14 = vpop.f32.mrb[6].mxu1 }
 0x103   :  { %v243_v15 = vpop.f32.mrb[7].mxu1 }
 0x108   :  { %v1377_v16 = vpop.f32.mrb[8].mxu1 }
 0x109   :  { %v256_v17 = vpop.f32.mrb[9].mxu1 }
 0x10a   :  { %v1378_v18 = vpop.f32.mrb[10].mxu1 }
 0x10b   :  { %v259_v19 = vpop.f32.mrb[11].mxu1 }
 0x110   :  { %v1892_v20 = vpop.f32.mrb[12].mxu1 }
 0x111   :  { %v1894_v21 = vpop.f32.mrb[13].mxu1 }
 0x112   :  { %v1896_v22 = vpop.f32.mrb[14].mxu1 }
 0x113   :  { %v1898_v23 = vpop.f32.mrb[15].mxu1 }
 0x135   :  { %v1465_v24 = vpop.f32.mrb[0].mxu0 }
 0x136   :  { %v1511_v26 = vadd.f32 %v1465_v24, %v1369_v8  ;;  %v883_v27 = vpop.f32.mrb[1].mxu0 }
 0x137   :  { %v1512_v28 = vadd.f32 %v883_v27, %v224_v9  ;;  %v1466_v29 = vpop.f32.mrb[2].mxu0 }
 0x138   :  { %v971_v30 = vadd.f32 %v1511_v26, %v1903_v25  ;;  %v1513_v31 = vadd.f32 %v1466_v29, %v1370_v10  ;;  %v886_v32 = vpop.f32.mrb[3].mxu0 }
 0x139   :  { %v969_v33 = vadd.f32 %v1512_v28, %v1903_v25  ;;  %v1514_v34 = vadd.f32 %v886_v32, %v227_v11 }
 0x13a   :  { %v972_v35 = vadd.f32 %v1513_v31, %v1903_v25  ;;  %v987_v37 = vmax.f32 %v971_v30, 0.0 }
 0x13b   :  { %v970_v36 = vadd.f32 %v1514_v34, %v1903_v25  ;;  %v985_v39 = vmax.f32 %v969_v33, 0.0 }
 0x13c   :  { %v988_v38 = vmax.f32 %v972_v35, 0.0 }
 0x13d   :  { %v986_v40 = vmax.f32 %v970_v36, 0.0  ;;  %v1469_v41 = vpop.f32.mrb[4].mxu0 }
 0x13e   :  { %v1002_v42 = vpack.c.bf16 %v988_v38, %v987_v37  ;;  %v1515_v43 = vadd.f32 %v1469_v41, %v1373_v12  ;;  %v899_v44 = vpop.f32.mrb[5].mxu0 }
 0x13f   :  { %v1516_v45 = vadd.f32 %v899_v44, %v240_v13  ;;  %v1470_v46 = vpop.f32.mrb[6].mxu0  ;;  %v1001_v47 = vpack.c.bf16 %v986_v40, %v985_v39 }
 0x140   :  { %v975_v48 = vadd.f32 %v1515_v43, %v1903_v25  ;;  %v1517_v49 = vadd.f32 %v1470_v46, %v1374_v14  ;;  %v902_v50 = vpop.f32.mrb[7].mxu0 }
 0x141   :  { %v973_v51 = vadd.f32 %v1516_v45, %v1903_v25  ;;  %v1518_v52 = vadd.f32 %v902_v50, %v243_v15  ;;  %1495 = vmatprep.mubr.bf16.mxu1 %v1001_v47 }
 0x142   :  { %v976_v53 = vadd.f32 %v1517_v49, %v1903_v25  ;;  %1496 = vmatmul.mubr.bf16.vlgmr.msra.gmra.mrb[16].mxu1 %v1002_v42  ;;  %v991_v55 = vmax.f32 %v975_v48, 0.0 }
 0x143   :  { %v974_v54 = vadd.f32 %v1518_v52, %v1903_v25  ;;  %v989_v57 = vmax.f32 %v973_v51, 0.0 }
 0x144   :  { %v992_v56 = vmax.f32 %v976_v53, 0.0 }
 0x145   :  { %v990_v58 = vmax.f32 %v974_v54, 0.0  ;;  %v1473_v59 = vpop.f32.mrb[8].mxu0 }
 0x146   :  { %v1519_v60 = vadd.f32 %v1473_v59, %v1377_v16  ;;  %v915_v61 = vpop.f32.mrb[9].mxu0  ;;  %v1004_v62 = vpack.c.bf16 %v992_v56, %v991_v55 }
 0x147   :  { %v1520_v63 = vadd.f32 %v915_v61, %v256_v17  ;;  %v1474_v0 = vpop.f32.mrb[10].mxu0  ;;  %v1003_v1 = vpack.c.bf16 %v990_v58, %v989_v57 }
 0x148   :  { %v979_v2 = vadd.f32 %v1519_v60, %v1903_v25  ;;  %v1521_v3 = vadd.f32 %v1474_v0, %v1378_v18  ;;  %v918_v4 = vpop.f32.mrb[11].mxu0 }
 0x149   :  { %v977_v5 = vadd.f32 %v1520_v63, %v1903_v25  ;;  %v1522_v6 = vadd.f32 %v918_v4, %v259_v19  ;;  %1499 = vmatprep.mubr.bf16.mxu1 %v1003_v1 }
 0x14a   :  { %v980_v7 = vadd.f32 %v1521_v3, %v1903_v25  ;;  %1500 = vmatmul.mubr.bf16.gmra.mrb[20].mxu1 %v1004_v62  ;;  %v995_v9 = vmax.f32 %v979_v2, 0.0 }
 0x14b   :  { %v978_v8 = vadd.f32 %v1522_v6, %v1903_v25  ;;  %v993_v11 = vmax.f32 %v977_v5, 0.0 }
 0x14c   :  { %v996_v10 = vmax.f32 %v980_v7, 0.0 }
 0x14d   :  { %v994_v12 = vmax.f32 %v978_v8, 0.0  ;;  %v1477_v13 = vpop.f32.mrb[12].mxu0 }
 0x14e   :  { %v1523_v14 = vadd.f32 %v1477_v13, %v1892_v20  ;;  %v931_v15 = vpop.f32.mrb[13].mxu0  ;;  %v1006_v16 = vpack.c.bf16 %v996_v10, %v995_v9 }
 0x14f   :  { %v1524_v17 = vadd.f32 %v931_v15, %v1894_v21  ;;  %v1478_v18 = vpop.f32.mrb[14].mxu0  ;;  %v1005_v24 = vpack.c.bf16 %v994_v12, %v993_v11 }
 0x150   :  { %v983_v19 = vadd.f32 %v1523_v14, %v1903_v25  ;;  %v1525_v26 = vadd.f32 %v1478_v18, %v1896_v22  ;;  %v934_v27 = vpop.f32.mrb[15].mxu0  ;;  %v1262_v22 = vld [vmem:[%s1983_s7] ss:$0 sm:$0xff] }
 0x151   :  { %v981_v28 = vadd.f32 %v1524_v17, %v1903_v25  ;;  %v1526_v29 = vadd.f32 %v934_v27, %v1898_v23  ;;  %1503 = vmatprep.mubr.bf16.mxu1 %v1005_v24 }
 0x152   :  { %v984_v30 = vadd.f32 %v1525_v26, %v1903_v25  ;;  %1504 = vmatmul.mubr.bf16.gmra.mrb[24].mxu1 %v1006_v16  ;;  %v999_v31 = vmax.f32 %v983_v19, 0.0 }
 0x153   :  { %v982_v20 = vadd.f32 %v1526_v29, %v1903_v25  ;;  %v997_v21 = vmax.f32 %v981_v28, 0.0 }
 0x154   :  { %v1000_v32 = vmax.f32 %v984_v30, 0.0 }
 0x155   :  { %v998_v33 = vmax.f32 %v982_v20, 0.0 }
 0x156   :  { %v1008_v34 = vpack.c.bf16 %v1000_v32, %v999_v31 }
 0x157   :  { %v1007_v35 = vpack.c.bf16 %v998_v33, %v997_v21 }
 0x159   :  { %1507 = vmatprep.mubr.bf16.mxu1 %v1007_v35 }
 0x15a   :  { %1508 = vmatmul.mubr.bf16.gmra.mrb[28].mxu1 %v1008_v34 }
 0x215   :  { %v1497_v36 = vpop.f32.mrb[16].mxu1 }
 0x216   :  { %v1123_v23 = vadd.f32 %v1497_v36, %v1262_v22  ;;  %v1114_v37 = vpop.f32.mrb[17].mxu1 }
 0x217   :  { %v1115_v38 = vadd.f32 %v1262_v22, %v1114_v37  ;;  %v1498_v39 = vpop.f32.mrb[18].mxu1 }
 0x218   :  { %1179 = vst [vmem:[%s1984_s8 + $0x10] sm:$0xff] %v1123_v23  ;;  %v1126_v25 = vadd.f32 %v1498_v39, %v1262_v22  ;;  %v1117_v40 = vpop.f32.mrb[19].mxu1 }
 0x219   :  { %1177 = vst [vmem:[%s1984_s8] sm:$0xff] %v1115_v38  ;;  %v1118_v41 = vadd.f32 %v1262_v22, %v1117_v40 }
 0x21a   :  { %1180 = vst [vmem:[%s1984_s8 + $0x18] sm:$0xff] %v1126_v25 }
 0x21b   :  { %1178 = vst [vmem:[%s1984_s8 + $0x8] sm:$0xff] %v1118_v41 }
 0x21d   :  { %v1501_v42 = vpop.f32.mrb[20].mxu1 }
 0x21e   :  { %v1139_v43 = vadd.f32 %v1501_v42, %v1262_v22  ;;  %v1130_v44 = vpop.f32.mrb[21].mxu1 }
 0x21f   :  { %v1131_v45 = vadd.f32 %v1262_v22, %v1130_v44  ;;  %v1502_v46 = vpop.f32.mrb[22].mxu1 }
 0x220   :  { %1183 = vst [vmem:[%s1984_s8 + $0x30] sm:$0xff] %v1139_v43  ;;  %v1142_v47 = vadd.f32 %v1502_v46, %v1262_v22  ;;  %v1133_v48 = vpop.f32.mrb[23].mxu1 }
 0x221   :  { %1181 = vst [vmem:[%s1984_s8 + $0x20] sm:$0xff] %v1131_v45  ;;  %v1134_v49 = vadd.f32 %v1262_v22, %v1133_v48 }
 0x222   :  { %1184 = vst [vmem:[%s1984_s8 + $0x38] sm:$0xff] %v1142_v47 }
 0x223   :  { %1182 = vst [vmem:[%s1984_s8 + $0x28] sm:$0xff] %v1134_v49 }
 0x225   :  { %v1505_v50 = vpop.f32.mrb[24].mxu1 }
 0x226   :  { %v1155_v51 = vadd.f32 %v1505_v50, %v1262_v22  ;;  %v1146_v52 = vpop.f32.mrb[25].mxu1 }
 0x227   :  { %v1147_v53 = vadd.f32 %v1262_v22, %v1146_v52  ;;  %v1506_v54 = vpop.f32.mrb[26].mxu1 }
 0x228   :  { %1187 = vst [vmem:[%s1984_s8 + $0x50] sm:$0xff] %v1155_v51  ;;  %v1158_v55 = vadd.f32 %v1506_v54, %v1262_v22  ;;  %v1149_v56 = vpop.f32.mrb[27].mxu1 }
 0x229   :  { %1185 = vst [vmem:[%s1984_s8 + $0x40] sm:$0xff] %v1147_v53  ;;  %v1150_v57 = vadd.f32 %v1262_v22, %v1149_v56 }
 0x22a   :  { %1188 = vst [vmem:[%s1984_s8 + $0x58] sm:$0xff] %v1158_v55 }
 0x22b   :  { %1186 = vst [vmem:[%s1984_s8 + $0x48] sm:$0xff] %v1150_v57 }
 0x22d   :  { %v1509_v58 = vpop.f32.mrb[28].mxu1 }
 0x22e   :  { %v1171_v59 = vadd.f32 %v1509_v58, %v1262_v22  ;;  %v1162_v60 = vpop.f32.mrb[29].mxu1 }
 0x22f   :  { %v1163_v61 = vadd.f32 %v1262_v22, %v1162_v60  ;;  %v1510_v62 = vpop.f32.mrb[30].mxu1 }
 0x230   :  { %1191 = vst [vmem:[%s1984_s8 + $0x70] sm:$0xff] %v1171_v59  ;;  %v1174_v63 = vadd.f32 %v1510_v62, %v1262_v22  ;;  %v1165_v0 = vpop.f32.mrb[31].mxu1 }
 0x231   :  { %1189 = vst [vmem:[%s1984_s8 + $0x60] sm:$0xff] %v1163_v61  ;;  %v1166_v1 = vadd.f32 %v1262_v22, %v1165_v0 }
 0x232   :  { %1192 = vst [vmem:[%s1984_s8 + $0x78] sm:$0xff] %v1174_v63 }
 0x233   :  { %1190 = vst [vmem:[%s1984_s8 + $0x68] sm:$0xff] %v1166_v1 }

</bundles_post_ra>
